<compile_context>
chip_gen: v7x
topology: tpu7x:2x2x1
jax: 0.10.0
libtpu: 0.0.40
codegen_flags: <defaults>
</compile_context>

<pallas_src>
import functools

import jax
import jax.numpy as jnp
from jax import lax
from jax.experimental import pallas as pl
from jax.experimental.pallas import tpu as pltpu


def _basic_block_kernel(xp_ref, w1_ref, s1_ref, b1_ref, w2_ref, s2_ref, b2_ref,
                        o_ref, mid_ref, *, rows_per_slab):
    # xp_ref:  (1, H+2, W+2, Cp)  spatially zero-padded, channel-padded input
    #                             (compute dtype)
    # w1_ref:  (3, 3, Cp, Cp)     conv1 weights, HWIO (compute dtype)
    # s1/b1:   (1, Cp) f32        folded BN1 scale / bias
    # w2_ref:  (3, 3, Cp, Cp)     conv2 weights, HWIO (compute dtype)
    # s2/b2:   (1, Cp) f32        folded BN2 scale / bias
    # o_ref:   (1, H, W, Cp)      output (lane-dense last dim)
    # mid_ref: (H+2, W+2, Cp)     scratch (compute dtype): conv1/bn1/relu result
    _, Hp, Wp, Cp = xp_ref.shape
    H, W = Hp - 2, Wp - 2
    R = rows_per_slab
    n_slabs = H // R
    rem = H - n_slabs * R
    cdt = w1_ref.dtype          # MXU operand dtype (bf16 default, f32 optional)
    mdt = mid_ref.dtype

    s1 = s1_ref[...]
    b1 = b1_ref[...]
    s2 = s2_ref[...]
    b2 = b2_ref[...]

    # Zero only the 1-pixel border ring of the padded mid scratch; the interior
    # is fully overwritten below.  Done every grid step (cheap) so each
    # iteration is self-contained and the batch grid axis can run "parallel".
    zrow = jnp.zeros((Wp, Cp), mdt)
    mid_ref[0, :, :] = zrow
    mid_ref[Hp - 1, :, :] = zrow
    zcol = jnp.zeros((H, 1, Cp), mdt)
    mid_ref[pl.ds(1, H), pl.ds(0, 1), :] = zcol
    mid_ref[pl.ds(1, H), pl.ds(Wp - 1, 1), :] = zcol

    # ---- conv1 (3x3, stride 1, pad 1) + bn1 + relu -> mid interior ----------
    # Each 3x3 tap is one (rows*W, Cp) x (Cp, Cp) MXU matmul; 9 taps accumulated
    # in f32.
    def conv1_slab(r0, rows):
        acc = jnp.zeros((rows * W, Cp), jnp.float32)
        for kh in range(3):
            for kw in range(3):
                patch = xp_ref[0, pl.ds(r0 + kh, rows), pl.ds(kw, W), :]
                patch = patch.reshape(rows * W, Cp).astype(cdt)
                acc = acc + jnp.dot(patch, w1_ref[kh, kw],
                                    preferred_element_type=jnp.float32)
        mid = jnp.maximum(acc * s1 + b1, 0.0)                      # bn1 + relu
        mid_ref[pl.ds(r0 + 1, rows), pl.ds(1, W), :] = (
            mid.reshape(rows, W, Cp).astype(mdt))

    # ---- conv2 (3x3, stride 1, pad 1) + bn2 + residual add + relu -----------
    def conv2_slab(r0, rows):
        acc = jnp.zeros((rows * W, Cp), jnp.float32)
        for kh in range(3):
            for kw in range(3):
                patch = mid_ref[pl.ds(r0 + kh, rows), pl.ds(kw, W), :]
                patch = patch.reshape(rows * W, Cp).astype(cdt)
                acc = acc + jnp.dot(patch, w2_ref[kh, kw],
                                    preferred_element_type=jnp.float32)
        out = (acc * s2 + b2).reshape(rows, W, Cp)                 # bn2
        # Residual read from the interior of the padded input already in VMEM
        # (no separate identity operand); add in f32.
        out = out + xp_ref[0, pl.ds(r0 + 1, rows), pl.ds(1, W), :].astype(
            jnp.float32)
        out = jnp.maximum(out, 0.0)                                # relu
        o_ref[0, pl.ds(r0, rows), :, :] = out.astype(o_ref.dtype)

    def body1(s_idx, carry):
        conv1_slab(pl.multiple_of(s_idx * R, R), R)
        return carry

    lax.fori_loop(0, n_slabs, body1, 0)
    if rem:                       # static ragged tail (avoids the R=1 cliff)
        conv1_slab(n_slabs * R, rem)

    def body2(s_idx, carry):
        conv2_slab(pl.multiple_of(s_idx * R, R), R)
        return carry

    lax.fori_loop(0, n_slabs, body2, 0)
    if rem:
        conv2_slab(n_slabs * R, rem)


def basic_block_forward(x_nchw, params, eps=1e-5,
                        compute_dtype=jnp.bfloat16, out_dtype=None,
                        stride=1, downsample=None):
    """Runs BasicBlock forward. x_nchw: (N, Cin, H, W) float32."""
    if stride != 1 or downsample is not None:
        # TODO(synk): stride-2 / downsample projection path not implemented.
        raise NotImplementedError(
            "Only stride=1, downsample=None (the module defaults) are supported.")

    w1, g1, be1, m1, v1 = (params[k] for k in ("w1", "g1", "be1", "m1", "v1"))
    w2, g2, be2, m2, v2 = (params[k] for k in ("w2", "g2", "be2", "m2", "v2"))

    # Fold BN (eval mode) into per-channel scale / bias (f32).
    s1 = g1 / jnp.sqrt(v1 + eps)
    b1 = be1 - m1 * s1
    s2 = g2 / jnp.sqrt(v2 + eps)
    b2 = be2 - m2 * s2

    # Public API stays NCHW (PyTorch convention); kernel works channels-last.
    x = jnp.transpose(x_nchw, (0, 2, 3, 1))          # NCHW -> NHWC
    N, H, W, Cin = x.shape
    C = w1.shape[-1]
    assert Cin == C, "identity path requires inplanes == planes (downsample=None)"
    if out_dtype is None:
        out_dtype = x.dtype

    LANE = 128
    Cp = pl.cdiv(C, LANE) * LANE                     # lane-dense channel pad

    # Rows per MXU slab: target M = R*W ~ 256, and cap the f32 accumulator at
    # ~128 KB so the 9 tap-accumulations stay in vregs (v5e/v6e MRF path).
    r_from_m = max(1, 256 // max(W, 1))
    r_from_acc = max(1, (128 * 1024) // max(W * Cp * 4, 1))
    R = max(1, min(H, r_from_m, r_from_acc))

    # One materialization provides the spatial halo, the channel pad and the
    # compute-dtype cast (halves the largest HBM->VMEM DMA in the bf16 path).
    xp = jnp.pad(x, ((0, 0), (1, 1), (1, 1), (0, Cp - C))).astype(compute_dtype)

    def pad_w(w):   # (3,3,C,C) -> (3,3,Cp,Cp), cast to MXU operand dtype
        return jnp.pad(w, ((0, 0), (0, 0), (0, Cp - C),
                           (0, Cp - C))).astype(compute_dtype)

    def pad_v(v):   # (C,) -> (1,Cp) f32 (zero in padded channels)
        return jnp.pad(v, (0, Cp - C)).reshape(1, Cp).astype(jnp.float32)

    # Grid-invariant operands (constant index_map): single-buffer them so two
    # weight tensors don't eat 4x their size of VMEM.
    def const_spec(shape):
        index_map = lambda n: (0,) * len(shape)
        try:
            return pl.BlockSpec(shape, index_map, pipeline_mode=pl.Buffered(1))
        except (TypeError, AttributeError):
            # Older Pallas without pipeline_mode: fall back to default buffering.
            return pl.BlockSpec(shape, index_map)

    # Explicit VMEM budget (scoped default is only 16/32 MiB).
    c_i = jnp.dtype(compute_dtype).itemsize
    o_i = jnp.dtype(out_dtype).itemsize
    xp_bytes = (H + 2) * (W + 2) * Cp * c_i
    out_bytes = H * W * Cp * o_i
    w_bytes = 3 * 3 * Cp * Cp * c_i
    vec_bytes = Cp * 4
    mid_bytes = (H + 2) * (W + 2) * Cp * c_i
    total = (2 * xp_bytes + 2 * out_bytes        # double-buffered activations
             + 2 * w_bytes + 4 * vec_bytes       # single-buffered constants
             + mid_bytes)                        # mid scratch
    vmem_limit = int(min(128 << 20, max(32 << 20, int(1.5 * total) + (4 << 20))))

    kernel = functools.partial(_basic_block_kernel, rows_per_slab=R)

    out_p = pl.pallas_call(
        kernel,
        out_shape=jax.ShapeDtypeStruct((N, H, W, Cp), out_dtype),
        grid_spec=pltpu.PrefetchScalarGridSpec(
            num_scalar_prefetch=0,
            grid=(N,),
            in_specs=[
                pl.BlockSpec((1, H + 2, W + 2, Cp), lambda n: (n, 0, 0, 0)),
                const_spec((3, 3, Cp, Cp)),
                const_spec((1, Cp)),
                const_spec((1, Cp)),
                const_spec((3, 3, Cp, Cp)),
                const_spec((1, Cp)),
                const_spec((1, Cp)),
            ],
            out_specs=pl.BlockSpec((1, H, W, Cp), lambda n: (n, 0, 0, 0)),
            # mid scratch in compute dtype: halves VMEM and conv2 vld bytes in
            # the bf16 path (exact f32 when compute_dtype=f32).
            scratch_shapes=[pltpu.VMEM((H + 2, W + 2, Cp), compute_dtype)],
        ),
        compiler_params=pltpu.CompilerParams(
            # Batch elements are independent -> shard across TensorCores (v7x).
            dimension_semantics=("parallel",),
            vmem_limit_bytes=vmem_limit),
    )(xp, pad_w(w1), pad_v(s1), pad_v(b1), pad_w(w2), pad_v(s2), pad_v(b2))

    out = out_p[..., :C]                              # drop channel padding
    return jnp.transpose(out, (0, 3, 1, 2))           # NHWC -> NCHW


def _reference_forward(x_nchw, params, eps=1e-5):
    """Pure-JAX reference (NHWC convs via lax.conv_general_dilated)."""
    def conv3x3(x_nhwc, w_hwio):
        return lax.conv_general_dilated(
            x_nhwc, w_hwio, window_strides=(1, 1),
            padding=((1, 1), (1, 1)),
            dimension_numbers=("NHWC", "HWIO", "NHWC"))

    def bn(y, g, b, m, v):
        return (y - m) / jnp.sqrt(v + eps) * g + b

    x = jnp.transpose(x_nchw, (0, 2, 3, 1))
    out = conv3x3(x, params["w1"])
    out = bn(out, params["g1"], params["be1"], params["m1"], params["v1"])
    out = jnp.maximum(out, 0.0)
    out = conv3x3(out, params["w2"])
    out = bn(out, params["g2"], params["be2"], params["m2"], params["v2"])
    out = jnp.maximum(out + x, 0.0)
    return jnp.transpose(out, (0, 3, 1, 2))


if __name__ == "__main__":
    N, Cch, H, W = 2, 4, 16, 16          # batch=2, inplanes=planes=4, 16x16
    key = jax.random.PRNGKey(0)
    ks = jax.random.split(key, 11)

    x = jax.random.normal(ks[0], (N, Cch, H, W), jnp.float32)

    params = {
        # Conv weights stored directly in HWIO (kernel layout); bias=False.
        "w1": 0.2 * jax.random.normal(ks[1], (3, 3, Cch, Cch), jnp.float32),
        "w2": 0.2 * jax.random.normal(ks[2], (3, 3, Cch, Cch), jnp.float32),
        # BatchNorm1 params (gamma, beta, running_mean, running_var).
        "g1": 1.0 + 0.1 * jax.random.normal(ks[3], (Cch,), jnp.float32),
        "be1": 0.1 * jax.random.normal(ks[4], (Cch,), jnp.float32),
        "m1": 0.1 * jax.random.normal(ks[5], (Cch,), jnp.float32),
        "v1": 0.5 + jnp.abs(jax.random.normal(ks[6], (Cch,), jnp.float32)),
        # BatchNorm2 params.
        "g2": 1.0 + 0.1 * jax.random.normal(ks[7], (Cch,), jnp.float32),
        "be2": 0.1 * jax.random.normal(ks[8], (Cch,), jnp.float32),
        "m2": 0.1 * jax.random.normal(ks[9], (Cch,), jnp.float32),
        "v2": 0.5 + jnp.abs(jax.random.normal(ks[10], (Cch,), jnp.float32)),
    }

    ref = jax.block_until_ready(_reference_forward(x, params))

    # f32 MXU operands: exact-mode check against the pure-JAX reference.
    fwd_f32 = jax.jit(lambda xx, pp: basic_block_forward(
        xx, pp, compute_dtype=jnp.float32))
    out_f32 = jax.block_until_ready(fwd_f32(x, params))
    assert out_f32.shape == (N, Cch, H, W) and out_f32.dtype == jnp.float32
    if not jnp.allclose(out_f32, ref, rtol=1e-4, atol=1e-4):
        max_err = float(jnp.max(jnp.abs(out_f32 - ref)))
        raise AssertionError(
            f"Pallas kernel (f32) mismatch vs reference, max_err={max_err}")

    # Default (bf16 MXU operands, bf16 xp/mid, f32 accumulation): the
    # production fast path on v5e/v6e/v7x.
    fwd_bf16 = jax.jit(lambda xx, pp: basic_block_forward(xx, pp))
    out_bf16 = jax.block_until_ready(fwd_bf16(x, params))
    assert out_bf16.shape == (N, Cch, H, W) and out_bf16.dtype == jnp.float32
    if not jnp.allclose(out_bf16, ref, rtol=5e-2, atol=1e-1):
        max_err = float(jnp.max(jnp.abs(out_bf16 - ref)))
        raise AssertionError(
            f"Pallas kernel (bf16) mismatch vs reference, max_err={max_err}")

    print("KERNEL_OK")
</pallas_src>

<mosaic_0001>
module attributes {stable_mosaic.version = 11 : i64} {
  func.func @_basic_block_kernel(%arg0: i32, %arg1: memref<1x18x18x128xf32, #tpu.memory_space<vmem>>, %arg2: memref<3x3x128x128xf32, #tpu.memory_space<vmem>>, %arg3: memref<1x128xf32, #tpu.memory_space<vmem>>, %arg4: memref<1x128xf32, #tpu.memory_space<vmem>>, %arg5: memref<3x3x128x128xf32, #tpu.memory_space<vmem>>, %arg6: memref<1x128xf32, #tpu.memory_space<vmem>>, %arg7: memref<1x128xf32, #tpu.memory_space<vmem>>, %arg8: memref<1x16x16x128xf32, #tpu.memory_space<vmem>>, %arg9: memref<18x18x128xf32, #tpu.memory_space<vmem>>) attributes {dimension_semantics = [#tpu.dimension_semantics<parallel>], iteration_bounds = array<i64: 2>, scalar_prefetch = 0 : i64, scratch_operands = 1 : i64, tpu.core_type = #tpu.core_type<tc>, window_params = [{transform_indices = @transform_0, window_bounds = array<i64: 1, 18, 18, 128>}, {pipeline_mode = #tpu.pipeline_mode<synchronous>, transform_indices = @transform_1, window_bounds = array<i64: 3, 3, 128, 128>}, {pipeline_mode = #tpu.pipeline_mode<synchronous>, transform_indices = @transform_2, window_bounds = array<i64: 1, 128>}, {pipeline_mode = #tpu.pipeline_mode<synchronous>, transform_indices = @transform_3, window_bounds = array<i64: 1, 128>}, {pipeline_mode = #tpu.pipeline_mode<synchronous>, transform_indices = @transform_4, window_bounds = array<i64: 3, 3, 128, 128>}, {pipeline_mode = #tpu.pipeline_mode<synchronous>, transform_indices = @transform_5, window_bounds = array<i64: 1, 128>}, {pipeline_mode = #tpu.pipeline_mode<synchronous>, transform_indices = @transform_6, window_bounds = array<i64: 1, 128>}, {transform_indices = @transform_7, window_bounds = array<i64: 1, 16, 16, 128>}]} {
    %c0 = arith.constant 0 : index
    %c0_0 = arith.constant 0 : index
    %0 = vector.load %arg3[%c0, %c0_0] : memref<1x128xf32, #tpu.memory_space<vmem>>, vector<1x128xf32>
    %c0_1 = arith.constant 0 : index
    %c0_2 = arith.constant 0 : index
    %1 = vector.load %arg4[%c0_1, %c0_2] : memref<1x128xf32, #tpu.memory_space<vmem>>, vector<1x128xf32>
    %c0_3 = arith.constant 0 : index
    %c0_4 = arith.constant 0 : index
    %2 = vector.load %arg6[%c0_3, %c0_4] : memref<1x128xf32, #tpu.memory_space<vmem>>, vector<1x128xf32>
    %c0_5 = arith.constant 0 : index
    %c0_6 = arith.constant 0 : index
    %3 = vector.load %arg7[%c0_5, %c0_6] : memref<1x128xf32, #tpu.memory_space<vmem>>, vector<1x128xf32>
    %cst = arith.constant 0.000000e+00 : f32
    %4 = vector.broadcast %cst : f32 to vector<18x128xf32>
    %c0_7 = arith.constant 0 : index
    %c0_8 = arith.constant 0 : index
    %c0_9 = arith.constant 0 : index
    %5 = vector.load %arg9[%c0_7, %c0_8, %c0_9] : memref<18x18x128xf32, #tpu.memory_space<vmem>>, vector<1x18x128xf32>
    %6 = vector.shape_cast %5 : vector<1x18x128xf32> to vector<18x128xf32>
    %7 = vector.shape_cast %4 : vector<18x128xf32> to vector<1x18x128xf32>
    tpu.vector_store %arg9[%c0_7, %c0_8, %c0_9], %7 {strides = array<i32>} : memref<18x18x128xf32, #tpu.memory_space<vmem>>, vector<1x18x128xf32>,
    %c17 = arith.constant 17 : index
    %c0_10 = arith.constant 0 : index
    %c0_11 = arith.constant 0 : index
    %8 = vector.load %arg9[%c17, %c0_10, %c0_11] : memref<18x18x128xf32, #tpu.memory_space<vmem>>, vector<1x18x128xf32>
    %9 = vector.shape_cast %8 : vector<1x18x128xf32> to vector<18x128xf32>
    %10 = vector.shape_cast %4 : vector<18x128xf32> to vector<1x18x128xf32>
    tpu.vector_store %arg9[%c17, %c0_10, %c0_11], %10 {strides = array<i32>} : memref<18x18x128xf32, #tpu.memory_space<vmem>>, vector<1x18x128xf32>,
    %cst_12 = arith.constant 0.000000e+00 : f32
    %11 = vector.broadcast %cst_12 : f32 to vector<16x1x128xf32>
    %c1 = arith.constant 1 : index
    %c0_13 = arith.constant 0 : index
    %c0_14 = arith.constant 0 : index
    %12 = vector.load %arg9[%c1, %c0_13, %c0_14] : memref<18x18x128xf32, #tpu.memory_space<vmem>>, vector<16x1x128xf32>
    tpu.vector_store %arg9[%c1, %c0_13, %c0_14], %11 {strides = array<i32>} : memref<18x18x128xf32, #tpu.memory_space<vmem>>, vector<16x1x128xf32>,
    %c1_15 = arith.constant 1 : index
    %c17_16 = arith.constant 17 : index
    %c0_17 = arith.constant 0 : index
    %13 = vector.load %arg9[%c1_15, %c17_16, %c0_17] : memref<18x18x128xf32, #tpu.memory_space<vmem>>, vector<16x1x128xf32>
    tpu.vector_store %arg9[%c1_15, %c17_16, %c0_17], %11 {strides = array<i32>} : memref<18x18x128xf32, #tpu.memory_space<vmem>>, vector<16x1x128xf32>,
    %c0_i32 = arith.constant 0 : i32
    %c16_i32 = arith.constant 16 : i32
    %14 = arith.muli %c0_i32, %c16_i32 : i32
    %15 = tpu.assume_multiple %14, 16 : i32
    %cst_18 = arith.constant 0.000000e+00 : f32
    %16 = vector.broadcast %cst_18 : f32 to vector<256x128xf32>
    %c0_i32_19 = arith.constant 0 : i32
    %17 = arith.addi %15, %c0_i32_19 : i32
    %c0_20 = arith.constant 0 : index
    %18 = arith.index_cast %17 : i32 to index
    %c0_21 = arith.constant 0 : index
    %c0_22 = arith.constant 0 : index
    %19 = vector.load %arg1[%c0_20, %18, %c0_21, %c0_22] : memref<1x18x18x128xf32, #tpu.memory_space<vmem>>, vector<1x16x16x128xf32>
    %20 = vector.shape_cast %19 : vector<1x16x16x128xf32> to vector<16x16x128xf32>
    %21 = vector.shape_cast %20 : vector<16x16x128xf32> to vector<256x128xf32>
    %c0_23 = arith.constant 0 : index
    %c0_24 = arith.constant 0 : index
    %c0_25 = arith.constant 0 : index
    %c0_26 = arith.constant 0 : index
    %22 = vector.load %arg2[%c0_23, %c0_24, %c0_25, %c0_26] : memref<3x3x128x128xf32, #tpu.memory_space<vmem>>, vector<1x1x128x128xf32>
    %23 = vector.shape_cast %22 : vector<1x1x128x128xf32> to vector<128x128xf32>
    %cst_27 = arith.constant dense<0.000000e+00> : vector<256x128xf32>
    %24 = tpu.matmul %21, %23, %cst_27 {dimension_numbers = #tpu.dot_dimension_numbers<[1], [0], [0], [1], [0, 0, 1, 1], [], []>} : vector<256x128xf32>, vector<128x128xf32>, vector<256x128xf32> -> vector<256x128xf32>
    %25 = arith.addf %16, %24 : vector<256x128xf32>
    %c0_i32_28 = arith.constant 0 : i32
    %26 = arith.addi %15, %c0_i32_28 : i32
    %c0_29 = arith.constant 0 : index
    %27 = arith.index_cast %26 : i32 to index
    %c1_30 = arith.constant 1 : index
    %c0_31 = arith.constant 0 : index
    %28 = vector.load %arg1[%c0_29, %27, %c1_30, %c0_31] : memref<1x18x18x128xf32, #tpu.memory_space<vmem>>, vector<1x16x16x128xf32>
    %29 = vector.shape_cast %28 : vector<1x16x16x128xf32> to vector<16x16x128xf32>
    %30 = vector.shape_cast %29 : vector<16x16x128xf32> to vector<256x128xf32>
    %c0_32 = arith.constant 0 : index
    %c1_33 = arith.constant 1 : index
    %c0_34 = arith.constant 0 : index
    %c0_35 = arith.constant 0 : index
    %31 = vector.load %arg2[%c0_32, %c1_33, %c0_34, %c0_35] : memref<3x3x128x128xf32, #tpu.memory_space<vmem>>, vector<1x1x128x128xf32>
    %32 = vector.shape_cast %31 : vector<1x1x128x128xf32> to vector<128x128xf32>
    %cst_36 = arith.constant dense<0.000000e+00> : vector<256x128xf32>
    %33 = tpu.matmul %30, %32, %cst_36 {dimension_numbers = #tpu.dot_dimension_numbers<[1], [0], [0], [1], [0, 0, 1, 1], [], []>} : vector<256x128xf32>, vector<128x128xf32>, vector<256x128xf32> -> vector<256x128xf32>
    %34 = arith.addf %25, %33 : vector<256x128xf32>
    %c0_i32_37 = arith.constant 0 : i32
    %35 = arith.addi %15, %c0_i32_37 : i32
    %c0_38 = arith.constant 0 : index
    %36 = arith.index_cast %35 : i32 to index
    %c2 = arith.constant 2 : index
    %c0_39 = arith.constant 0 : index
    %37 = vector.load %arg1[%c0_38, %36, %c2, %c0_39] : memref<1x18x18x128xf32, #tpu.memory_space<vmem>>, vector<1x16x16x128xf32>
    %38 = vector.shape_cast %37 : vector<1x16x16x128xf32> to vector<16x16x128xf32>
    %39 = vector.shape_cast %38 : vector<16x16x128xf32> to vector<256x128xf32>
    %c0_40 = arith.constant 0 : index
    %c2_41 = arith.constant 2 : index
    %c0_42 = arith.constant 0 : index
    %c0_43 = arith.constant 0 : index
    %40 = vector.load %arg2[%c0_40, %c2_41, %c0_42, %c0_43] : memref<3x3x128x128xf32, #tpu.memory_space<vmem>>, vector<1x1x128x128xf32>
    %41 = vector.shape_cast %40 : vector<1x1x128x128xf32> to vector<128x128xf32>
    %cst_44 = arith.constant dense<0.000000e+00> : vector<256x128xf32>
    %42 = tpu.matmul %39, %41, %cst_44 {dimension_numbers = #tpu.dot_dimension_numbers<[1], [0], [0], [1], [0, 0, 1, 1], [], []>} : vector<256x128xf32>, vector<128x128xf32>, vector<256x128xf32> -> vector<256x128xf32>
    %43 = arith.addf %34, %42 : vector<256x128xf32>
    %c1_i32 = arith.constant 1 : i32
    %44 = arith.addi %15, %c1_i32 : i32
    %c0_45 = arith.constant 0 : index
    %45 = arith.index_cast %44 : i32 to index
    %c0_46 = arith.constant 0 : index
    %c0_47 = arith.constant 0 : index
    %46 = vector.load %arg1[%c0_45, %45, %c0_46, %c0_47] : memref<1x18x18x128xf32, #tpu.memory_space<vmem>>, vector<1x16x16x128xf32>
    %47 = vector.shape_cast %46 : vector<1x16x16x128xf32> to vector<16x16x128xf32>
    %48 = vector.shape_cast %47 : vector<16x16x128xf32> to vector<256x128xf32>
    %c1_48 = arith.constant 1 : index
    %c0_49 = arith.constant 0 : index
    %c0_50 = arith.constant 0 : index
    %c0_51 = arith.constant 0 : index
    %49 = vector.load %arg2[%c1_48, %c0_49, %c0_50, %c0_51] : memref<3x3x128x128xf32, #tpu.memory_space<vmem>>, vector<1x1x128x128xf32>
    %50 = vector.shape_cast %49 : vector<1x1x128x128xf32> to vector<128x128xf32>
    %cst_52 = arith.constant dense<0.000000e+00> : vector<256x128xf32>
    %51 = tpu.matmul %48, %50, %cst_52 {dimension_numbers = #tpu.dot_dimension_numbers<[1], [0], [0], [1], [0, 0, 1, 1], [], []>} : vector<256x128xf32>, vector<128x128xf32>, vector<256x128xf32> -> vector<256x128xf32>
    %52 = arith.addf %43, %51 : vector<256x128xf32>
    %c1_i32_53 = arith.constant 1 : i32
    %53 = arith.addi %15, %c1_i32_53 : i32
    %c0_54 = arith.constant 0 : index
    %54 = arith.index_cast %53 : i32 to index
    %c1_55 = arith.constant 1 : index
    %c0_56 = arith.constant 0 : index
    %55 = vector.load %arg1[%c0_54, %54, %c1_55, %c0_56] : memref<1x18x18x128xf32, #tpu.memory_space<vmem>>, vector<1x16x16x128xf32>
    %56 = vector.shape_cast %55 : vector<1x16x16x128xf32> to vector<16x16x128xf32>
    %57 = vector.shape_cast %56 : vector<16x16x128xf32> to vector<256x128xf32>
    %c1_57 = arith.constant 1 : index
    %c1_58 = arith.constant 1 : index
    %c0_59 = arith.constant 0 : index
    %c0_60 = arith.constant 0 : index
    %58 = vector.load %arg2[%c1_57, %c1_58, %c0_59, %c0_60] : memref<3x3x128x128xf32, #tpu.memory_space<vmem>>, vector<1x1x128x128xf32>
    %59 = vector.shape_cast %58 : vector<1x1x128x128xf32> to vector<128x128xf32>
    %cst_61 = arith.constant dense<0.000000e+00> : vector<256x128xf32>
    %60 = tpu.matmul %57, %59, %cst_61 {dimension_numbers = #tpu.dot_dimension_numbers<[1], [0], [0], [1], [0, 0, 1, 1], [], []>} : vector<256x128xf32>, vector<128x128xf32>, vector<256x128xf32> -> vector<256x128xf32>
    %61 = arith.addf %52, %60 : vector<256x128xf32>
    %c1_i32_62 = arith.constant 1 : i32
    %62 = arith.addi %15, %c1_i32_62 : i32
    %c0_63 = arith.constant 0 : index
    %63 = arith.index_cast %62 : i32 to index
    %c2_64 = arith.constant 2 : index
    %c0_65 = arith.constant 0 : index
    %64 = vector.load %arg1[%c0_63, %63, %c2_64, %c0_65] : memref<1x18x18x128xf32, #tpu.memory_space<vmem>>, vector<1x16x16x128xf32>
    %65 = vector.shape_cast %64 : vector<1x16x16x128xf32> to vector<16x16x128xf32>
    %66 = vector.shape_cast %65 : vector<16x16x128xf32> to vector<256x128xf32>
    %c1_66 = arith.constant 1 : index
    %c2_67 = arith.constant 2 : index
    %c0_68 = arith.constant 0 : index
    %c0_69 = arith.constant 0 : index
    %67 = vector.load %arg2[%c1_66, %c2_67, %c0_68, %c0_69] : memref<3x3x128x128xf32, #tpu.memory_space<vmem>>, vector<1x1x128x128xf32>
    %68 = vector.shape_cast %67 : vector<1x1x128x128xf32> to vector<128x128xf32>
    %cst_70 = arith.constant dense<0.000000e+00> : vector<256x128xf32>
    %69 = tpu.matmul %66, %68, %cst_70 {dimension_numbers = #tpu.dot_dimension_numbers<[1], [0], [0], [1], [0, 0, 1, 1], [], []>} : vector<256x128xf32>, vector<128x128xf32>, vector<256x128xf32> -> vector<256x128xf32>
    %70 = arith.addf %61, %69 : vector<256x128xf32>
    %c2_i32 = arith.constant 2 : i32
    %71 = arith.addi %15, %c2_i32 : i32
    %c0_71 = arith.constant 0 : index
    %72 = arith.index_cast %71 : i32 to index
    %c0_72 = arith.constant 0 : index
    %c0_73 = arith.constant 0 : index
    %73 = vector.load %arg1[%c0_71, %72, %c0_72, %c0_73] : memref<1x18x18x128xf32, #tpu.memory_space<vmem>>, vector<1x16x16x128xf32>
    %74 = vector.shape_cast %73 : vector<1x16x16x128xf32> to vector<16x16x128xf32>
    %75 = vector.shape_cast %74 : vector<16x16x128xf32> to vector<256x128xf32>
    %c2_74 = arith.constant 2 : index
    %c0_75 = arith.constant 0 : index
    %c0_76 = arith.constant 0 : index
    %c0_77 = arith.constant 0 : index
    %76 = vector.load %arg2[%c2_74, %c0_75, %c0_76, %c0_77] : memref<3x3x128x128xf32, #tpu.memory_space<vmem>>, vector<1x1x128x128xf32>
    %77 = vector.shape_cast %76 : vector<1x1x128x128xf32> to vector<128x128xf32>
    %cst_78 = arith.constant dense<0.000000e+00> : vector<256x128xf32>
    %78 = tpu.matmul %75, %77, %cst_78 {dimension_numbers = #tpu.dot_dimension_numbers<[1], [0], [0], [1], [0, 0, 1, 1], [], []>} : vector<256x128xf32>, vector<128x128xf32>, vector<256x128xf32> -> vector<256x128xf32>
    %79 = arith.addf %70, %78 : vector<256x128xf32>
    %c2_i32_79 = arith.constant 2 : i32
    %80 = arith.addi %15, %c2_i32_79 : i32
    %c0_80 = arith.constant 0 : index
    %81 = arith.index_cast %80 : i32 to index
    %c1_81 = arith.constant 1 : index
    %c0_82 = arith.constant 0 : index
    %82 = vector.load %arg1[%c0_80, %81, %c1_81, %c0_82] : memref<1x18x18x128xf32, #tpu.memory_space<vmem>>, vector<1x16x16x128xf32>
    %83 = vector.shape_cast %82 : vector<1x16x16x128xf32> to vector<16x16x128xf32>
    %84 = vector.shape_cast %83 : vector<16x16x128xf32> to vector<256x128xf32>
    %c2_83 = arith.constant 2 : index
    %c1_84 = arith.constant 1 : index
    %c0_85 = arith.constant 0 : index
    %c0_86 = arith.constant 0 : index
    %85 = vector.load %arg2[%c2_83, %c1_84, %c0_85, %c0_86] : memref<3x3x128x128xf32, #tpu.memory_space<vmem>>, vector<1x1x128x128xf32>
    %86 = vector.shape_cast %85 : vector<1x1x128x128xf32> to vector<128x128xf32>
    %cst_87 = arith.constant dense<0.000000e+00> : vector<256x128xf32>
    %87 = tpu.matmul %84, %86, %cst_87 {dimension_numbers = #tpu.dot_dimension_numbers<[1], [0], [0], [1], [0, 0, 1, 1], [], []>} : vector<256x128xf32>, vector<128x128xf32>, vector<256x128xf32> -> vector<256x128xf32>
    %88 = arith.addf %79, %87 : vector<256x128xf32>
    %c2_i32_88 = arith.constant 2 : i32
    %89 = arith.addi %15, %c2_i32_88 : i32
    %c0_89 = arith.constant 0 : index
    %90 = arith.index_cast %89 : i32 to index
    %c2_90 = arith.constant 2 : index
    %c0_91 = arith.constant 0 : index
    %91 = vector.load %arg1[%c0_89, %90, %c2_90, %c0_91] : memref<1x18x18x128xf32, #tpu.memory_space<vmem>>, vector<1x16x16x128xf32>
    %92 = vector.shape_cast %91 : vector<1x16x16x128xf32> to vector<16x16x128xf32>
    %93 = vector.shape_cast %92 : vector<16x16x128xf32> to vector<256x128xf32>
    %c2_92 = arith.constant 2 : index
    %c2_93 = arith.constant 2 : index
    %c0_94 = arith.constant 0 : index
    %c0_95 = arith.constant 0 : index
    %94 = vector.load %arg2[%c2_92, %c2_93, %c0_94, %c0_95] : memref<3x3x128x128xf32, #tpu.memory_space<vmem>>, vector<1x1x128x128xf32>
    %95 = vector.shape_cast %94 : vector<1x1x128x128xf32> to vector<128x128xf32>
    %cst_96 = arith.constant dense<0.000000e+00> : vector<256x128xf32>
    %96 = tpu.matmul %93, %95, %cst_96 {dimension_numbers = #tpu.dot_dimension_numbers<[1], [0], [0], [1], [0, 0, 1, 1], [], []>} : vector<256x128xf32>, vector<128x128xf32>, vector<256x128xf32> -> vector<256x128xf32>
    %97 = arith.addf %88, %96 : vector<256x128xf32>
    %98 = vector.broadcast %0 : vector<1x128xf32> to vector<256x128xf32>
    %99 = arith.mulf %97, %98 : vector<256x128xf32>
    %100 = vector.broadcast %1 : vector<1x128xf32> to vector<256x128xf32>
    %101 = arith.addf %99, %100 : vector<256x128xf32>
    %cst_97 = arith.constant 0.000000e+00 : f32
    %102 = vector.broadcast %cst_97 : f32 to vector<256x128xf32>
    %103 = arith.maximumf %101, %102 : vector<256x128xf32>
    %104 = vector.shape_cast %103 : vector<256x128xf32> to vector<16x16x128xf32>
    %c1_i32_98 = arith.constant 1 : i32
    %105 = arith.addi %15, %c1_i32_98 : i32
    %106 = arith.index_cast %105 : i32 to index
    %c1_99 = arith.constant 1 : index
    %c0_100 = arith.constant 0 : index
    %107 = vector.load %arg9[%106, %c1_99, %c0_100] : memref<18x18x128xf32, #tpu.memory_space<vmem>>, vector<16x16x128xf32>
    tpu.vector_store %arg9[%106, %c1_99, %c0_100], %104 {strides = array<i32>} : memref<18x18x128xf32, #tpu.memory_space<vmem>>, vector<16x16x128xf32>,
    %c1_i32_101 = arith.constant 1 : i32
    %c0_i32_102 = arith.constant 0 : i32
    %c16_i32_103 = arith.constant 16 : i32
    %108 = arith.muli %c0_i32_102, %c16_i32_103 : i32
    %109 = tpu.assume_multiple %108, 16 : i32
    %cst_104 = arith.constant 0.000000e+00 : f32
    %110 = vector.broadcast %cst_104 : f32 to vector<256x128xf32>
    %c0_i32_105 = arith.constant 0 : i32
    %111 = arith.addi %109, %c0_i32_105 : i32
    %112 = arith.index_cast %111 : i32 to index
    %c0_106 = arith.constant 0 : index
    %c0_107 = arith.constant 0 : index
    %113 = vector.load %arg9[%112, %c0_106, %c0_107] : memref<18x18x128xf32, #tpu.memory_space<vmem>>, vector<16x16x128xf32>
    %114 = vector.shape_cast %113 : vector<16x16x128xf32> to vector<256x128xf32>
    %c0_108 = arith.constant 0 : index
    %c0_109 = arith.constant 0 : index
    %c0_110 = arith.constant 0 : index
    %c0_111 = arith.constant 0 : index
    %115 = vector.load %arg5[%c0_108, %c0_109, %c0_110, %c0_111] : memref<3x3x128x128xf32, #tpu.memory_space<vmem>>, vector<1x1x128x128xf32>
    %116 = vector.shape_cast %115 : vector<1x1x128x128xf32> to vector<128x128xf32>
    %cst_112 = arith.constant dense<0.000000e+00> : vector<256x128xf32>
    %117 = tpu.matmul %114, %116, %cst_112 {dimension_numbers = #tpu.dot_dimension_numbers<[1], [0], [0], [1], [0, 0, 1, 1], [], []>} : vector<256x128xf32>, vector<128x128xf32>, vector<256x128xf32> -> vector<256x128xf32>
    %118 = arith.addf %110, %117 : vector<256x128xf32>
    %c0_i32_113 = arith.constant 0 : i32
    %119 = arith.addi %109, %c0_i32_113 : i32
    %120 = arith.index_cast %119 : i32 to index
    %c1_114 = arith.constant 1 : index
    %c0_115 = arith.constant 0 : index
    %121 = vector.load %arg9[%120, %c1_114, %c0_115] : memref<18x18x128xf32, #tpu.memory_space<vmem>>, vector<16x16x128xf32>
    %122 = vector.shape_cast %121 : vector<16x16x128xf32> to vector<256x128xf32>
    %c0_116 = arith.constant 0 : index
    %c1_117 = arith.constant 1 : index
    %c0_118 = arith.constant 0 : index
    %c0_119 = arith.constant 0 : index
    %123 = vector.load %arg5[%c0_116, %c1_117, %c0_118, %c0_119] : memref<3x3x128x128xf32, #tpu.memory_space<vmem>>, vector<1x1x128x128xf32>
    %124 = vector.shape_cast %123 : vector<1x1x128x128xf32> to vector<128x128xf32>
    %cst_120 = arith.constant dense<0.000000e+00> : vector<256x128xf32>
    %125 = tpu.matmul %122, %124, %cst_120 {dimension_numbers = #tpu.dot_dimension_numbers<[1], [0], [0], [1], [0, 0, 1, 1], [], []>} : vector<256x128xf32>, vector<128x128xf32>, vector<256x128xf32> -> vector<256x128xf32>
    %126 = arith.addf %118, %125 : vector<256x128xf32>
    %c0_i32_121 = arith.constant 0 : i32
    %127 = arith.addi %109, %c0_i32_121 : i32
    %128 = arith.index_cast %127 : i32 to index
    %c2_122 = arith.constant 2 : index
    %c0_123 = arith.constant 0 : index
    %129 = vector.load %arg9[%128, %c2_122, %c0_123] : memref<18x18x128xf32, #tpu.memory_space<vmem>>, vector<16x16x128xf32>
    %130 = vector.shape_cast %129 : vector<16x16x128xf32> to vector<256x128xf32>
    %c0_124 = arith.constant 0 : index
    %c2_125 = arith.constant 2 : index
    %c0_126 = arith.constant 0 : index
    %c0_127 = arith.constant 0 : index
    %131 = vector.load %arg5[%c0_124, %c2_125, %c0_126, %c0_127] : memref<3x3x128x128xf32, #tpu.memory_space<vmem>>, vector<1x1x128x128xf32>
    %132 = vector.shape_cast %131 : vector<1x1x128x128xf32> to vector<128x128xf32>
    %cst_128 = arith.constant dense<0.000000e+00> : vector<256x128xf32>
    %133 = tpu.matmul %130, %132, %cst_128 {dimension_numbers = #tpu.dot_dimension_numbers<[1], [0], [0], [1], [0, 0, 1, 1], [], []>} : vector<256x128xf32>, vector<128x128xf32>, vector<256x128xf32> -> vector<256x128xf32>
    %134 = arith.addf %126, %133 : vector<256x128xf32>
    %c1_i32_129 = arith.constant 1 : i32
    %135 = arith.addi %109, %c1_i32_129 : i32
    %136 = arith.index_cast %135 : i32 to index
    %c0_130 = arith.constant 0 : index
    %c0_131 = arith.constant 0 : index
    %137 = vector.load %arg9[%136, %c0_130, %c0_131] : memref<18x18x128xf32, #tpu.memory_space<vmem>>, vector<16x16x128xf32>
    %138 = vector.shape_cast %137 : vector<16x16x128xf32> to vector<256x128xf32>
    %c1_132 = arith.constant 1 : index
    %c0_133 = arith.constant 0 : index
    %c0_134 = arith.constant 0 : index
    %c0_135 = arith.constant 0 : index
    %139 = vector.load %arg5[%c1_132, %c0_133, %c0_134, %c0_135] : memref<3x3x128x128xf32, #tpu.memory_space<vmem>>, vector<1x1x128x128xf32>
    %140 = vector.shape_cast %139 : vector<1x1x128x128xf32> to vector<128x128xf32>
    %cst_136 = arith.constant dense<0.000000e+00> : vector<256x128xf32>
    %141 = tpu.matmul %138, %140, %cst_136 {dimension_numbers = #tpu.dot_dimension_numbers<[1], [0], [0], [1], [0, 0, 1, 1], [], []>} : vector<256x128xf32>, vector<128x128xf32>, vector<256x128xf32> -> vector<256x128xf32>
    %142 = arith.addf %134, %141 : vector<256x128xf32>
    %c1_i32_137 = arith.constant 1 : i32
    %143 = arith.addi %109, %c1_i32_137 : i32
    %144 = arith.index_cast %143 : i32 to index
    %c1_138 = arith.constant 1 : index
    %c0_139 = arith.constant 0 : index
    %145 = vector.load %arg9[%144, %c1_138, %c0_139] : memref<18x18x128xf32, #tpu.memory_space<vmem>>, vector<16x16x128xf32>
    %146 = vector.shape_cast %145 : vector<16x16x128xf32> to vector<256x128xf32>
    %c1_140 = arith.constant 1 : index
    %c1_141 = arith.constant 1 : index
    %c0_142 = arith.constant 0 : index
    %c0_143 = arith.constant 0 : index
    %147 = vector.load %arg5[%c1_140, %c1_141, %c0_142, %c0_143] : memref<3x3x128x128xf32, #tpu.memory_space<vmem>>, vector<1x1x128x128xf32>
    %148 = vector.shape_cast %147 : vector<1x1x128x128xf32> to vector<128x128xf32>
    %cst_144 = arith.constant dense<0.000000e+00> : vector<256x128xf32>
    %149 = tpu.matmul %146, %148, %cst_144 {dimension_numbers = #tpu.dot_dimension_numbers<[1], [0], [0], [1], [0, 0, 1, 1], [], []>} : vector<256x128xf32>, vector<128x128xf32>, vector<256x128xf32> -> vector<256x128xf32>
    %150 = arith.addf %142, %149 : vector<256x128xf32>
    %c1_i32_145 = arith.constant 1 : i32
    %151 = arith.addi %109, %c1_i32_145 : i32
    %152 = arith.index_cast %151 : i32 to index
    %c2_146 = arith.constant 2 : index
    %c0_147 = arith.constant 0 : index
    %153 = vector.load %arg9[%152, %c2_146, %c0_147] : memref<18x18x128xf32, #tpu.memory_space<vmem>>, vector<16x16x128xf32>
    %154 = vector.shape_cast %153 : vector<16x16x128xf32> to vector<256x128xf32>
    %c1_148 = arith.constant 1 : index
    %c2_149 = arith.constant 2 : index
    %c0_150 = arith.constant 0 : index
    %c0_151 = arith.constant 0 : index
    %155 = vector.load %arg5[%c1_148, %c2_149, %c0_150, %c0_151] : memref<3x3x128x128xf32, #tpu.memory_space<vmem>>, vector<1x1x128x128xf32>
    %156 = vector.shape_cast %155 : vector<1x1x128x128xf32> to vector<128x128xf32>
    %cst_152 = arith.constant dense<0.000000e+00> : vector<256x128xf32>
    %157 = tpu.matmul %154, %156, %cst_152 {dimension_numbers = #tpu.dot_dimension_numbers<[1], [0], [0], [1], [0, 0, 1, 1], [], []>} : vector<256x128xf32>, vector<128x128xf32>, vector<256x128xf32> -> vector<256x128xf32>
    %158 = arith.addf %150, %157 : vector<256x128xf32>
    %c2_i32_153 = arith.constant 2 : i32
    %159 = arith.addi %109, %c2_i32_153 : i32
    %160 = arith.index_cast %159 : i32 to index
    %c0_154 = arith.constant 0 : index
    %c0_155 = arith.constant 0 : index
    %161 = vector.load %arg9[%160, %c0_154, %c0_155] : memref<18x18x128xf32, #tpu.memory_space<vmem>>, vector<16x16x128xf32>
    %162 = vector.shape_cast %161 : vector<16x16x128xf32> to vector<256x128xf32>
    %c2_156 = arith.constant 2 : index
    %c0_157 = arith.constant 0 : index
    %c0_158 = arith.constant 0 : index
    %c0_159 = arith.constant 0 : index
    %163 = vector.load %arg5[%c2_156, %c0_157, %c0_158, %c0_159] : memref<3x3x128x128xf32, #tpu.memory_space<vmem>>, vector<1x1x128x128xf32>
    %164 = vector.shape_cast %163 : vector<1x1x128x128xf32> to vector<128x128xf32>
    %cst_160 = arith.constant dense<0.000000e+00> : vector<256x128xf32>
    %165 = tpu.matmul %162, %164, %cst_160 {dimension_numbers = #tpu.dot_dimension_numbers<[1], [0], [0], [1], [0, 0, 1, 1], [], []>} : vector<256x128xf32>, vector<128x128xf32>, vector<256x128xf32> -> vector<256x128xf32>
    %166 = arith.addf %158, %165 : vector<256x128xf32>
    %c2_i32_161 = arith.constant 2 : i32
    %167 = arith.addi %109, %c2_i32_161 : i32
    %168 = arith.index_cast %167 : i32 to index
    %c1_162 = arith.constant 1 : index
    %c0_163 = arith.constant 0 : index
    %169 = vector.load %arg9[%168, %c1_162, %c0_163] : memref<18x18x128xf32, #tpu.memory_space<vmem>>, vector<16x16x128xf32>
    %170 = vector.shape_cast %169 : vector<16x16x128xf32> to vector<256x128xf32>
    %c2_164 = arith.constant 2 : index
    %c1_165 = arith.constant 1 : index
    %c0_166 = arith.constant 0 : index
    %c0_167 = arith.constant 0 : index
    %171 = vector.load %arg5[%c2_164, %c1_165, %c0_166, %c0_167] : memref<3x3x128x128xf32, #tpu.memory_space<vmem>>, vector<1x1x128x128xf32>
    %172 = vector.shape_cast %171 : vector<1x1x128x128xf32> to vector<128x128xf32>
    %cst_168 = arith.constant dense<0.000000e+00> : vector<256x128xf32>
    %173 = tpu.matmul %170, %172, %cst_168 {dimension_numbers = #tpu.dot_dimension_numbers<[1], [0], [0], [1], [0, 0, 1, 1], [], []>} : vector<256x128xf32>, vector<128x128xf32>, vector<256x128xf32> -> vector<256x128xf32>
    %174 = arith.addf %166, %173 : vector<256x128xf32>
    %c2_i32_169 = arith.constant 2 : i32
    %175 = arith.addi %109, %c2_i32_169 : i32
    %176 = arith.index_cast %175 : i32 to index
    %c2_170 = arith.constant 2 : index
    %c0_171 = arith.constant 0 : index
    %177 = vector.load %arg9[%176, %c2_170, %c0_171] : memref<18x18x128xf32, #tpu.memory_space<vmem>>, vector<16x16x128xf32>
    %178 = vector.shape_cast %177 : vector<16x16x128xf32> to vector<256x128xf32>
    %c2_172 = arith.constant 2 : index
    %c2_173 = arith.constant 2 : index
    %c0_174 = arith.constant 0 : index
    %c0_175 = arith.constant 0 : index
    %179 = vector.load %arg5[%c2_172, %c2_173, %c0_174, %c0_175] : memref<3x3x128x128xf32, #tpu.memory_space<vmem>>, vector<1x1x128x128xf32>
    %180 = vector.shape_cast %179 : vector<1x1x128x128xf32> to vector<128x128xf32>
    %cst_176 = arith.constant dense<0.000000e+00> : vector<256x128xf32>
    %181 = tpu.matmul %178, %180, %cst_176 {dimension_numbers = #tpu.dot_dimension_numbers<[1], [0], [0], [1], [0, 0, 1, 1], [], []>} : vector<256x128xf32>, vector<128x128xf32>, vector<256x128xf32> -> vector<256x128xf32>
    %182 = arith.addf %174, %181 : vector<256x128xf32>
    %183 = vector.broadcast %2 : vector<1x128xf32> to vector<256x128xf32>
    %184 = arith.mulf %182, %183 : vector<256x128xf32>
    %185 = vector.broadcast %3 : vector<1x128xf32> to vector<256x128xf32>
    %186 = arith.addf %184, %185 : vector<256x128xf32>
    %187 = vector.shape_cast %186 : vector<256x128xf32> to vector<16x16x128xf32>
    %c1_i32_177 = arith.constant 1 : i32
    %188 = arith.addi %109, %c1_i32_177 : i32
    %c0_178 = arith.constant 0 : index
    %189 = arith.index_cast %188 : i32 to index
    %c1_179 = arith.constant 1 : index
    %c0_180 = arith.constant 0 : index
    %190 = vector.load %arg1[%c0_178, %189, %c1_179, %c0_180] : memref<1x18x18x128xf32, #tpu.memory_space<vmem>>, vector<1x16x16x128xf32>
    %191 = vector.shape_cast %190 : vector<1x16x16x128xf32> to vector<16x16x128xf32>
    %192 = arith.addf %187, %191 : vector<16x16x128xf32>
    %cst_181 = arith.constant 0.000000e+00 : f32
    %193 = vector.broadcast %cst_181 : f32 to vector<16x16x128xf32>
    %194 = arith.maximumf %192, %193 : vector<16x16x128xf32>
    %c0_182 = arith.constant 0 : index
    %195 = arith.index_cast %109 : i32 to index
    %c0_183 = arith.constant 0 : index
    %c0_184 = arith.constant 0 : index
    %196 = vector.load %arg8[%c0_182, %195, %c0_183, %c0_184] : memref<1x16x16x128xf32, #tpu.memory_space<vmem>>, vector<1x16x16x128xf32>
    %197 = vector.shape_cast %196 : vector<1x16x16x128xf32> to vector<16x16x128xf32>
    %198 = vector.shape_cast %194 : vector<16x16x128xf32> to vector<1x16x16x128xf32>
    tpu.vector_store %arg8[%c0_182, %195, %c0_183, %c0_184], %198 {strides = array<i32>} : memref<1x16x16x128xf32, #tpu.memory_space<vmem>>, vector<1x16x16x128xf32>,
    %c1_i32_185 = arith.constant 1 : i32
    return
  }
  func.func @transform_0(%arg0: i32) -> (i32, i32, i32, i32) {
    %c0_i32 = arith.constant 0 : i32
    %c0_i32_0 = arith.constant 0 : i32
    %c0_i32_1 = arith.constant 0 : i32
    %c0_i32_2 = arith.constant 0 : i32
    return %arg0, %c0_i32, %c0_i32_0, %c0_i32_1 : i32, i32, i32, i32
  }
  func.func @transform_1(%arg0: i32) -> (i32, i32, i32, i32) {
    %c0_i32 = arith.constant 0 : i32
    %c0_i32_0 = arith.constant 0 : i32
    %c0_i32_1 = arith.constant 0 : i32
    %c0_i32_2 = arith.constant 0 : i32
    %c0_i32_3 = arith.constant 0 : i32
    return %c0_i32, %c0_i32_0, %c0_i32_1, %c0_i32_2 : i32, i32, i32, i32
  }
  func.func @transform_2(%arg0: i32) -> (i32, i32) {
    %c0_i32 = arith.constant 0 : i32
    %c0_i32_0 = arith.constant 0 : i32
    %c0_i32_1 = arith.constant 0 : i32
    return %c0_i32, %c0_i32_0 : i32, i32
  }
  func.func @transform_3(%arg0: i32) -> (i32, i32) {
    %c0_i32 = arith.constant 0 : i32
    %c0_i32_0 = arith.constant 0 : i32
    %c0_i32_1 = arith.constant 0 : i32
    return %c0_i32, %c0_i32_0 : i32, i32
  }
  func.func @transform_4(%arg0: i32) -> (i32, i32, i32, i32) {
    %c0_i32 = arith.constant 0 : i32
    %c0_i32_0 = arith.constant 0 : i32
    %c0_i32_1 = arith.constant 0 : i32
    %c0_i32_2 = arith.constant 0 : i32
    %c0_i32_3 = arith.constant 0 : i32
    return %c0_i32, %c0_i32_0, %c0_i32_1, %c0_i32_2 : i32, i32, i32, i32
  }
  func.func @transform_5(%arg0: i32) -> (i32, i32) {
    %c0_i32 = arith.constant 0 : i32
    %c0_i32_0 = arith.constant 0 : i32
    %c0_i32_1 = arith.constant 0 : i32
    return %c0_i32, %c0_i32_0 : i32, i32
  }
  func.func @transform_6(%arg0: i32) -> (i32, i32) {
    %c0_i32 = arith.constant 0 : i32
    %c0_i32_0 = arith.constant 0 : i32
    %c0_i32_1 = arith.constant 0 : i32
    return %c0_i32, %c0_i32_0 : i32, i32
  }
  func.func @transform_7(%arg0: i32) -> (i32, i32, i32, i32) {
    %c0_i32 = arith.constant 0 : i32
    %c0_i32_0 = arith.constant 0 : i32
    %c0_i32_1 = arith.constant 0 : i32
    %c0_i32_2 = arith.constant 0 : i32
    return %arg0, %c0_i32, %c0_i32_0, %c0_i32_1 : i32, i32, i32, i32
  }
}

</mosaic_0001>

<bundles_post_ra>
// kernel: _lambda_.1
= control target key start
LH: loop header
LB: loop body
LE: loop exit
PB: predicated region body
PF: predicated region fallthrough
CT: control target
= control target key end

     0   :  { %s10064_s24 = smov 0   ;;  %s12209_s0 = inlined_call_operand.vmem [shape: f32[2,18,18,128], index: 0, kind: input, shape index: {}]   ;;  %s12210_s1 = inlined_call_operand.vmem [shape: f32[3,3,128,128], index: 1, kind: input, shape index: {}]   ;;  %s12211_s2 = inlined_call_operand.vmem [shape: f32[1,128], index: 2, kind: input, shape index: {}]   ;;  %s12212_s3 = inlined_call_operand.vmem [shape: f32[1,128], index: 3, kind: input, shape index: {}]   ;;  %s12213_s4 = inlined_call_operand.vmem [shape: f32[3,3,128,128], index: 4, kind: input, shape index: {}]   ;;  %s12214_s5 = inlined_call_operand.vmem [shape: f32[1,128], index: 5, kind: input, shape index: {}]   ;;  %s12215_s6 = inlined_call_operand.vmem [shape: f32[1,128], index: 6, kind: input, shape index: {}]   ;;  %s12216_s7 = inlined_call_operand.vmem [shape: f32[2,16,16,128], index: 7, kind: output, shape index: {}]  }
   0x1 LB: > { %s6117_s25 = sadd.s32 4294967295, %s10021_s24   ;;  %p6121_p0 = scmp.ge.s32.totalorder %s10021_s24, 1  ;;  %s10021_s24 = sphi %s10064_s24, %s17_s24  }
   0x2   : > { %p237_p1 = scmp.lt.s32.totalorder %s10021_s24, 3 }
   0x4   : > { %p238_p2 = pnand %p6121_p0, %p237_p1 }
   0x6   : > { %241 = sbr.rel (%p238_p2) target bundleno = 1570 (0x622), region = 48 }
   0xd   : > { %v6125_v0 = vld [vmem:[%s12210_s1 + $0x80] sm:$0xff]  ;;  %v6126_v1 = vld [vmem:[%s12210_s1 + $0x88] sm:$0xff]  ;;  %v6127_v2 = vld [vmem:[%s12210_s1 + $0x90] sm:$0xff]  ;;  %p269_p3 = scmp.lt.s32.totalorder %s6117_s25, 1 }
   0xe   : > { %v8916_v3 = vpack.c.bf16 %v6126_v1, %v6125_v0  ;;  %v6128_v4 = vld [vmem:[%s12210_s1 + $0x98] sm:$0xff]  ;;  %v6129_v6 = vld [vmem:[%s12210_s1 + $0xa0] sm:$0xff]  ;;  %v6130_v7 = vld [vmem:[%s12210_s1 + $0xa8] sm:$0xff] }
   0xf   : > { %v8920_v5 = vpack.c.bf16 %v6128_v4, %v6127_v2  ;;  %s12417_s25 = smov (!%p269_p3, %s6117_s25), 1  ;;  %v8924_v8 = vpack.c.bf16 %v6130_v7, %v6129_v6  ;;  %v6131_v9 = vld [vmem:[%s12210_s1 + $0xb0] sm:$0xff]  ;;  %v6132_v10 = vld [vmem:[%s12210_s1 + $0xb8] sm:$0xff]  ;;  %v6133_v13 = vld [vmem:[%s12210_s1 + $0xc0] sm:$0xff] }
  0x10   : > { %8917 = vmatprep.subr.bf16.mxu0 %v8916_v3  ;;  %s10004_s15 = smul.u32 432, %s12417_s25  ;;  %v8928_v12 = vpack.c.bf16 %v6132_v10, %v6131_v9  ;;  %v6134_v14 = vld [vmem:[%s12210_s1 + $0xc8] sm:$0xff]  ;;  %v6135_v16 = vld [vmem:[%s12210_s1 + $0xd0] sm:$0xff]  ;;  %v6136_v17 = vld [vmem:[%s12210_s1 + $0xd8] sm:$0xff]  ;;  %s6611_s10 = sshll.u32 %s12417_s25, 8 }
  0x11   : > { %8919 = vmatpush3.bf16.msra.mxu0 %v8916_v3  ;;  %v8932_v15 = vpack.c.bf16 %v6134_v14, %v6133_v13  ;;  %v8936_v18 = vpack.c.bf16 %v6136_v17, %v6135_v16  ;;  %v6137_v19 = vld [vmem:[%s12210_s1 + $0xe0] sm:$0xff]  ;;  %v6138_v20 = vld [vmem:[%s12210_s1 + $0xe8] sm:$0xff]  ;;  %v6139_v22 = vld [vmem:[%s12210_s1 + $0xf0] sm:$0xff]  ;;  %s12083_s13 = scalar_lea.vmem %s12216_s7, %s6611_s10 }
  0x12   : > { %8921 = vmatprep.subr.bf16.mxu0 %v8920_v5  ;;  %s10102_s22 = scalar_lea.vmem %s12209_s0, %s10004_s15  ;;  %v8940_v21 = vpack.c.bf16 %v6138_v20, %v6137_v19  ;;  %v6140_v23 = vld [vmem:[%s12210_s1 + $0xf8] sm:$0xff]  ;;  %v357_v25 = vld [vmem:[%s12210_s1] sm:$0xff]  ;;  %v358_v26 = vld [vmem:[%s12210_s1 + $0x8] sm:$0xff] }
  0x13   : > { %v373_v11 = vld [vmem:[%s10102_s22 + $0x1] sm:$0xff]  ;;  %v8944_v24 = vpack.c.bf16 %v6140_v23, %v6139_v22  ;;  %v8948_v27 = vpack.c.bf16 %v358_v26, %v357_v25  ;;  %v359_v28 = vld [vmem:[%s12210_s1 + $0x10] sm:$0xff]  ;;  %v360_v29 = vld [vmem:[%s12210_s1 + $0x18] sm:$0xff] }
  0x14   : > { %7508 = vmatprep.mubr.f32.mxu0 %v373_v11  ;;  %v374_v30 = vld [vmem:[%s10102_s22 + $0x9] sm:$0xff]  ;;  %v10143_v31 = vld [vmem:[%s10102_s22 + $0x19] sm:$0xff]  ;;  %v8952_v32 = vpack.c.bf16 %v360_v29, %v359_v28  ;;  %v10153_v35 = vld [vmem:[%s10102_s22 + $0x21] sm:$0xff] }
  0x15   : > { %8923 = vmatpush3.bf16.msra.mxu0 %v8920_v5  ;;  %v361_v33 = vld [vmem:[%s12210_s1 + $0x20] sm:$0xff]  ;;  %v362_v34 = vld [vmem:[%s12210_s1 + $0x28] sm:$0xff]  ;;  %v10156_v36 = vld [vmem:[%s10102_s22 + $0x31] sm:$0xff] }
  0x16   : > { %8925 = vmatprep.subr.bf16.mxu0 %v8924_v8  ;;  %v8956_v37 = vpack.c.bf16 %v362_v34, %v361_v33  ;;  %v363_v38 = vld [vmem:[%s12210_s1 + $0x30] sm:$0xff]  ;;  %v364_v39 = vld [vmem:[%s12210_s1 + $0x38] sm:$0xff]  ;;  %v365_v43 = vld [vmem:[%s12210_s1 + $0x40] sm:$0xff] }
  0x17   : > { %v10167_v40 = vld [vmem:[%s10102_s22 + $0x39] sm:$0xff]  ;;  %v10170_v41 = vld [vmem:[%s10102_s22 + $0x49] sm:$0xff]  ;;  %v8960_v42 = vpack.c.bf16 %v364_v39, %v363_v38  ;;  %v10181_v45 = vld [vmem:[%s10102_s22 + $0x51] sm:$0xff] }
  0x18   : > { %v366_v44 = vld [vmem:[%s12210_s1 + $0x48] sm:$0xff]  ;;  %v367_v48 = vld [vmem:[%s12210_s1 + $0x50] sm:$0xff]  ;;  %v368_v49 = vld [vmem:[%s12210_s1 + $0x58] sm:$0xff] }
  0x19   : > { %8927 = vmatpush3.bf16.msra.mxu0 %v8924_v8  ;;  %v10184_v46 = vld [vmem:[%s10102_s22 + $0x61] sm:$0xff]  ;;  %v8964_v47 = vpack.c.bf16 %v366_v44, %v365_v43  ;;  %v10195_v50 = vld [vmem:[%s10102_s22 + $0x69] sm:$0xff]  ;;  %v10198_v51 = vld [vmem:[%s10102_s22 + $0x79] sm:$0xff]  ;;  %v8968_v52 = vpack.c.bf16 %v368_v49, %v367_v48 }
  0x1a   : > { %8929 = vmatprep.subr.bf16.mxu0 %v8928_v12  ;;  %v369_v53 = vld [vmem:[%s12210_s1 + $0x60] sm:$0xff]  ;;  %v370_v54 = vld [vmem:[%s12210_s1 + $0x68] sm:$0xff]  ;;  %v10212_v56 = vld [vmem:[%s10102_s22 + $0x91] sm:$0xff] }
  0x1b   : > { %v10209_v55 = vld [vmem:[%s10102_s22 + $0x81] sm:$0xff]  ;;  %v8972_v57 = vpack.c.bf16 %v370_v54, %v369_v53  ;;  %v371_v58 = vld [vmem:[%s12210_s1 + $0x70] sm:$0xff]  ;;  %v372_v59 = vld [vmem:[%s12210_s1 + $0x78] sm:$0xff] }
  0x1c   : > { %v10223_v60 = vld [vmem:[%s10102_s22 + $0x99] sm:$0xff]  ;;  %v10226_v61 = vld [vmem:[%s10102_s22 + $0xa9] sm:$0xff]  ;;  %v8976_v62 = vpack.c.bf16 %v372_v59, %v371_v58  ;;  %v10237_v1 = vld [vmem:[%s10102_s22 + $0xb1] sm:$0xff] }
  0x1d   : > { %8931 = vmatpush3.bf16.msra.mxu0 %v8928_v12  ;;  %v6141_v63 = vld [vmem:[%s12210_s1 + $0x100] sm:$0xff]  ;;  %v6142_v0 = vld [vmem:[%s12210_s1 + $0x108] sm:$0xff]  ;;  %v10256_v7 = vld [vmem:[%s10102_s22 + $0xf1] sm:$0xff] }
  0x1e   : > { %8933 = vmatprep.subr.bf16.mxu0 %v8932_v15  ;;  %v10240_v2 = vld [vmem:[%s10102_s22 + $0xc1] sm:$0xff]  ;;  %v8980_v3 = vpack.c.bf16 %v6142_v0, %v6141_v63  ;;  %v10245_v4 = vld [vmem:[%s10102_s22 + $0xc9] sm:$0xff]  ;;  %v10248_v5 = vld [vmem:[%s10102_s22 + $0xd9] sm:$0xff] }
  0x1f   : > { %v10253_v6 = vld [vmem:[%s10102_s22 + $0xe1] sm:$0xff]  ;;  %v10261_v8 = vld [vmem:[%s10102_s22 + $0xf9] sm:$0xff]  ;;  %v10264_v9 = vld [vmem:[%s10102_s22 + $0x109] sm:$0xff] }
  0x20   : > { %v10269_v10 = vld [vmem:[%s10102_s22 + $0x111] sm:$0xff]  ;;  %v10272_v11 = vld [vmem:[%s10102_s22 + $0x121] sm:$0xff]  ;;  %v10277_v12 = vld [vmem:[%s10102_s22 + $0x129] sm:$0xff] }
  0x21   : > { %8935 = vmatpush3.bf16.msra.mxu0 %v8932_v15  ;;  %12284 = vst [vmem:[#allocation3_spill] sm:$0xff] %v10277_v12  ;;  %v10280_v13 = vld [vmem:[%s10102_s22 + $0x139] sm:$0xff]  ;;  %v10285_v14 = vld [vmem:[%s10102_s22 + $0x141] sm:$0xff]  ;;  %v10288_v15 = vld [vmem:[%s10102_s22 + $0x151] sm:$0xff] }
  0x22   : > { %8937 = vmatprep.subr.bf16.mxu0 %v8936_v18  ;;  %12285 = vst [vmem:[#allocation4_spill] sm:$0xff] %v10280_v13  ;;  %12286 = vst [vmem:[#allocation5_spill] sm:$0xff] %v10285_v14  ;;  %v10293_v16 = vld [vmem:[%s10102_s22 + $0x159] sm:$0xff]  ;;  %v10296_v17 = vld [vmem:[%s10102_s22 + $0x169] sm:$0xff] }
  0x23   : > { %12287 = vst [vmem:[#allocation6_spill] sm:$0xff] %v10288_v15  ;;  %12288 = vst [vmem:[#allocation7_spill] sm:$0xff] %v10293_v16  ;;  %v325_v19 = vld [vmem:[%s10102_s22] sm:$0xff]  ;;  %v6143_v20 = vld [vmem:[%s12210_s1 + $0x110] sm:$0xff] }
  0x24   : > { %12289 = vst [vmem:[#allocation8_spill] sm:$0xff] %v10296_v17  ;;  %v326_v22 = vld [vmem:[%s10102_s22 + $0x8] sm:$0xff]  ;;  %v10313_v23 = vld [vmem:[%s10102_s22 + $0x18] sm:$0xff]  ;;  %v6145_v25 = vld [vmem:[%s12210_s1 + $0x120] sm:$0xff] }
  0x25   : > { %8939 = vmatpush3.bf16.msra.mxu0 %v8936_v18  ;;  %v10301_v18 = vld [vmem:[%s10102_s22 + $0x171] sm:$0xff]  ;;  %v6146_v26 = vld [vmem:[%s12210_s1 + $0x128] sm:$0xff]  ;;  %v6149_v38 = vld [vmem:[%s12210_s1 + $0x140] sm:$0xff] }
  0x26   : > { %8941 = vmatprep.subr.bf16.mxu0 %v8940_v21  ;;  %12290 = vst [vmem:[#allocation9_spill] sm:$0xff] %v10301_v18  ;;  %v10326_v28 = vld [vmem:[%s10102_s22 + $0x30] sm:$0xff]  ;;  %v8988_v29 = vpack.c.bf16 %v6146_v26, %v6145_v25  ;;  %v10337_v33 = vld [vmem:[%s10102_s22 + $0x38] sm:$0xff]  ;;  %v10340_v34 = vld [vmem:[%s10102_s22 + $0x48] sm:$0xff] }
  0x27   : > { %v6150_v39 = vld [vmem:[%s12210_s1 + $0x148] sm:$0xff]  ;;  %v10354_v43 = vld [vmem:[%s10102_s22 + $0x60] sm:$0xff]  ;;  %v6152_v48 = vld [vmem:[%s12210_s1 + $0x158] sm:$0xff] }
  0x28   : > { %v8996_v44 = vpack.c.bf16 %v6150_v39, %v6149_v38  ;;  %v10365_v49 = vld [vmem:[%s10102_s22 + $0x68] sm:$0xff]  ;;  %v6153_v54 = vld [vmem:[%s12210_s1 + $0x160] sm:$0xff]  ;;  %v10382_v59 = vld [vmem:[%s10102_s22 + $0x90] sm:$0xff] }
  0x29   : > { %8943 = vmatpush3.bf16.msra.mxu0 %v8940_v21  ;;  %v6144_v21 = vld [vmem:[%s12210_s1 + $0x118] sm:$0xff]  ;;  %v10379_v58 = vld [vmem:[%s10102_s22 + $0x80] sm:$0xff]  ;;  %v6155_v63 = vld [vmem:[%s12210_s1 + $0x170] sm:$0xff] }
  0x2a   : > { %8945 = vmatprep.subr.bf16.mxu0 %v8944_v24  ;;  %v6156_v0 = vld [vmem:[%s12210_s1 + $0x178] sm:$0xff]  ;;  %v10410_v25 = vld [vmem:[%s10102_s22 + $0xc0] sm:$0xff]  ;;  %v10434_v39 = vld [vmem:[%s10102_s22 + $0x108] sm:$0xff] }
  0x2b   : > { %v10431_v38 = vld [vmem:[%s10102_s22 + $0xf8] sm:$0xff] }
  0x2d   : > { %8947 = vmatpush3.bf16.msra.mxu0 %v8944_v24  ;;  %v8984_v24 = vpack.c.bf16 %v6144_v21, %v6143_v20  ;;  %v9008_v20 = vpack.c.bf16 %v6156_v0, %v6155_v63  ;;  %v6189_v21 = vld [vmem:[%s12210_s1 + $0x180] sm:$0xff]  ;;  %v10466_v63 = vld [vmem:[%s10102_s22 + $0x168] sm:$0xff]  ;;  %v10471_v0 = vld [vmem:[%s10102_s22 + $0x170] sm:$0xff] }
  0x2e   : > { %8949 = vmatprep.subr.bf16.mxu0 %v8948_v27 }
  0x30   : > { %7509 = vmatmul.mubr.f32.vlgmr.msra.gmra.mrb[0].mxu0 %v374_v30  ;;  %v6147_v30 = vld [vmem:[%s12210_s1 + $0x130] sm:$0xff] }
  0x31   : > { %8951 = vmatpush3.bf16.msra.mxu0 %v8948_v27  ;;  %7511 = vmatprep.mubr.f32.mxu0 %v10143_v31  ;;  %v10323_v27 = vld [vmem:[%s10102_s22 + $0x20] sm:$0xff] }
  0x32   : > { %8953 = vmatprep.subr.bf16.mxu0 %v8952_v32 }
  0x34   : > { %7512 = vmatmul.mubr.f32.gmra.mrb[2].mxu0 %v10153_v35 }
  0x35   : > { %7514 = vmatprep.mubr.f32.mxu0 %v10156_v36  ;;  %8955 = vmatpush3.bf16.msra.mxu0 %v8952_v32  ;;  %v6148_v32 = vld [vmem:[%s12210_s1 + $0x138] sm:$0xff] }
  0x36   : > { %8957 = vmatprep.subr.bf16.mxu0 %v8956_v37 }
  0x38   : > { %7515 = vmatmul.mubr.f32.gmra.mrb[4].mxu0 %v10167_v40 }
  0x39   : > { %7517 = vmatprep.mubr.f32.mxu0 %v10170_v41  ;;  %8959 = vmatpush3.bf16.msra.mxu0 %v8956_v37  ;;  %v8992_v37 = vpack.c.bf16 %v6148_v32, %v6147_v30  ;;  %v10418_v30 = vld [vmem:[%s10102_s22 + $0xd8] sm:$0xff]  ;;  %v10423_v32 = vld [vmem:[%s10102_s22 + $0xe0] sm:$0xff] }
  0x3a   : > { %8961 = vmatprep.subr.bf16.mxu0 %v8960_v42 }
  0x3c   : > { %7518 = vmatmul.mubr.f32.gmra.mrb[6].mxu0 %v10181_v45 }
  0x3d   : > { %7520 = vmatprep.mubr.f32.mxu0 %v10184_v46  ;;  %8963 = vmatpush3.bf16.msra.mxu0 %v8960_v42  ;;  %v10351_v42 = vld [vmem:[%s10102_s22 + $0x50] sm:$0xff] }
  0x3e   : > { %8965 = vmatprep.subr.bf16.mxu0 %v8964_v47 }
  0x40   : > { %7521 = vmatmul.mubr.f32.gmra.mrb[8].mxu0 %v10195_v50 }
  0x41   : > { %7523 = vmatprep.mubr.f32.mxu0 %v10198_v51  ;;  %8967 = vmatpush3.bf16.msra.mxu0 %v8964_v47  ;;  %v6151_v47 = vld [vmem:[%s12210_s1 + $0x150] sm:$0xff] }
  0x42   : > { %8969 = vmatprep.subr.bf16.mxu0 %v8968_v52  ;;  %v9000_v53 = vpack.c.bf16 %v6152_v48, %v6151_v47  ;;  %v10442_v47 = vld [vmem:[%s10102_s22 + $0x120] sm:$0xff]  ;;  %v10447_v48 = vld [vmem:[%s10102_s22 + $0x128] sm:$0xff] }
  0x44   : > { %7524 = vmatmul.mubr.f32.gmra.mrb[10].mxu0 %v10209_v55 }
  0x45   : > { %7526 = vmatprep.mubr.f32.mxu0 %v10212_v56  ;;  %8971 = vmatpush3.bf16.msra.mxu0 %v8968_v52  ;;  %v10368_v52 = vld [vmem:[%s10102_s22 + $0x78] sm:$0xff] }
  0x46   : > { %8973 = vmatprep.subr.bf16.mxu0 %v8972_v57 }
  0x48   : > { %7527 = vmatmul.mubr.f32.gmra.mrb[12].mxu0 %v10223_v60 }
  0x49   : > { %7529 = vmatprep.mubr.f32.mxu0 %v10226_v61  ;;  %8975 = vmatpush3.bf16.msra.mxu0 %v8972_v57  ;;  %v6154_v57 = vld [vmem:[%s12210_s1 + $0x168] sm:$0xff] }
  0x4a   : > { %8977 = vmatprep.subr.bf16.mxu0 %v8976_v62 }
  0x4c   : > { %7530 = vmatmul.mubr.f32.gmra.mrb[14].mxu0 %v10237_v1 }
  0x4d   : > { %7532 = vmatprep.mubr.f32.mxu0 %v10240_v2  ;;  %8979 = vmatpush3.bf16.msra.mxu0 %v8976_v62  ;;  %v9004_v62 = vpack.c.bf16 %v6154_v57, %v6153_v54  ;;  %v10455_v54 = vld [vmem:[%s10102_s22 + $0x140] sm:$0xff]  ;;  %v10458_v57 = vld [vmem:[%s10102_s22 + $0x150] sm:$0xff] }
  0x4e   : > { %8981 = vmatprep.subr.bf16.mxu0 %v8980_v3 }
  0x50   : > { %7533 = vmatmul.mubr.f32.gmra.mrb[16].mxu0 %v10245_v4 }
  0x51   : > { %7535 = vmatprep.mubr.f32.mxu0 %v10248_v5 }
  0x54   : > { %7536 = vmatmul.mubr.f32.gmra.mrb[18].mxu0 %v10253_v6 }
  0x55   : > { %7538 = vmatprep.mubr.f32.mxu0 %v10256_v7 }
  0x58   : > { %7539 = vmatmul.mubr.f32.gmra.mrb[20].mxu0 %v10261_v8 }
  0x59   : > { %7541 = vmatprep.mubr.f32.mxu0 %v10264_v9 }
  0x5c   : > { %7542 = vmatmul.mubr.f32.gmra.mrb[22].mxu0 %v10269_v10 }
  0x5d   : > { %7544 = vmatprep.mubr.f32.mxu0 %v10272_v11 }
  0x60   : > { %7545 = vmatmul.mubr.f32.gmra.mrb[24].mxu0 %v10277_v12  ;;  %v6196_v12 = vld [vmem:[%s12210_s1 + $0x1b8] sm:$0xff] }
  0x61   : > { %7547 = vmatprep.mubr.f32.mxu0 %v10280_v13  ;;  %v10493_v13 = vld [vmem:[%s10102_s22 + $0x22] sm:$0xff] }
  0x62   : > { %12292 = vst [vmem:[#allocation11_spill] sm:$0xff] %v10493_v13 }
  0x64   : > { %7548 = vmatmul.mubr.f32.gmra.mrb[26].mxu0 %v10285_v14  ;;  %v6194_v14 = vld [vmem:[%s12210_s1 + $0x1a8] sm:$0xff] }
  0x65   : > { %7550 = vmatprep.mubr.f32.mxu0 %v10288_v15  ;;  %v6193_v15 = vld [vmem:[%s12210_s1 + $0x1a0] sm:$0xff] }
  0x68   : > { %7551 = vmatmul.mubr.f32.gmra.mrb[28].mxu0 %v10293_v16 }
  0x69   : > { %7553 = vmatprep.mubr.f32.mxu0 %v10296_v17  ;;  %v10483_v17 = vld [vmem:[%s10102_s22 + $0x1a] sm:$0xff] }
  0x6a   : > { %12291 = vst [vmem:[#allocation10_spill] sm:$0xff] %v10483_v17 }
  0x6c   : > { %7554 = vmatmul.mubr.f32.gmra.mrb[30].mxu0 %v10301_v18  ;;  %v873_v18 = vld [vmem:[%s10102_s22 + $0xa] sm:$0xff] }
  0x6d   : > { %7588 = vmatprep.mubr.f32.mxu0 %v325_v19  ;;  %v10396_v19 = vld [vmem:[%s10102_s22 + $0xa8] sm:$0xff] }
  0x70   : > { %7589 = vmatmul.mubr.f32.vlgmr.msra.gmra.mrb[0].mxu0 %v326_v22  ;;  %v6190_v22 = vld [vmem:[%s12210_s1 + $0x188] sm:$0xff] }
  0x71   : > { %8983 = vmatpush3.bf16.msra.mxu0 %v8980_v3  ;;  %7591 = vmatprep.mubr.f32.mxu0 %v10313_v23  ;;  %v10393_v3 = vld [vmem:[%s10102_s22 + $0x98] sm:$0xff]  ;;  %v9012_v26 = vpack.c.bf16 %v6190_v22, %v6189_v21  ;;  %v6191_v21 = vld [vmem:[%s12210_s1 + $0x190] sm:$0xff] }
  0x72   : > { %8985 = vmatprep.subr.bf16.mxu0 %v8984_v24  ;;  %v6192_v22 = vld [vmem:[%s12210_s1 + $0x198] sm:$0xff] }
  0x73   : > { %v9016_v16 = vpack.c.bf16 %v6192_v22, %v6191_v21  ;;  %v9020_v21 = vpack.c.bf16 %v6194_v14, %v6193_v15  ;;  %v6195_v22 = vld [vmem:[%s12210_s1 + $0x1b0] sm:$0xff]  ;;  %v6197_v15 = vld [vmem:[%s12210_s1 + $0x1c0] sm:$0xff] }
  0x74   : > { %7592 = vmatmul.mubr.f32.gmra.mrb[2].mxu0 %v10323_v27  ;;  %v9024_v14 = vpack.c.bf16 %v6196_v12, %v6195_v22  ;;  %v6199_v22 = vld [vmem:[%s12210_s1 + $0x1d0] sm:$0xff] }
  0x75   : > { %7594 = vmatprep.mubr.f32.mxu0 %v10326_v28  ;;  %8987 = vmatpush3.bf16.msra.mxu0 %v8984_v24  ;;  %v10407_v24 = vld [vmem:[%s10102_s22 + $0xb0] sm:$0xff] }
  0x76   : > { %8989 = vmatprep.subr.bf16.mxu0 %v8988_v29 }
  0x78   : > { %7595 = vmatmul.mubr.f32.gmra.mrb[4].mxu0 %v10337_v33 }
  0x79   : > { %7597 = vmatprep.mubr.f32.mxu0 %v10340_v34  ;;  %8991 = vmatpush3.bf16.msra.mxu0 %v8988_v29  ;;  %v10415_v29 = vld [vmem:[%s10102_s22 + $0xc8] sm:$0xff] }
  0x7a   : > { %8993 = vmatprep.subr.bf16.mxu0 %v8992_v37 }
  0x7c   : > { %7598 = vmatmul.mubr.f32.gmra.mrb[6].mxu0 %v10351_v42 }
  0x7d   : > { %7600 = vmatprep.mubr.f32.mxu0 %v10354_v43  ;;  %8995 = vmatpush3.bf16.msra.mxu0 %v8992_v37  ;;  %v10426_v37 = vld [vmem:[%s10102_s22 + $0xf0] sm:$0xff] }
  0x7e   : > { %8997 = vmatprep.subr.bf16.mxu0 %v8996_v44 }
  0x80   : > { %7601 = vmatmul.mubr.f32.gmra.mrb[8].mxu0 %v10365_v49 }
  0x81   : > { %7603 = vmatprep.mubr.f32.mxu0 %v10368_v52  ;;  %8999 = vmatpush3.bf16.msra.mxu0 %v8996_v44  ;;  %v10439_v44 = vld [vmem:[%s10102_s22 + $0x110] sm:$0xff] }
  0x82   : > { %9001 = vmatprep.subr.bf16.mxu0 %v9000_v53 }
  0x84   : > { %7604 = vmatmul.mubr.f32.gmra.mrb[10].mxu0 %v10379_v58 }
  0x85   : > { %7606 = vmatprep.mubr.f32.mxu0 %v10382_v59  ;;  %9003 = vmatpush3.bf16.msra.mxu0 %v9000_v53  ;;  %v10450_v53 = vld [vmem:[%s10102_s22 + $0x138] sm:$0xff] }
  0x86   : > { %9005 = vmatprep.subr.bf16.mxu0 %v9004_v62 }
  0x88   : > { %7607 = vmatmul.mubr.f32.gmra.mrb[12].mxu0 %v10393_v3 }
  0x89   : > { %7609 = vmatprep.mubr.f32.mxu0 %v10396_v19  ;;  %9007 = vmatpush3.bf16.msra.mxu0 %v9004_v62  ;;  %v10463_v62 = vld [vmem:[%s10102_s22 + $0x158] sm:$0xff] }
  0x8a   : > { %9009 = vmatprep.subr.bf16.mxu0 %v9008_v20 }
  0x8c   : > { %7610 = vmatmul.mubr.f32.gmra.mrb[14].mxu0 %v10407_v24 }
  0x8d   : > { %7612 = vmatprep.mubr.f32.mxu0 %v10410_v25  ;;  %9011 = vmatpush3.bf16.msra.mxu0 %v9008_v20  ;;  %v872_v20 = vld [vmem:[%s10102_s22 + $0x2] sm:$0xff] }
  0x8e   : > { %9013 = vmatprep.subr.bf16.mxu0 %v9012_v26 }
  0x90   : > { %7613 = vmatmul.mubr.f32.gmra.mrb[16].mxu0 %v10415_v29 }
  0x91   : > { %7615 = vmatprep.mubr.f32.mxu0 %v10418_v30 }
  0x94   : > { %7616 = vmatmul.mubr.f32.gmra.mrb[18].mxu0 %v10423_v32 }
  0x95   : > { %7618 = vmatprep.mubr.f32.mxu0 %v10426_v37 }
  0x98   : > { %7619 = vmatmul.mubr.f32.gmra.mrb[20].mxu0 %v10431_v38 }
  0x99   : > { %7621 = vmatprep.mubr.f32.mxu0 %v10434_v39 }
  0x9c   : > { %7622 = vmatmul.mubr.f32.gmra.mrb[22].mxu0 %v10439_v44 }
  0x9d   : > { %7624 = vmatprep.mubr.f32.mxu0 %v10442_v47 }
  0xa0   : > { %7625 = vmatmul.mubr.f32.gmra.mrb[24].mxu0 %v10447_v48 }
  0xa1   : > { %7627 = vmatprep.mubr.f32.mxu0 %v10450_v53 }
  0xa4   : > { %7628 = vmatmul.mubr.f32.gmra.mrb[26].mxu0 %v10455_v54 }
  0xa5   : > { %7630 = vmatprep.mubr.f32.mxu0 %v10458_v57 }
  0xa8   : > { %7631 = vmatmul.mubr.f32.gmra.mrb[28].mxu0 %v10463_v62 }
  0xa9   : > { %7633 = vmatprep.mubr.f32.mxu0 %v10466_v63 }
  0xac   : > { %7634 = vmatmul.mubr.f32.gmra.mrb[30].mxu0 %v10471_v0 }
  0xad   : > { %7668 = vmatprep.mubr.f32.mxu0 %v872_v20  ;;  %v10496_v20 = vld [vmem:[%s10102_s22 + $0x32] sm:$0xff] }
  0xae   : > { %12293 = vst [vmem:[#allocation12_spill] sm:$0xff] %v10496_v20 }
  0xb0   : > { %7669 = vmatmul.mubr.f32.vlgmr.msra.gmra.mrb[0].mxu0 %v873_v18  ;;  %v10507_v18 = vld [vmem:[%s10102_s22 + $0x3a] sm:$0xff] }
  0xb1   : > { %9015 = vmatpush3.bf16.msra.mxu0 %v9012_v26  ;;  %7671 = vmatprep.mubr.f32.mxu0 %v10483_v17  ;;  %12294 = vst [vmem:[#allocation13_spill] sm:$0xff] %v10507_v18  ;;  %v10510_v26 = vld [vmem:[%s10102_s22 + $0x4a] sm:$0xff] }
  0xb2   : > { %9017 = vmatprep.subr.bf16.mxu0 %v9016_v16  ;;  %12295 = vst [vmem:[#allocation14_spill] sm:$0xff] %v10510_v26  ;;  %v6198_v17 = vld [vmem:[%s12210_s1 + $0x1c8] sm:$0xff] }
  0xb3   : > { %v9028_v12 = vpack.c.bf16 %v6198_v17, %v6197_v15  ;;  %v6201_v15 = vld [vmem:[%s12210_s1 + $0x1e0] sm:$0xff] }
  0xb4   : > { %7672 = vmatmul.mubr.f32.gmra.mrb[2].mxu0 %v10493_v13  ;;  %v6200_v13 = vld [vmem:[%s12210_s1 + $0x1d8] sm:$0xff] }
  0xb5   : > { %7674 = vmatprep.mubr.f32.mxu0 %v10496_v20  ;;  %9019 = vmatpush3.bf16.msra.mxu0 %v9016_v16  ;;  %v10521_v20 = vld [vmem:[%s10102_s22 + $0x52] sm:$0xff]  ;;  %v10524_v16 = vld [vmem:[%s10102_s22 + $0x62] sm:$0xff]  ;;  %v9032_v17 = vpack.c.bf16 %v6200_v13, %v6199_v22 }
  0xb6   : > { %9021 = vmatprep.subr.bf16.mxu0 %v9020_v21  ;;  %12296 = vst [vmem:[#allocation15_spill] sm:$0xff] %v10521_v20  ;;  %12297 = vst [vmem:[#allocation16_spill] sm:$0xff] %v10524_v16  ;;  %v6203_v22 = vld [vmem:[%s12210_s1 + $0x1f0] sm:$0xff] }
  0xb8   : > { %7675 = vmatmul.mubr.f32.gmra.mrb[4].mxu0 %v10507_v18  ;;  %v6202_v18 = vld [vmem:[%s12210_s1 + $0x1e8] sm:$0xff] }
  0xb9   : > { %7677 = vmatprep.mubr.f32.mxu0 %v10510_v26  ;;  %9023 = vmatpush3.bf16.msra.mxu0 %v9020_v21  ;;  %v10535_v26 = vld [vmem:[%s10102_s22 + $0x6a] sm:$0xff]  ;;  %v10538_v21 = vld [vmem:[%s10102_s22 + $0x7a] sm:$0xff]  ;;  %v9036_v13 = vpack.c.bf16 %v6202_v18, %v6201_v15 }
  0xba   : > { %9025 = vmatprep.subr.bf16.mxu0 %v9024_v14  ;;  %12298 = vst [vmem:[#allocation17_spill] sm:$0xff] %v10535_v26  ;;  %12299 = vst [vmem:[#allocation18_spill] sm:$0xff] %v10538_v21  ;;  %v6237_v15 = vld [vmem:[%s12210_s1 + $0x200] sm:$0xff] }
  0xbc   : > { %7678 = vmatmul.mubr.f32.gmra.mrb[6].mxu0 %v10521_v20  ;;  %v6204_v20 = vld [vmem:[%s12210_s1 + $0x1f8] sm:$0xff] }
  0xbd   : > { %7680 = vmatprep.mubr.f32.mxu0 %v10524_v16  ;;  %9027 = vmatpush3.bf16.msra.mxu0 %v9024_v14  ;;  %v10549_v16 = vld [vmem:[%s10102_s22 + $0x82] sm:$0xff]  ;;  %v10552_v14 = vld [vmem:[%s10102_s22 + $0x92] sm:$0xff]  ;;  %v9040_v18 = vpack.c.bf16 %v6204_v20, %v6203_v22  ;;  %v10585_v22 = vld [vmem:[%s10102_s22 + $0xca] sm:$0xff] }
  0xbe   : > { %9029 = vmatprep.subr.bf16.mxu0 %v9028_v12  ;;  %12300 = vst [vmem:[#allocation19_spill] sm:$0xff] %v10552_v14  ;;  %12303 = vst [vmem:[#allocation22_spill] sm:$0xff] %v10585_v22 }
  0xc0   : > { %7681 = vmatmul.mubr.f32.gmra.mrb[8].mxu0 %v10535_v26  ;;  %v6238_v26 = vld [vmem:[%s12210_s1 + $0x208] sm:$0xff] }
  0xc1   : > { %7683 = vmatprep.mubr.f32.mxu0 %v10538_v21  ;;  %9031 = vmatpush3.bf16.msra.mxu0 %v9028_v12  ;;  %v10563_v21 = vld [vmem:[%s10102_s22 + $0x9a] sm:$0xff]  ;;  %v10566_v12 = vld [vmem:[%s10102_s22 + $0xaa] sm:$0xff]  ;;  %v9044_v20 = vpack.c.bf16 %v6238_v26, %v6237_v15  ;;  %v10596_v26 = vld [vmem:[%s10102_s22 + $0xf2] sm:$0xff] }
  0xc2   : > { %9033 = vmatprep.subr.bf16.mxu0 %v9032_v17  ;;  %12301 = vst [vmem:[#allocation20_spill] sm:$0xff] %v10563_v21  ;;  %12306 = vst [vmem:[#allocation25_spill] sm:$0xff] %v10596_v26  ;;  %v10604_v15 = vld [vmem:[%s10102_s22 + $0x10a] sm:$0xff] }
  0xc3   : > { %12308 = vst [vmem:[#allocation27_spill] sm:$0xff] %v10604_v15 }
  0xc4   : > { %7684 = vmatmul.mubr.f32.gmra.mrb[10].mxu0 %v10549_v16 }
  0xc5   : > { %7686 = vmatprep.mubr.f32.mxu0 %v10552_v14  ;;  %9035 = vmatpush3.bf16.msra.mxu0 %v9032_v17  ;;  %v10577_v17 = vld [vmem:[%s10102_s22 + $0xb2] sm:$0xff]  ;;  %v10580_v14 = vld [vmem:[%s10102_s22 + $0xc2] sm:$0xff] }
  0xc6   : > { %9037 = vmatprep.subr.bf16.mxu0 %v9036_v13  ;;  %12302 = vst [vmem:[#allocation21_spill] sm:$0xff] %v10580_v14 }
  0xc8   : > { %7687 = vmatmul.mubr.f32.gmra.mrb[12].mxu0 %v10563_v21  ;;  %v10588_v21 = vld [vmem:[%s10102_s22 + $0xda] sm:$0xff] }
  0xc9   : > { %7689 = vmatprep.mubr.f32.mxu0 %v10566_v12  ;;  %9039 = vmatpush3.bf16.msra.mxu0 %v9036_v13  ;;  %12304 = vst [vmem:[#allocation23_spill] sm:$0xff] %v10588_v21  ;;  %v10593_v13 = vld [vmem:[%s10102_s22 + $0xe2] sm:$0xff] }
  0xca   : > { %9041 = vmatprep.subr.bf16.mxu0 %v9040_v18  ;;  %12305 = vst [vmem:[#allocation24_spill] sm:$0xff] %v10593_v13 }
  0xcc   : > { %7690 = vmatmul.mubr.f32.gmra.mrb[14].mxu0 %v10577_v17 }
  0xcd   : > { %7692 = vmatprep.mubr.f32.mxu0 %v10580_v14  ;;  %9043 = vmatpush3.bf16.msra.mxu0 %v9040_v18  ;;  %v10601_v18 = vld [vmem:[%s10102_s22 + $0xfa] sm:$0xff] }
  0xce   : > { %9045 = vmatprep.subr.bf16.mxu0 %v9044_v20  ;;  %12307 = vst [vmem:[#allocation26_spill] sm:$0xff] %v10601_v18  ;;  %v10633_v14 = vld [vmem:[%s10102_s22 + $0x15a] sm:$0xff] }
  0xcf   : > { %12315 = vst [vmem:[#allocation34_spill] sm:$0xff] %v10633_v14 }
  0xd0   : > { %7693 = vmatmul.mubr.f32.gmra.mrb[16].mxu0 %v10585_v22  ;;  %v10612_v22 = vld [vmem:[%s10102_s22 + $0x122] sm:$0xff] }
  0xd1   : > { %7695 = vmatprep.mubr.f32.mxu0 %v10588_v21  ;;  %v10609_v21 = vld [vmem:[%s10102_s22 + $0x112] sm:$0xff]  ;;  %12310 = vst [vmem:[#allocation29_spill] sm:$0xff] %v10612_v22 }
  0xd2   : > { %12309 = vst [vmem:[#allocation28_spill] sm:$0xff] %v10609_v21 }
  0xd4   : > { %7696 = vmatmul.mubr.f32.gmra.mrb[18].mxu0 %v10593_v13  ;;  %v10620_v13 = vld [vmem:[%s10102_s22 + $0x13a] sm:$0xff] }
  0xd5   : > { %7698 = vmatprep.mubr.f32.mxu0 %v10596_v26  ;;  %v10617_v26 = vld [vmem:[%s10102_s22 + $0x12a] sm:$0xff]  ;;  %12312 = vst [vmem:[#allocation31_spill] sm:$0xff] %v10620_v13 }
  0xd6   : > { %12311 = vst [vmem:[#allocation30_spill] sm:$0xff] %v10617_v26 }
  0xd8   : > { %7699 = vmatmul.mubr.f32.gmra.mrb[20].mxu0 %v10601_v18  ;;  %v10625_v18 = vld [vmem:[%s10102_s22 + $0x142] sm:$0xff] }
  0xd9   : > { %7701 = vmatprep.mubr.f32.mxu0 %v10604_v15  ;;  %12313 = vst [vmem:[#allocation32_spill] sm:$0xff] %v10625_v18  ;;  %v10628_v15 = vld [vmem:[%s10102_s22 + $0x152] sm:$0xff] }
  0xda   : > { %12314 = vst [vmem:[#allocation33_spill] sm:$0xff] %v10628_v15 }
  0xdc   : > { %7702 = vmatmul.mubr.f32.gmra.mrb[22].mxu0 %v10609_v21  ;;  %v10636_v21 = vld [vmem:[%s10102_s22 + $0x16a] sm:$0xff] }
  0xdd   : > { %7704 = vmatprep.mubr.f32.mxu0 %v10612_v22  ;;  %12316 = vst [vmem:[#allocation35_spill] sm:$0xff] %v10636_v21  ;;  %v10641_v22 = vld [vmem:[%s10102_s22 + $0x172] sm:$0xff] }
  0xe0   : > { %7705 = vmatmul.mubr.f32.gmra.mrb[24].mxu0 %v10617_v26 }
  0xe1   : > { %7707 = vmatprep.mubr.f32.mxu0 %v10620_v13  ;;  %v6239_v13 = vld [vmem:[%s12210_s1 + $0x210] sm:$0xff] }
  0xe4   : > { %7708 = vmatmul.mubr.f32.gmra.mrb[26].mxu0 %v10625_v18  ;;  %v6240_v18 = vld [vmem:[%s12210_s1 + $0x218] sm:$0xff] }
  0xe5   : > { %7710 = vmatprep.mubr.f32.mxu0 %v10628_v15  ;;  %v9048_v15 = vpack.c.bf16 %v6240_v18, %v6239_v13  ;;  %v6244_v13 = vld [vmem:[%s12210_s1 + $0x238] sm:$0xff]  ;;  %v6247_v18 = vld [vmem:[%s12210_s1 + $0x250] sm:$0xff] }
  0xe8   : > { %7711 = vmatmul.mubr.f32.gmra.mrb[28].mxu0 %v10633_v14  ;;  %v6241_v14 = vld [vmem:[%s12210_s1 + $0x220] sm:$0xff] }
  0xe9   : > { %7713 = vmatprep.mubr.f32.mxu0 %v10636_v21  ;;  %v6242_v21 = vld [vmem:[%s12210_s1 + $0x228] sm:$0xff] }
  0xea   : > { %v9052_v26 = vpack.c.bf16 %v6242_v21, %v6241_v14  ;;  %v6246_v21 = vld [vmem:[%s12210_s1 + $0x248] sm:$0xff] }
  0xec   : > { %7714 = vmatmul.mubr.f32.gmra.mrb[30].mxu0 %v10641_v22 }
  0xed   : > { %7748 = vmatprep.mubr.f32.mxu0 %v10313_v23  ;;  %v6243_v23 = vld [vmem:[%s12210_s1 + $0x230] sm:$0xff] }
  0xf0   : > { %7749 = vmatmul.mubr.f32.vlgmr.msra.gmra.mrb[0].mxu0 %v10323_v27  ;;  %v9056_v27 = vpack.c.bf16 %v6244_v13, %v6243_v23  ;;  %v6250_v13 = vld [vmem:[%s12210_s1 + $0x268] sm:$0xff] }
  0xf1   : > { %9047 = vmatpush3.bf16.msra.mxu0 %v9044_v20  ;;  %7751 = vmatprep.mubr.f32.mxu0 %v10326_v28  ;;  %v6245_v20 = vld [vmem:[%s12210_s1 + $0x240] sm:$0xff] }
  0xf2   : > { %9049 = vmatprep.subr.bf16.mxu0 %v9048_v15  ;;  %v9060_v14 = vpack.c.bf16 %v6246_v21, %v6245_v20  ;;  %v6252_v21 = vld [vmem:[%s12210_s1 + $0x278] sm:$0xff] }
  0xf4   : > { %7752 = vmatmul.mubr.f32.gmra.mrb[2].mxu0 %v10337_v33 }
  0xf5   : > { %7754 = vmatprep.mubr.f32.mxu0 %v10340_v34  ;;  %9051 = vmatpush3.bf16.msra.mxu0 %v9048_v15  ;;  %v6248_v15 = vld [vmem:[%s12210_s1 + $0x258] sm:$0xff] }
  0xf6   : > { %9053 = vmatprep.subr.bf16.mxu0 %v9052_v26  ;;  %v9064_v23 = vpack.c.bf16 %v6248_v15, %v6247_v18  ;;  %v6286_v15 = vld [vmem:[%s12210_s1 + $0x288] sm:$0xff] }
  0xf8   : > { %7755 = vmatmul.mubr.f32.gmra.mrb[4].mxu0 %v10351_v42 }
  0xf9   : > { %7757 = vmatprep.mubr.f32.mxu0 %v10354_v43  ;;  %9055 = vmatpush3.bf16.msra.mxu0 %v9052_v26  ;;  %v6249_v26 = vld [vmem:[%s12210_s1 + $0x260] sm:$0xff] }
  0xfa   : > { %9057 = vmatprep.subr.bf16.mxu0 %v9056_v27  ;;  %v9068_v20 = vpack.c.bf16 %v6250_v13, %v6249_v26  ;;  %v10727_v13 = vld [vmem:[%s10102_s22 + $0x188] sm:$0xff] }
  0xfc   : > { %7758 = vmatmul.mubr.f32.gmra.mrb[6].mxu0 %v10365_v49 }
  0xfd   : > { %7760 = vmatprep.mubr.f32.mxu0 %v10368_v52  ;;  %9059 = vmatpush3.bf16.msra.mxu0 %v9056_v27  ;;  %v6251_v27 = vld [vmem:[%s12210_s1 + $0x270] sm:$0xff] }
  0xfe   : > { %9061 = vmatprep.subr.bf16.mxu0 %v9060_v14  ;;  %v9072_v18 = vpack.c.bf16 %v6252_v21, %v6251_v27  ;;  %v6288_v27 = vld [vmem:[%s12210_s1 + $0x298] sm:$0xff] }
 0x100   : > { %7761 = vmatmul.mubr.f32.gmra.mrb[8].mxu0 %v10379_v58 }
 0x101   : > { %7763 = vmatprep.mubr.f32.mxu0 %v10382_v59  ;;  %9063 = vmatpush3.bf16.msra.mxu0 %v9060_v14  ;;  %v6285_v14 = vld [vmem:[%s12210_s1 + $0x280] sm:$0xff] }
 0x102   : > { %9065 = vmatprep.subr.bf16.mxu0 %v9064_v23  ;;  %v9076_v26 = vpack.c.bf16 %v6286_v15, %v6285_v14  ;;  %v6290_v14 = vld [vmem:[%s12210_s1 + $0x2a8] sm:$0xff] }
 0x104   : > { %7764 = vmatmul.mubr.f32.gmra.mrb[10].mxu0 %v10393_v3 }
 0x105   : > { %7766 = vmatprep.mubr.f32.mxu0 %v10396_v19  ;;  %9067 = vmatpush3.bf16.msra.mxu0 %v9064_v23  ;;  %v10722_v23 = vld [vmem:[%s10102_s22 + $0x180] sm:$0xff] }
 0x106   : > { %9069 = vmatprep.subr.bf16.mxu0 %v9068_v20 }
 0x108   : > { %7767 = vmatmul.mubr.f32.gmra.mrb[12].mxu0 %v10407_v24 }
 0x109   : > { %7769 = vmatprep.mubr.f32.mxu0 %v10410_v25  ;;  %9071 = vmatpush3.bf16.msra.mxu0 %v9068_v20  ;;  %v6287_v20 = vld [vmem:[%s12210_s1 + $0x290] sm:$0xff] }
 0x10a   : > { %9073 = vmatprep.subr.bf16.mxu0 %v9072_v18  ;;  %v9080_v21 = vpack.c.bf16 %v6288_v27, %v6287_v20  ;;  %v6292_v20 = vld [vmem:[%s12210_s1 + $0x2b8] sm:$0xff] }
 0x10b   : > { %v6296_v27 = vld [vmem:[%s12210_s1 + $0x2d8] sm:$0xff] }
 0x10c   : > { %7770 = vmatmul.mubr.f32.gmra.mrb[14].mxu0 %v10415_v29 }
 0x10d   : > { %7772 = vmatprep.mubr.f32.mxu0 %v10418_v30  ;;  %9075 = vmatpush3.bf16.msra.mxu0 %v9072_v18  ;;  %v6289_v18 = vld [vmem:[%s12210_s1 + $0x2a0] sm:$0xff] }
 0x10e   : > { %9077 = vmatprep.subr.bf16.mxu0 %v9076_v26  ;;  %v9084_v15 = vpack.c.bf16 %v6290_v14, %v6289_v18  ;;  %v6300_v18 = vld [vmem:[%s12210_s1 + $0x2f8] sm:$0xff]  ;;  %v6334_v14 = vld [vmem:[%s12210_s1 + $0x308] sm:$0xff] }
 0x110   : > { %7773 = vmatmul.mubr.f32.gmra.mrb[16].mxu0 %v10423_v32 }
 0x111   : > { %7775 = vmatprep.mubr.f32.mxu0 %v10426_v37 }
 0x114   : > { %7776 = vmatmul.mubr.f32.gmra.mrb[18].mxu0 %v10431_v38 }
 0x115   : > { %7778 = vmatprep.mubr.f32.mxu0 %v10434_v39 }
 0x118   : > { %7779 = vmatmul.mubr.f32.gmra.mrb[20].mxu0 %v10439_v44 }
 0x119   : > { %7781 = vmatprep.mubr.f32.mxu0 %v10442_v47 }
 0x11c   : > { %7782 = vmatmul.mubr.f32.gmra.mrb[22].mxu0 %v10447_v48 }
 0x11d   : > { %7784 = vmatprep.mubr.f32.mxu0 %v10450_v53 }
 0x120   : > { %7785 = vmatmul.mubr.f32.gmra.mrb[24].mxu0 %v10455_v54 }
 0x121   : > { %7787 = vmatprep.mubr.f32.mxu0 %v10458_v57 }
 0x124   : > { %7788 = vmatmul.mubr.f32.gmra.mrb[26].mxu0 %v10463_v62 }
 0x125   : > { %7790 = vmatprep.mubr.f32.mxu0 %v10466_v63 }
 0x128   : > { %7791 = vmatmul.mubr.f32.gmra.mrb[28].mxu0 %v10471_v0 }
 0x129   : > { %7793 = vmatprep.mubr.f32.mxu0 %v10722_v23 }
 0x12c   : > { %7794 = vmatmul.mubr.f32.gmra.mrb[30].mxu0 %v10727_v13 }
 0x12d   : > { %7828 = vmatprep.mubr.f32.mxu0 %v10143_v31  ;;  %v6291_v31 = vld [vmem:[%s12210_s1 + $0x2b0] sm:$0xff] }
 0x130   : > { %7829 = vmatmul.mubr.f32.vlgmr.msra.gmra.mrb[0].mxu0 %v10153_v35  ;;  %v9088_v35 = vpack.c.bf16 %v6292_v20, %v6291_v31  ;;  %v6337_v20 = vld [vmem:[%s12210_s1 + $0x320] sm:$0xff] }
 0x131   : > { %9079 = vmatpush3.bf16.msra.mxu0 %v9076_v26  ;;  %7831 = vmatprep.mubr.f32.mxu0 %v10156_v36  ;;  %v6293_v36 = vld [vmem:[%s12210_s1 + $0x2c0] sm:$0xff]  ;;  %v6294_v26 = vld [vmem:[%s12210_s1 + $0x2c8] sm:$0xff] }
 0x132   : > { %9081 = vmatprep.subr.bf16.mxu0 %v9080_v21 }
 0x134   : > { %7832 = vmatmul.mubr.f32.gmra.mrb[2].mxu0 %v10167_v40  ;;  %v9092_v40 = vpack.c.bf16 %v6294_v26, %v6293_v36  ;;  %v12325_v36 = vld [vmem:[#allocation11_spill] sm:$0xff]  ;;  %v12326_v26 = vld [vmem:[#allocation12_spill] sm:$0xff] }
 0x135   : > { %7834 = vmatprep.mubr.f32.mxu0 %v10170_v41  ;;  %9083 = vmatpush3.bf16.msra.mxu0 %v9080_v21  ;;  %v6295_v41 = vld [vmem:[%s12210_s1 + $0x2d0] sm:$0xff]  ;;  %v6298_v21 = vld [vmem:[%s12210_s1 + $0x2e8] sm:$0xff] }
 0x136   : > { %9085 = vmatprep.subr.bf16.mxu0 %v9084_v15 }
 0x138   : > { %7835 = vmatmul.mubr.f32.gmra.mrb[4].mxu0 %v10181_v45  ;;  %v9096_v45 = vpack.c.bf16 %v6296_v27, %v6295_v41  ;;  %v6339_v41 = vld [vmem:[%s12210_s1 + $0x330] sm:$0xff]  ;;  %v6340_v27 = vld [vmem:[%s12210_s1 + $0x338] sm:$0xff] }
 0x139   : > { %7837 = vmatprep.mubr.f32.mxu0 %v10184_v46  ;;  %9087 = vmatpush3.bf16.msra.mxu0 %v9084_v15  ;;  %v6297_v46 = vld [vmem:[%s12210_s1 + $0x2e0] sm:$0xff]  ;;  %v12324_v15 = vld [vmem:[#allocation10_spill] sm:$0xff] }
 0x13a   : > { %9089 = vmatprep.subr.bf16.mxu0 %v9088_v35 }
 0x13c   : > { %7838 = vmatmul.mubr.f32.gmra.mrb[6].mxu0 %v10195_v50  ;;  %v9100_v50 = vpack.c.bf16 %v6298_v21, %v6297_v46  ;;  %v12328_v46 = vld [vmem:[#allocation14_spill] sm:$0xff]  ;;  %v9120_v21 = vpack.c.bf16 %v6340_v27, %v6339_v41  ;;  %v12339_v41 = vld [vmem:[#allocation25_spill] sm:$0xff] }
 0x13d   : > { %7840 = vmatprep.mubr.f32.mxu0 %v10198_v51  ;;  %9091 = vmatpush3.bf16.msra.mxu0 %v9088_v35  ;;  %v6299_v51 = vld [vmem:[%s12210_s1 + $0x2f0] sm:$0xff]  ;;  %v6338_v35 = vld [vmem:[%s12210_s1 + $0x328] sm:$0xff] }
 0x13e   : > { %9093 = vmatprep.subr.bf16.mxu0 %v9092_v40  ;;  %v12340_v27 = vld [vmem:[#allocation26_spill] sm:$0xff] }
 0x140   : > { %7841 = vmatmul.mubr.f32.gmra.mrb[8].mxu0 %v10209_v55  ;;  %v9104_v55 = vpack.c.bf16 %v6300_v18, %v6299_v51  ;;  %v6342_v51 = vld [vmem:[%s12210_s1 + $0x348] sm:$0xff]  ;;  %v12329_v18 = vld [vmem:[#allocation15_spill] sm:$0xff] }
 0x141   : > { %7843 = vmatprep.mubr.f32.mxu0 %v10212_v56  ;;  %9095 = vmatpush3.bf16.msra.mxu0 %v9092_v40  ;;  %v6333_v56 = vld [vmem:[%s12210_s1 + $0x300] sm:$0xff]  ;;  %v9116_v40 = vpack.c.bf16 %v6338_v35, %v6337_v20  ;;  %v6382_v20 = vld [vmem:[%s12210_s1 + $0x388] sm:$0xff] }
 0x142   : > { %9097 = vmatprep.subr.bf16.mxu0 %v9096_v45  ;;  %v12335_v35 = vld [vmem:[#allocation21_spill] sm:$0xff] }
 0x144   : > { %7844 = vmatmul.mubr.f32.gmra.mrb[10].mxu0 %v10223_v60  ;;  %v9108_v60 = vpack.c.bf16 %v6334_v14, %v6333_v56  ;;  %v6343_v14 = vld [vmem:[%s12210_s1 + $0x350] sm:$0xff] }
 0x145   : > { %7846 = vmatprep.mubr.f32.mxu0 %v10226_v61  ;;  %9099 = vmatpush3.bf16.msra.mxu0 %v9096_v45  ;;  %v12317_v61 = vld [vmem:[#allocation3_spill] sm:$0xff]  ;;  %v12327_v45 = vld [vmem:[#allocation13_spill] sm:$0xff] }
 0x146   : > { %9101 = vmatprep.subr.bf16.mxu0 %v9100_v50 }
 0x148   : > { %7847 = vmatmul.mubr.f32.gmra.mrb[12].mxu0 %v10237_v1  ;;  %v12318_v1 = vld [vmem:[#allocation4_spill] sm:$0xff] }
 0x149   : > { %7849 = vmatprep.mubr.f32.mxu0 %v10240_v2  ;;  %9103 = vmatpush3.bf16.msra.mxu0 %v9100_v50  ;;  %v12319_v2 = vld [vmem:[#allocation5_spill] sm:$0xff] }
 0x14a   : > { %9105 = vmatprep.subr.bf16.mxu0 %v9104_v55  ;;  %v6341_v50 = vld [vmem:[%s12210_s1 + $0x340] sm:$0xff] }
 0x14b   : > { %v9124_v56 = vpack.c.bf16 %v6342_v51, %v6341_v50  ;;  %v12345_v50 = vld [vmem:[#allocation31_spill] sm:$0xff]  ;;  %v12346_v51 = vld [vmem:[#allocation32_spill] sm:$0xff] }
 0x14c   : > { %7850 = vmatmul.mubr.f32.gmra.mrb[14].mxu0 %v10245_v4  ;;  %v12320_v4 = vld [vmem:[#allocation6_spill] sm:$0xff] }
 0x14d   : > { %7852 = vmatprep.mubr.f32.mxu0 %v10248_v5  ;;  %9107 = vmatpush3.bf16.msra.mxu0 %v9104_v55  ;;  %v12321_v5 = vld [vmem:[#allocation7_spill] sm:$0xff]  ;;  %v12330_v55 = vld [vmem:[#allocation16_spill] sm:$0xff] }
 0x14e   : > { %9109 = vmatprep.subr.bf16.mxu0 %v9108_v60 }
 0x150   : > { %7853 = vmatmul.mubr.f32.gmra.mrb[16].mxu0 %v10253_v6  ;;  %v12322_v6 = vld [vmem:[#allocation8_spill] sm:$0xff] }
 0x151   : > { %7855 = vmatprep.mubr.f32.mxu0 %v10256_v7  ;;  %v10808_v7 = vld [vmem:[%s10102_s22 + $0x181] sm:$0xff] }
 0x154   : > { %7856 = vmatmul.mubr.f32.gmra.mrb[18].mxu0 %v10261_v8  ;;  %v12323_v8 = vld [vmem:[#allocation9_spill] sm:$0xff] }
 0x155   : > { %7858 = vmatprep.mubr.f32.mxu0 %v10264_v9  ;;  %v10813_v9 = vld [vmem:[%s10102_s22 + $0x189] sm:$0xff] }
 0x158   : > { %7859 = vmatmul.mubr.f32.gmra.mrb[20].mxu0 %v10269_v10  ;;  %v6335_v10 = vld [vmem:[%s12210_s1 + $0x310] sm:$0xff] }
 0x159   : > { %7861 = vmatprep.mubr.f32.mxu0 %v10272_v11  ;;  %v6336_v11 = vld [vmem:[%s12210_s1 + $0x318] sm:$0xff] }
 0x15a   : > { %v9112_v31 = vpack.c.bf16 %v6336_v11, %v6335_v10  ;;  %v6347_v10 = vld [vmem:[%s12210_s1 + $0x370] sm:$0xff]  ;;  %v6348_v11 = vld [vmem:[%s12210_s1 + $0x378] sm:$0xff] }
 0x15c   : > { %7862 = vmatmul.mubr.f32.gmra.mrb[22].mxu0 %v12317_v61  ;;  %v12331_v61 = vld [vmem:[#allocation17_spill] sm:$0xff] }
 0x15d   : > { %7864 = vmatprep.mubr.f32.mxu0 %v12318_v1  ;;  %v12332_v1 = vld [vmem:[#allocation18_spill] sm:$0xff] }
 0x160   : > { %7865 = vmatmul.mubr.f32.gmra.mrb[24].mxu0 %v12319_v2 }
 0x161   : > { %7867 = vmatprep.mubr.f32.mxu0 %v12320_v4  ;;  %v6345_v4 = vld [vmem:[%s12210_s1 + $0x360] sm:$0xff] }
 0x164   : > { %7868 = vmatmul.mubr.f32.gmra.mrb[26].mxu0 %v12321_v5  ;;  %v6346_v5 = vld [vmem:[%s12210_s1 + $0x368] sm:$0xff] }
 0x165   : > { %7870 = vmatprep.mubr.f32.mxu0 %v12322_v6  ;;  %v12333_v6 = vld [vmem:[#allocation19_spill] sm:$0xff] }
 0x168   : > { %7871 = vmatmul.mubr.f32.gmra.mrb[28].mxu0 %v12323_v8  ;;  %v9132_v8 = vpack.c.bf16 %v6346_v5, %v6345_v4  ;;  %v6386_v4 = vld [vmem:[%s12210_s1 + $0x3a8] sm:$0xff] }
 0x169   : > { %7873 = vmatprep.mubr.f32.mxu0 %v10808_v7 }
 0x16c   : > { %7874 = vmatmul.mubr.f32.gmra.mrb[30].mxu0 %v10813_v9 }
 0x16d   : > { %7908 = vmatprep.mubr.f32.mxu0 %v12324_v15  ;;  %v12334_v15 = vld [vmem:[#allocation20_spill] sm:$0xff] }
 0x170   : > { %7909 = vmatmul.mubr.f32.vlgmr.msra.gmra.mrb[0].mxu0 %v12325_v36 }
 0x171   : > { %9111 = vmatpush3.bf16.msra.mxu0 %v9108_v60  ;;  %7911 = vmatprep.mubr.f32.mxu0 %v12326_v26  ;;  %v6344_v60 = vld [vmem:[%s12210_s1 + $0x358] sm:$0xff]  ;;  %v12336_v26 = vld [vmem:[#allocation22_spill] sm:$0xff] }
 0x172   : > { %9113 = vmatprep.subr.bf16.mxu0 %v9112_v31  ;;  %v9128_v2 = vpack.c.bf16 %v6344_v60, %v6343_v14  ;;  %v10894_v14 = vld [vmem:[%s10102_s22 + $0x182] sm:$0xff]  ;;  %v10899_v60 = vld [vmem:[%s10102_s22 + $0x18a] sm:$0xff] }
 0x174   : > { %7912 = vmatmul.mubr.f32.gmra.mrb[2].mxu0 %v12327_v45  ;;  %v12342_v45 = vld [vmem:[#allocation28_spill] sm:$0xff] }
 0x175   : > { %7914 = vmatprep.mubr.f32.mxu0 %v12328_v46  ;;  %9115 = vmatpush3.bf16.msra.mxu0 %v9112_v31  ;;  %v6381_v31 = vld [vmem:[%s12210_s1 + $0x380] sm:$0xff] }
 0x176   : > { %9117 = vmatprep.subr.bf16.mxu0 %v9116_v40  ;;  %v9140_v36 = vpack.c.bf16 %v6382_v20, %v6381_v31  ;;  %v12343_v46 = vld [vmem:[#allocation29_spill] sm:$0xff]  ;;  %v6352_v31 = vld [vmem:[%s10102_s22 + $0x51] sm:$0xff] }
 0x177   : > { %v6353_v20 = vld [vmem:[%s10102_s22 + $0x61] sm:$0xff] }
 0x178   : > { %7915 = vmatmul.mubr.f32.gmra.mrb[4].mxu0 %v12329_v18  ;;  %v12347_v18 = vld [vmem:[#allocation33_spill] sm:$0xff] }
 0x179   : > { %7917 = vmatprep.mubr.f32.mxu0 %v12330_v55  ;;  %9119 = vmatpush3.bf16.msra.mxu0 %v9116_v40  ;;  %v12338_v40 = vld [vmem:[#allocation24_spill] sm:$0xff]  ;;  %v12348_v55 = vld [vmem:[#allocation34_spill] sm:$0xff] }
 0x17a   : > { %9121 = vmatprep.subr.bf16.mxu0 %v9120_v21 }
 0x17c   : > { %7918 = vmatmul.mubr.f32.gmra.mrb[6].mxu0 %v12331_v61  ;;  %v6383_v61 = vld [vmem:[%s12210_s1 + $0x390] sm:$0xff] }
 0x17d   : > { %7920 = vmatprep.mubr.f32.mxu0 %v12332_v1  ;;  %9123 = vmatpush3.bf16.msra.mxu0 %v9120_v21  ;;  %v12344_v21 = vld [vmem:[#allocation30_spill] sm:$0xff]  ;;  %v6384_v1 = vld [vmem:[%s12210_s1 + $0x398] sm:$0xff] }
 0x17e   : > { %9125 = vmatprep.subr.bf16.mxu0 %v9124_v56 }
 0x180   : > { %7921 = vmatmul.mubr.f32.gmra.mrb[8].mxu0 %v10549_v16  ;;  %v9136_v16 = vpack.c.bf16 %v6348_v11, %v6347_v10  ;;  %v6392_v10 = vld [vmem:[%s12210_s1 + $0x3d8] sm:$0xff]  ;;  %v6394_v11 = vld [vmem:[%s12210_s1 + $0x3e8] sm:$0xff] }
 0x181   : > { %7923 = vmatprep.mubr.f32.mxu0 %v12333_v6  ;;  %9127 = vmatpush3.bf16.msra.mxu0 %v9124_v56  ;;  %v12349_v56 = vld [vmem:[#allocation35_spill] sm:$0xff]  ;;  %v6388_v6 = vld [vmem:[%s12210_s1 + $0x3b8] sm:$0xff] }
 0x182   : > { %9129 = vmatprep.subr.bf16.mxu0 %v9128_v2 }
 0x184   : > { %7924 = vmatmul.mubr.f32.gmra.mrb[10].mxu0 %v12334_v15  ;;  %v6396_v15 = vld [vmem:[%s12210_s1 + $0x3f8] sm:$0xff] }
 0x185   : > { %7926 = vmatprep.mubr.f32.mxu0 %v10566_v12  ;;  %9131 = vmatpush3.bf16.msra.mxu0 %v9128_v2  ;;  %v12337_v12 = vld [vmem:[#allocation23_spill] sm:$0xff]  ;;  %v9144_v2 = vpack.c.bf16 %v6384_v1, %v6383_v61 }
 0x186   : > { %9133 = vmatprep.subr.bf16.mxu0 %v9132_v8 }
 0x188   : > { %7927 = vmatmul.mubr.f32.gmra.mrb[12].mxu0 %v10577_v17  ;;  %v12341_v17 = vld [vmem:[#allocation27_spill] sm:$0xff] }
 0x189   : > { %7929 = vmatprep.mubr.f32.mxu0 %v12335_v35  ;;  %9135 = vmatpush3.bf16.msra.mxu0 %v9132_v8  ;;  %v6390_v8 = vld [vmem:[%s12210_s1 + $0x3c8] sm:$0xff] }
 0x18a   : > { %9137 = vmatprep.subr.bf16.mxu0 %v9136_v16 }
 0x18c   : > { %7930 = vmatmul.mubr.f32.gmra.mrb[14].mxu0 %v12336_v26 }
 0x18d   : > { %7932 = vmatprep.mubr.f32.mxu0 %v12337_v12  ;;  %9139 = vmatpush3.bf16.msra.mxu0 %v9136_v16  ;;  %v6430_v16 = vld [vmem:[%s12210_s1 + $0x408] sm:$0xff]  ;;  %v6436_v12 = vld [vmem:[%s12210_s1 + $0x438] sm:$0xff] }
 0x18e   : > { %9141 = vmatprep.subr.bf16.mxu0 %v9140_v36 }
 0x190   : > { %7933 = vmatmul.mubr.f32.gmra.mrb[16].mxu0 %v12338_v40  ;;  %v6453_v40 = vld [vmem:[%s12213_s4 + $0xb0] sm:$0xff] }
 0x191   : > { %7935 = vmatprep.mubr.f32.mxu0 %v12339_v41  ;;  %v6454_v41 = vld [vmem:[%s12213_s4 + $0xb8] sm:$0xff] }
 0x194   : > { %7936 = vmatmul.mubr.f32.gmra.mrb[18].mxu0 %v12340_v27  ;;  %v6354_v27 = vld [vmem:[%s10102_s22 + $0x69] sm:$0xff] }
 0x195   : > { %7938 = vmatprep.mubr.f32.mxu0 %v12341_v17  ;;  %v6355_v17 = vld [vmem:[%s10102_s22 + $0x79] sm:$0xff] }
 0x198   : > { %7939 = vmatmul.mubr.f32.gmra.mrb[20].mxu0 %v12342_v45 }
 0x199   : > { %7941 = vmatprep.mubr.f32.mxu0 %v12343_v46  ;;  %v6437_v46 = vld [vmem:[%s12210_s1 + $0x440] sm:$0xff] }
 0x19c   : > { %7942 = vmatmul.mubr.f32.gmra.mrb[22].mxu0 %v12344_v21  ;;  %v9216_v21 = vpack.c.bf16 %v6454_v41, %v6453_v40  ;;  %v6415_v40 = vld [vmem:[%s10102_s22 + $0x10a] sm:$0xff]  ;;  %v6416_v41 = vld [vmem:[%s10102_s22 + $0x112] sm:$0xff] }
 0x19d   : > { %7944 = vmatprep.mubr.f32.mxu0 %v12345_v50  ;;  %v6438_v50 = vld [vmem:[%s12210_s1 + $0x448] sm:$0xff] }
 0x19e   : > { %v9188_v61 = vpack.c.bf16 %v6438_v50, %v6437_v46  ;;  %v6420_v46 = vld [vmem:[%s10102_s22 + $0x142] sm:$0xff]  ;;  %v6422_v50 = vld [vmem:[%s10102_s22 + $0x15a] sm:$0xff] }
 0x1a0   : > { %7945 = vmatmul.mubr.f32.gmra.mrb[24].mxu0 %v12346_v51  ;;  %v6455_v51 = vld [vmem:[%s12213_s4 + $0xc0] sm:$0xff] }
 0x1a1   : > { %7947 = vmatprep.mubr.f32.mxu0 %v12347_v18  ;;  %v6456_v18 = vld [vmem:[%s12213_s4 + $0xc8] sm:$0xff] }
 0x1a2   : > { %v9220_v1 = vpack.c.bf16 %v6456_v18, %v6455_v51  ;;  %v6423_v51 = vld [vmem:[%s10102_s22 + $0x16a] sm:$0xff]  ;;  %v6424_v18 = vld [vmem:[%s10102_s22 + $0x172] sm:$0xff] }
 0x1a4   : > { %7948 = vmatmul.mubr.f32.gmra.mrb[26].mxu0 %v12348_v55  ;;  %v6356_v55 = vld [vmem:[%s10102_s22 + $0x81] sm:$0xff] }
 0x1a5   : > { %7950 = vmatprep.mubr.f32.mxu0 %v12349_v56  ;;  %v6357_v56 = vld [vmem:[%s10102_s22 + $0x91] sm:$0xff] }
 0x1a8   : > { %7951 = vmatmul.mubr.f32.gmra.mrb[28].mxu0 %v10641_v22  ;;  %v6385_v22 = vld [vmem:[%s12210_s1 + $0x3a0] sm:$0xff] }
 0x1a9   : > { %7953 = vmatprep.mubr.f32.mxu0 %v10894_v14  ;;  %v9148_v5 = vpack.c.bf16 %v6386_v4, %v6385_v22  ;;  %v6440_v22 = vld [vmem:[%s12210_s1 + $0x458] sm:$0xff] }
 0x1aa   : > { %v6358_v4 = vld [vmem:[%s10102_s22 + $0x99] sm:$0xff] }
 0x1ac   : > { %7954 = vmatmul.mubr.f32.gmra.mrb[30].mxu0 %v10899_v60 }
 0x1ad   : > { %7988 = vmatprep.mubr.f32.mxu0 %v10326_v28  ;;  %v6387_v28 = vld [vmem:[%s12210_s1 + $0x3b0] sm:$0xff] }
 0x1b0   : > { %7989 = vmatmul.mubr.f32.vlgmr.msra.gmra.mrb[0].mxu0 %v10337_v33  ;;  %v9152_v33 = vpack.c.bf16 %v6388_v6, %v6387_v28  ;;  %v6441_v6 = vld [vmem:[%s12210_s1 + $0x460] sm:$0xff] }
 0x1b1   : > { %9143 = vmatpush3.bf16.msra.mxu0 %v9140_v36  ;;  %7991 = vmatprep.mubr.f32.mxu0 %v10340_v34  ;;  %v6389_v34 = vld [vmem:[%s12210_s1 + $0x3c0] sm:$0xff]  ;;  %v6435_v36 = vld [vmem:[%s12210_s1 + $0x430] sm:$0xff] }
 0x1b2   : > { %9145 = vmatprep.subr.bf16.mxu0 %v9144_v2  ;;  %v9184_v45 = vpack.c.bf16 %v6436_v12, %v6435_v36  ;;  %v6412_v36 = vld [vmem:[%s10102_s22 + $0xe2] sm:$0xff]  ;;  %v6414_v12 = vld [vmem:[%s10102_s22 + $0xfa] sm:$0xff] }
 0x1b4   : > { %7992 = vmatmul.mubr.f32.gmra.mrb[2].mxu0 %v10351_v42  ;;  %v9156_v42 = vpack.c.bf16 %v6390_v8, %v6389_v34  ;;  %v6360_v34 = vld [vmem:[%s10102_s22 + $0xb1] sm:$0xff]  ;;  %v6361_v8 = vld [vmem:[%s10102_s22 + $0xc1] sm:$0xff] }
 0x1b5   : > { %7994 = vmatprep.mubr.f32.mxu0 %v10354_v43  ;;  %9147 = vmatpush3.bf16.msra.mxu0 %v9144_v2  ;;  %v6391_v43 = vld [vmem:[%s12210_s1 + $0x3d0] sm:$0xff] }
 0x1b6   : > { %9149 = vmatprep.subr.bf16.mxu0 %v9148_v5  ;;  %v6439_v2 = vld [vmem:[%s12210_s1 + $0x450] sm:$0xff] }
 0x1b7   : > { %v9192_v28 = vpack.c.bf16 %v6440_v22, %v6439_v2 }
 0x1b8   : > { %7995 = vmatmul.mubr.f32.gmra.mrb[4].mxu0 %v10365_v49  ;;  %v9160_v49 = vpack.c.bf16 %v6392_v10, %v6391_v43  ;;  %v6443_v43 = vld [vmem:[%s12210_s1 + $0x470] sm:$0xff]  ;;  %v6444_v10 = vld [vmem:[%s12210_s1 + $0x478] sm:$0xff] }
 0x1b9   : > { %7997 = vmatprep.mubr.f32.mxu0 %v10368_v52  ;;  %9151 = vmatpush3.bf16.msra.mxu0 %v9148_v5  ;;  %v6393_v52 = vld [vmem:[%s12210_s1 + $0x3e0] sm:$0xff]  ;;  %v6359_v5 = vld [vmem:[%s10102_s22 + $0xa9] sm:$0xff] }
 0x1ba   : > { %9153 = vmatprep.subr.bf16.mxu0 %v9152_v33 }
 0x1bc   : > { %7998 = vmatmul.mubr.f32.gmra.mrb[6].mxu0 %v10379_v58  ;;  %v9164_v58 = vpack.c.bf16 %v6394_v11, %v6393_v52  ;;  %v6363_v52 = vld [vmem:[%s10102_s22 + $0xd9] sm:$0xff]  ;;  %v9200_v11 = vpack.c.bf16 %v6444_v10, %v6443_v43  ;;  %v3196_v10 = vld [vmem:[%s12213_s4 + $0x10] sm:$0xff] }
 0x1bd   : > { %8000 = vmatprep.mubr.f32.mxu0 %v10382_v59  ;;  %9155 = vmatpush3.bf16.msra.mxu0 %v9152_v33  ;;  %v6395_v59 = vld [vmem:[%s12210_s1 + $0x3f0] sm:$0xff]  ;;  %v6442_v33 = vld [vmem:[%s12210_s1 + $0x468] sm:$0xff] }
 0x1be   : > { %9157 = vmatprep.subr.bf16.mxu0 %v9156_v42 }
 0x1c0   : > { %8001 = vmatmul.mubr.f32.gmra.mrb[8].mxu0 %v10393_v3  ;;  %v9168_v3 = vpack.c.bf16 %v6396_v15, %v6395_v59  ;;  %v6365_v59 = vld [vmem:[%s10102_s22 + $0xf1] sm:$0xff]  ;;  %v6366_v15 = vld [vmem:[%s10102_s22 + $0xf9] sm:$0xff] }
 0x1c1   : > { %8003 = vmatprep.mubr.f32.mxu0 %v10396_v19  ;;  %9159 = vmatpush3.bf16.msra.mxu0 %v9156_v42  ;;  %v6429_v19 = vld [vmem:[%s12210_s1 + $0x400] sm:$0xff]  ;;  %v9196_v42 = vpack.c.bf16 %v6442_v33, %v6441_v6 }
 0x1c2   : > { %9161 = vmatprep.subr.bf16.mxu0 %v9160_v49 }
 0x1c4   : > { %8004 = vmatmul.mubr.f32.gmra.mrb[10].mxu0 %v10407_v24  ;;  %v9172_v24 = vpack.c.bf16 %v6430_v16, %v6429_v19  ;;  %v6368_v19 = vld [vmem:[%s10102_s22 + $0x111] sm:$0xff]  ;;  %v6369_v16 = vld [vmem:[%s10102_s22 + $0x121] sm:$0xff] }
 0x1c5   : > { %8006 = vmatprep.mubr.f32.mxu0 %v10410_v25  ;;  %9163 = vmatpush3.bf16.msra.mxu0 %v9160_v49  ;;  %v6331_v25 = vld [vmem:[%s10102_s22 + $0x198] sm:$0xff]  ;;  %v6362_v49 = vld [vmem:[%s10102_s22 + $0xc9] sm:$0xff] }
 0x1c6   : > { %9165 = vmatprep.subr.bf16.mxu0 %v9164_v58 }
 0x1c8   : > { %8007 = vmatmul.mubr.f32.gmra.mrb[12].mxu0 %v10415_v29  ;;  %v6332_v29 = vld [vmem:[%s10102_s22 + $0x1a0] sm:$0xff] }
 0x1c9   : > { %8009 = vmatprep.mubr.f32.mxu0 %v10418_v30  ;;  %9167 = vmatpush3.bf16.msra.mxu0 %v9164_v58  ;;  %v6349_v30 = vld [vmem:[%s10102_s22 + $0x31] sm:$0xff]  ;;  %v6364_v58 = vld [vmem:[%s10102_s22 + $0xe1] sm:$0xff] }
 0x1ca   : > { %9169 = vmatprep.subr.bf16.mxu0 %v9168_v3 }
 0x1cc   : > { %8010 = vmatmul.mubr.f32.gmra.mrb[14].mxu0 %v10423_v32  ;;  %v6431_v32 = vld [vmem:[%s12210_s1 + $0x410] sm:$0xff] }
 0x1cd   : > { %8012 = vmatprep.mubr.f32.mxu0 %v10426_v37  ;;  %9171 = vmatpush3.bf16.msra.mxu0 %v9168_v3  ;;  %v6432_v37 = vld [vmem:[%s12210_s1 + $0x418] sm:$0xff]  ;;  %v6367_v3 = vld [vmem:[%s10102_s22 + $0x109] sm:$0xff] }
 0x1ce   : > { %9173 = vmatprep.subr.bf16.mxu0 %v9172_v24 }
 0x1d0   : > { %8013 = vmatmul.mubr.f32.gmra.mrb[16].mxu0 %v10431_v38  ;;  %v6447_v38 = vld [vmem:[%s12213_s4 + $0x80] sm:$0xff] }
 0x1d1   : > { %8015 = vmatprep.mubr.f32.mxu0 %v10434_v39  ;;  %v6448_v39 = vld [vmem:[%s12213_s4 + $0x88] sm:$0xff] }
 0x1d4   : > { %8016 = vmatmul.mubr.f32.gmra.mrb[18].mxu0 %v10439_v44  ;;  %v6449_v44 = vld [vmem:[%s12213_s4 + $0x90] sm:$0xff] }
 0x1d5   : > { %8018 = vmatprep.mubr.f32.mxu0 %v10442_v47  ;;  %v6350_v47 = vld [vmem:[%s10102_s22 + $0x39] sm:$0xff] }
 0x1d8   : > { %8019 = vmatmul.mubr.f32.gmra.mrb[20].mxu0 %v10447_v48  ;;  %v9204_v48 = vpack.c.bf16 %v6448_v39, %v6447_v38  ;;  %v6376_v38 = vld [vmem:[%s10102_s22 + $0x171] sm:$0xff]  ;;  %v6379_v39 = vld [vmem:[%s10102_s22 + $0x199] sm:$0xff] }
 0x1d9   : > { %8021 = vmatprep.mubr.f32.mxu0 %v10450_v53  ;;  %v6450_v53 = vld [vmem:[%s12213_s4 + $0x98] sm:$0xff] }
 0x1da   : > { %9205 = vmatprep.subr.bf16.mxu1 %v9204_v48 }
 0x1db   : > { %9207 = vmatpush3.bf16.msra.mxu1 %v9204_v48  ;;  %v6398_v48 = vld [vmem:[%s10102_s22 + $0x3a] sm:$0xff] }
 0x1dc   : > { %8022 = vmatmul.mubr.f32.gmra.mrb[22].mxu0 %v10455_v54  ;;  %v6351_v54 = vld [vmem:[%s10102_s22 + $0x49] sm:$0xff] }
 0x1dd   : > { %8024 = vmatprep.mubr.f32.mxu0 %v10458_v57  ;;  %v9176_v57 = vpack.c.bf16 %v6432_v37, %v6431_v32  ;;  %v6374_v32 = vld [vmem:[%s10102_s22 + $0x159] sm:$0xff]  ;;  %v6375_v37 = vld [vmem:[%s10102_s22 + $0x169] sm:$0xff] }
 0x1e0   : > { %8025 = vmatmul.mubr.f32.gmra.mrb[24].mxu0 %v10463_v62  ;;  %v6433_v62 = vld [vmem:[%s12210_s1 + $0x420] sm:$0xff] }
 0x1e1   : > { %8027 = vmatprep.mubr.f32.mxu0 %v10466_v63  ;;  %v9208_v63 = vpack.c.bf16 %v6450_v53, %v6449_v44  ;;  %v6380_v44 = vld [vmem:[%s10102_s22 + $0x1a1] sm:$0xff]  ;;  %v6399_v53 = vld [vmem:[%s10102_s22 + $0x4a] sm:$0xff] }
 0x1e3   : > { %9209 = vmatprep.subr.bf16.mxu1 %v9208_v63 }
 0x1e4   : > { %8028 = vmatmul.mubr.f32.gmra.mrb[26].mxu0 %v10471_v0  ;;  %v6434_v0 = vld [vmem:[%s12210_s1 + $0x428] sm:$0xff]  ;;  %9211 = vmatpush3.bf16.msra.mxu1 %v9208_v63  ;;  %v6405_v63 = vld [vmem:[%s10102_s22 + $0x92] sm:$0xff] }
 0x1e5   : > { %8030 = vmatprep.mubr.f32.mxu0 %v10722_v23  ;;  %v6451_v23 = vld [vmem:[%s12213_s4 + $0xa0] sm:$0xff]  ;;  %v9180_v35 = vpack.c.bf16 %v6434_v0, %v6433_v62 }
 0x1e6   : > { %v6404_v62 = vld [vmem:[%s10102_s22 + $0x82] sm:$0xff]  ;;  %v6406_v0 = vld [vmem:[%s10102_s22 + $0x9a] sm:$0xff] }
 0x1e8   : > { %8031 = vmatmul.mubr.f32.gmra.mrb[28].mxu0 %v10727_v13  ;;  %v6452_v13 = vld [vmem:[%s12213_s4 + $0xa8] sm:$0xff] }
 0x1e9   : > { %8033 = vmatprep.mubr.f32.mxu0 %v6331_v25  ;;  %v9212_v26 = vpack.c.bf16 %v6452_v13, %v6451_v23  ;;  %v6371_v25 = vld [vmem:[%s10102_s22 + $0x139] sm:$0xff]  ;;  %v6407_v23 = vld [vmem:[%s10102_s22 + $0xaa] sm:$0xff] }
 0x1ea   : > { %v6408_v13 = vld [vmem:[%s10102_s22 + $0xb2] sm:$0xff] }
 0x1eb   : > { %9213 = vmatprep.subr.bf16.mxu1 %v9212_v26 }
 0x1ec   : > { %8034 = vmatmul.mubr.f32.gmra.mrb[30].mxu0 %v6332_v29  ;;  %9215 = vmatpush3.bf16.msra.mxu1 %v9212_v26  ;;  %v6372_v29 = vld [vmem:[%s10102_s22 + $0x141] sm:$0xff]  ;;  %v6413_v26 = vld [vmem:[%s10102_s22 + $0xf2] sm:$0xff] }
 0x1ed   : > { %8068 = vmatprep.mubr.f32.mxu0 %v6349_v30  ;;  %9217 = vmatprep.subr.bf16.mxu1 %v9216_v21  ;;  %v6373_v30 = vld [vmem:[%s10102_s22 + $0x151] sm:$0xff] }
 0x1f0   : > { %8069 = vmatmul.mubr.f32.vlgmr.msra.gmra.mrb[0].mxu0 %v6350_v47  ;;  %9219 = vmatpush3.bf16.msra.mxu1 %v9216_v21  ;;  %v6397_v47 = vld [vmem:[%s10102_s22 + $0x32] sm:$0xff] }
 0x1f1   : > { %9175 = vmatpush3.bf16.msra.mxu0 %v9172_v24  ;;  %8071 = vmatprep.mubr.f32.mxu0 %v6351_v54  ;;  %v6370_v24 = vld [vmem:[%s10102_s22 + $0x129] sm:$0xff]  ;;  %v6400_v54 = vld [vmem:[%s10102_s22 + $0x52] sm:$0xff] }
 0x1f2   : > { %9177 = vmatprep.subr.bf16.mxu0 %v9176_v57  ;;  %9221 = vmatprep.subr.bf16.mxu1 %v9220_v1  ;;  %v6421_v21 = vld [vmem:[%s10102_s22 + $0x152] sm:$0xff] }
 0x1f4   : > { %8072 = vmatmul.mubr.f32.gmra.mrb[2].mxu0 %v6352_v31  ;;  %9223 = vmatpush3.bf16.msra.mxu1 %v9220_v1  ;;  %v6409_v31 = vld [vmem:[%s10102_s22 + $0xc2] sm:$0xff]  ;;  %v6458_v1 = vld [vmem:[%s12213_s4 + $0xd8] sm:$0xff] }
 0x1f5   : > { %8074 = vmatprep.mubr.f32.mxu0 %v6353_v20  ;;  %9179 = vmatpush3.bf16.msra.mxu0 %v9176_v57  ;;  %v6403_v57 = vld [vmem:[%s10102_s22 + $0x7a] sm:$0xff]  ;;  %v6410_v20 = vld [vmem:[%s10102_s22 + $0xca] sm:$0xff] }
 0x1f6   : > { %9181 = vmatprep.subr.bf16.mxu0 %v9180_v35 }
 0x1f8   : > { %8075 = vmatmul.mubr.f32.gmra.mrb[4].mxu0 %v6354_v27  ;;  %v6417_v27 = vld [vmem:[%s10102_s22 + $0x122] sm:$0xff] }
 0x1f9   : > { %8077 = vmatprep.mubr.f32.mxu0 %v6355_v17  ;;  %9183 = vmatpush3.bf16.msra.mxu0 %v9180_v35  ;;  %v6411_v35 = vld [vmem:[%s10102_s22 + $0xda] sm:$0xff]  ;;  %v6418_v17 = vld [vmem:[%s10102_s22 + $0x12a] sm:$0xff] }
 0x1fa   : > { %9185 = vmatprep.subr.bf16.mxu0 %v9184_v45 }
 0x1fc   : > { %8078 = vmatmul.mubr.f32.gmra.mrb[6].mxu0 %v6356_v55  ;;  %v6427_v55 = vld [vmem:[%s10102_s22 + $0x19a] sm:$0xff] }
 0x1fd   : > { %8080 = vmatprep.mubr.f32.mxu0 %v6357_v56  ;;  %9187 = vmatpush3.bf16.msra.mxu0 %v9184_v45  ;;  %v6419_v45 = vld [vmem:[%s10102_s22 + $0x13a] sm:$0xff]  ;;  %v6428_v56 = vld [vmem:[%s10102_s22 + $0x1a2] sm:$0xff] }
 0x1fe   : > { %9189 = vmatprep.subr.bf16.mxu0 %v9188_v61 }
 0x200   : > { %8081 = vmatmul.mubr.f32.gmra.mrb[8].mxu0 %v6358_v4  ;;  %v10023_v4 = vmov 0.0  }
 0x201   : > { %8083 = vmatprep.mubr.f32.mxu0 %v6359_v5  ;;  %9191 = vmatpush3.bf16.msra.mxu0 %v9188_v61  ;;  %v6457_v61 = vld [vmem:[%s12213_s4 + $0xd0] sm:$0xff]  ;;  %283 = vst [vmem:[#allocation2] sm:$0xff] %v10023_v4  ;;  %284 = vst [vmem:[#allocation2 + $0x8] sm:$0xff] %v10023_v4 }
 0x202   : > { %9193 = vmatprep.subr.bf16.mxu0 %v9192_v28  ;;  %v9224_v2 = vpack.c.bf16 %v6458_v1, %v6457_v61  ;;  %285 = vst [vmem:[#allocation2 + $0x10] sm:$0x3] %v10023_v4  ;;  %287 = vst [vmem:[#allocation2 + $0x198] sm:$0xff] %v10023_v4  ;;  %v6461_v5 = vld [vmem:[%s12213_s4 + $0xf0] sm:$0xff] }
 0x203   : > { %288 = vst [vmem:[#allocation2 + $0x1a0] sm:$0xff] %v10023_v4  ;;  %289 = vst [vmem:[#allocation2 + $0x1a8] sm:$0x3] %v10023_v4 }
 0x204   : > { %8084 = vmatmul.mubr.f32.gmra.mrb[10].mxu0 %v6360_v34  ;;  %9225 = vmatprep.subr.bf16.mxu1 %v9224_v2  ;;  %291 = vst [vmem:[#allocation2 + $0x18] sm:$0x1] %v10023_v4  ;;  %292 = vst [vmem:[#allocation2 + $0x30] sm:$0x1] %v10023_v4 }
 0x205   : > { %8086 = vmatprep.mubr.f32.mxu0 %v6361_v8  ;;  %9195 = vmatpush3.bf16.msra.mxu0 %v9192_v28  ;;  %293 = vst [vmem:[#allocation2 + $0x48] sm:$0x1] %v10023_v4  ;;  %294 = vst [vmem:[#allocation2 + $0x60] sm:$0x1] %v10023_v4  ;;  %v6462_v28 = vld [vmem:[%s12213_s4 + $0xf8] sm:$0xff]  ;;  %v3194_v8 = vld [vmem:[%s12213_s4] sm:$0xff] }
 0x206   : > { %9197 = vmatprep.subr.bf16.mxu0 %v9196_v42  ;;  %9227 = vmatpush3.bf16.msra.mxu1 %v9224_v2  ;;  %295 = vst [vmem:[#allocation2 + $0x78] sm:$0x1] %v10023_v4  ;;  %296 = vst [vmem:[#allocation2 + $0x90] sm:$0x1] %v10023_v4  ;;  %v9232_v6 = vpack.c.bf16 %v6462_v28, %v6461_v5 }
 0x207   : > { %297 = vst [vmem:[#allocation2 + $0xa8] sm:$0x1] %v10023_v4  ;;  %298 = vst [vmem:[#allocation2 + $0xc0] sm:$0x1] %v10023_v4 }
 0x208   : > { %8087 = vmatmul.mubr.f32.gmra.mrb[12].mxu0 %v6362_v49  ;;  %299 = vst [vmem:[#allocation2 + $0xd8] sm:$0x1] %v10023_v4  ;;  %300 = vst [vmem:[#allocation2 + $0xf0] sm:$0x1] %v10023_v4  ;;  %v3210_v33 = vld [vmem:[#allocation2 + $0x1] sm:$0xff]  ;;  %v3197_v49 = vld [vmem:[%s12213_s4 + $0x18] sm:$0xff] }
 0x209   : > { %8089 = vmatprep.mubr.f32.mxu0 %v6363_v52  ;;  %9199 = vmatpush3.bf16.msra.mxu0 %v9196_v42  ;;  %301 = vst [vmem:[#allocation2 + $0x108] sm:$0x1] %v10023_v4  ;;  %302 = vst [vmem:[#allocation2 + $0x120] sm:$0x1] %v10023_v4  ;;  %v3211_v34 = vld [vmem:[#allocation2 + $0x9] sm:$0xff]  ;;  %v9240_v52 = vpack.c.bf16 %v3197_v49, %v3196_v10 }
 0x20a   : > { %9201 = vmatprep.subr.bf16.mxu0 %v9200_v11  ;;  %303 = vst [vmem:[#allocation2 + $0x138] sm:$0x1] %v10023_v4  ;;  %304 = vst [vmem:[#allocation2 + $0x150] sm:$0x1] %v10023_v4  ;;  %8228 = vmatprep.mubr.f32.mxu1 %v3210_v33  ;;  %v3195_v42 = vld [vmem:[%s12213_s4 + $0x8] sm:$0xff] }
 0x20b   : > { %305 = vst [vmem:[#allocation2 + $0x168] sm:$0x1] %v10023_v4  ;;  %306 = vst [vmem:[#allocation2 + $0x180] sm:$0x1] %v10023_v4  ;;  %v9236_v43 = vpack.c.bf16 %v3195_v42, %v3194_v8 }
 0x20c   : > { %8090 = vmatmul.mubr.f32.gmra.mrb[14].mxu0 %v6364_v58  ;;  %307 = vst [vmem:[#allocation2 + $0x29] sm:$0x1] %v10023_v4  ;;  %308 = vst [vmem:[#allocation2 + $0x41] sm:$0x1] %v10023_v4  ;;  %v3199_v58 = vld [vmem:[%s12213_s4 + $0x28] sm:$0xff] }
 0x20d   : > { %8092 = vmatprep.mubr.f32.mxu0 %v6365_v59  ;;  %9203 = vmatpush3.bf16.msra.mxu0 %v9200_v11  ;;  %309 = vst [vmem:[#allocation2 + $0x59] sm:$0x1] %v10023_v4  ;;  %310 = vst [vmem:[#allocation2 + $0x71] sm:$0x1] %v10023_v4  ;;  %v3198_v11 = vld [vmem:[%s12213_s4 + $0x20] sm:$0xff] }
 0x20e   : > { %311 = vst [vmem:[#allocation2 + $0x89] sm:$0x1] %v10023_v4  ;;  %312 = vst [vmem:[#allocation2 + $0xa1] sm:$0x1] %v10023_v4  ;;  %v9244_v59 = vpack.c.bf16 %v3199_v58, %v3198_v11 }
 0x20f   : > { %313 = vst [vmem:[#allocation2 + $0xb9] sm:$0x1] %v10023_v4  ;;  %314 = vst [vmem:[#allocation2 + $0xd1] sm:$0x1] %v10023_v4 }
 0x210   : > { %8093 = vmatmul.mubr.f32.gmra.mrb[16].mxu0 %v6366_v15  ;;  %315 = vst [vmem:[#allocation2 + $0xe9] sm:$0x1] %v10023_v4  ;;  %316 = vst [vmem:[#allocation2 + $0x101] sm:$0x1] %v10023_v4  ;;  %v3200_v15 = vld [vmem:[%s12213_s4 + $0x30] sm:$0xff] }
 0x211   : > { %8095 = vmatprep.mubr.f32.mxu0 %v6367_v3  ;;  %317 = vst [vmem:[#allocation2 + $0x119] sm:$0x1] %v10023_v4  ;;  %318 = vst [vmem:[#allocation2 + $0x131] sm:$0x1] %v10023_v4  ;;  %v3201_v3 = vld [vmem:[%s12213_s4 + $0x38] sm:$0xff] }
 0x212   : > { %319 = vst [vmem:[#allocation2 + $0x149] sm:$0x1] %v10023_v4  ;;  %320 = vst [vmem:[#allocation2 + $0x161] sm:$0x1] %v10023_v4 }
 0x213   : > { %321 = vst [vmem:[#allocation2 + $0x179] sm:$0x1] %v10023_v4  ;;  %322 = vst [vmem:[#allocation2 + $0x191] sm:$0x1] %v10023_v4 }
 0x214   : > { %8096 = vmatmul.mubr.f32.gmra.mrb[18].mxu0 %v6368_v19  ;;  %v9248_v19 = vpack.c.bf16 %v3201_v3, %v3200_v15 }
 0x215   : > { %8098 = vmatprep.mubr.f32.mxu0 %v6369_v16  ;;  %v3202_v16 = vld [vmem:[%s12213_s4 + $0x40] sm:$0xff] }
 0x218   : > { %8099 = vmatmul.mubr.f32.gmra.mrb[20].mxu0 %v6370_v24  ;;  %v3203_v24 = vld [vmem:[%s12213_s4 + $0x48] sm:$0xff] }
 0x219   : > { %8101 = vmatprep.mubr.f32.mxu0 %v6371_v25  ;;  %v9252_v25 = vpack.c.bf16 %v3203_v24, %v3202_v16 }
 0x21c   : > { %8102 = vmatmul.mubr.f32.gmra.mrb[22].mxu0 %v6372_v29  ;;  %v3204_v29 = vld [vmem:[%s12213_s4 + $0x50] sm:$0xff] }
 0x21d   : > { %8104 = vmatprep.mubr.f32.mxu0 %v6373_v30  ;;  %v3205_v30 = vld [vmem:[%s12213_s4 + $0x58] sm:$0xff] }
 0x220   : > { %8105 = vmatmul.mubr.f32.gmra.mrb[24].mxu0 %v6374_v32  ;;  %v9256_v32 = vpack.c.bf16 %v3205_v30, %v3204_v29 }
 0x221   : > { %8107 = vmatprep.mubr.f32.mxu0 %v6375_v37  ;;  %v3206_v37 = vld [vmem:[%s12213_s4 + $0x60] sm:$0xff] }
 0x224   : > { %8108 = vmatmul.mubr.f32.gmra.mrb[26].mxu0 %v6376_v38  ;;  %v3207_v38 = vld [vmem:[%s12213_s4 + $0x68] sm:$0xff] }
 0x225   : > { %8110 = vmatprep.mubr.f32.mxu0 %v10808_v7  ;;  %v6401_v7 = vld [vmem:[%s10102_s22 + $0x62] sm:$0xff] }
 0x228   : > { %8111 = vmatmul.mubr.f32.gmra.mrb[28].mxu0 %v10813_v9  ;;  %v6402_v9 = vld [vmem:[%s10102_s22 + $0x6a] sm:$0xff] }
 0x229   : > { %8113 = vmatprep.mubr.f32.mxu0 %v6379_v39  ;;  %v9260_v39 = vpack.c.bf16 %v3207_v38, %v3206_v37 }
 0x22c   : > { %8114 = vmatmul.mubr.f32.gmra.mrb[30].mxu0 %v6380_v44  ;;  %v3208_v44 = vld [vmem:[%s12213_s4 + $0x70] sm:$0xff] }
 0x22d   : > { %8148 = vmatprep.mubr.f32.mxu0 %v6397_v47  ;;  %v3209_v47 = vld [vmem:[%s12213_s4 + $0x78] sm:$0xff] }
 0x230   : > { %8149 = vmatmul.mubr.f32.vlgmr.msra.gmra.mrb[0].mxu0 %v6398_v48  ;;  %v9264_v48 = vpack.c.bf16 %v3209_v47, %v3208_v44 }
 0x231   : > { %8151 = vmatprep.mubr.f32.mxu0 %v6399_v53  ;;  %v6463_v53 = vld [vmem:[%s12213_s4 + $0x100] sm:$0xff] }
 0x234   : > { %8152 = vmatmul.mubr.f32.gmra.mrb[2].mxu0 %v6400_v54  ;;  %v6464_v54 = vld [vmem:[%s12213_s4 + $0x108] sm:$0xff] }
 0x235   : > { %8154 = vmatprep.mubr.f32.mxu0 %v6401_v7  ;;  %v11228_v7 = vpack.c.bf16 %v6464_v54, %v6463_v53 }
 0x238   : > { %8155 = vmatmul.mubr.f32.gmra.mrb[4].mxu0 %v6402_v9  ;;  %v11234_v9 = vld [vmem:[%s12211_s2] ss:$0 sm:$0xff] }
 0x239   : > { %8157 = vmatprep.mubr.f32.mxu0 %v6403_v57  ;;  %v11239_v57 = vld [vmem:[%s12212_s3] ss:$0 sm:$0xff] }
 0x23c   : > { %8158 = vmatmul.mubr.f32.gmra.mrb[6].mxu0 %v6404_v62 }
 0x23d   : > { %8160 = vmatprep.mubr.f32.mxu0 %v6405_v63 }
 0x240   : > { %8161 = vmatmul.mubr.f32.gmra.mrb[8].mxu0 %v6406_v0 }
 0x241   : > { %8163 = vmatprep.mubr.f32.mxu0 %v6407_v23 }
 0x244   : > { %8164 = vmatmul.mubr.f32.gmra.mrb[10].mxu0 %v6408_v13 }
 0x245   : > { %8166 = vmatprep.mubr.f32.mxu0 %v6409_v31 }
 0x248   : > { %8167 = vmatmul.mubr.f32.gmra.mrb[12].mxu0 %v6410_v20 }
 0x249   : > { %8169 = vmatprep.mubr.f32.mxu0 %v6411_v35 }
 0x24c   : > { %8170 = vmatmul.mubr.f32.gmra.mrb[14].mxu0 %v6412_v36 }
 0x24d   : > { %8172 = vmatprep.mubr.f32.mxu0 %v6413_v26 }
 0x250   : > { %8173 = vmatmul.mubr.f32.gmra.mrb[16].mxu0 %v6414_v12 }
 0x251   : > { %8175 = vmatprep.mubr.f32.mxu0 %v6415_v40 }
 0x254   : > { %8176 = vmatmul.mubr.f32.gmra.mrb[18].mxu0 %v6416_v41 }
 0x255   : > { %8178 = vmatprep.mubr.f32.mxu0 %v6417_v27 }
 0x258   : > { %8179 = vmatmul.mubr.f32.gmra.mrb[20].mxu0 %v6418_v17 }
 0x259   : > { %8181 = vmatprep.mubr.f32.mxu0 %v6419_v45 }
 0x25c   : > { %8182 = vmatmul.mubr.f32.gmra.mrb[22].mxu0 %v6420_v46 }
 0x25d   : > { %8184 = vmatprep.mubr.f32.mxu0 %v6421_v21 }
 0x260   : > { %8185 = vmatmul.mubr.f32.gmra.mrb[24].mxu0 %v6422_v50 }
 0x261   : > { %8187 = vmatprep.mubr.f32.mxu0 %v6423_v51 }
 0x264   : > { %8188 = vmatmul.mubr.f32.gmra.mrb[26].mxu0 %v6424_v18 }
 0x265   : > { %8190 = vmatprep.mubr.f32.mxu0 %v10894_v14  ;;  %v6459_v14 = vld [vmem:[%s12213_s4 + $0xe0] sm:$0xff] }
 0x268   : > { %8191 = vmatmul.mubr.f32.gmra.mrb[28].mxu0 %v10899_v60  ;;  %v6460_v60 = vld [vmem:[%s12213_s4 + $0xe8] sm:$0xff] }
 0x269   : > { %8193 = vmatprep.mubr.f32.mxu0 %v6427_v55  ;;  %v9228_v22 = vpack.c.bf16 %v6460_v60, %v6459_v14 }
 0x26b   : > { %9229 = vmatprep.subr.bf16.mxu1 %v9228_v22 }
 0x26c   : > { %8194 = vmatmul.mubr.f32.gmra.mrb[30].mxu0 %v6428_v56  ;;  %9231 = vmatpush3.bf16.msra.mxu1 %v9228_v22 }
 0x26d   : > { %9233 = vmatprep.subr.bf16.mxu1 %v9232_v6 }
 0x270   : > { %9235 = vmatpush3.bf16.msra.mxu1 %v9232_v6 }
 0x271   : > { %9237 = vmatprep.subr.bf16.mxu1 %v9236_v43 }
 0x273   : > { %8229 = vmatmul.mubr.f32.vlgmr.msra.gmra.mrb[0].mxu1 %v3211_v34 }
 0x274   : > { %9239 = vmatpush3.bf16.msra.mxu1 %v9236_v43 }
 0x275   : > { %9241 = vmatprep.subr.bf16.mxu1 %v9240_v52 }
 0x278   : > { %9243 = vmatpush3.bf16.msra.mxu1 %v9240_v52 }
 0x279   : > { %9245 = vmatprep.subr.bf16.mxu1 %v9244_v59 }
 0x27c   : > { %9247 = vmatpush3.bf16.msra.mxu1 %v9244_v59 }
 0x27d   : > { %9249 = vmatprep.subr.bf16.mxu1 %v9248_v19 }
 0x280   : > { %9251 = vmatpush3.bf16.msra.mxu1 %v9248_v19 }
 0x281   : > { %9253 = vmatprep.subr.bf16.mxu1 %v9252_v25 }
 0x284   : > { %9255 = vmatpush3.bf16.msra.mxu1 %v9252_v25 }
 0x285   : > { %9257 = vmatprep.subr.bf16.mxu1 %v9256_v32 }
 0x288   : > { %9259 = vmatpush3.bf16.msra.mxu1 %v9256_v32 }
 0x289   : > { %9261 = vmatprep.subr.bf16.mxu1 %v9260_v39 }
 0x28c   : > { %9263 = vmatpush3.bf16.msra.mxu1 %v9260_v39 }
 0x28d   : > { %9265 = vmatprep.subr.bf16.mxu1 %v9264_v48 }
 0x290   : > { %9267 = vmatpush3.bf16.msra.mxu1 %v9264_v48 }
 0x291   : > { %9269 = vmatprep.subr.bf16.mxu1 %v11228_v7 }
 0x303   : > { %v8150_v62 = vpop.f32.mrb[0].mxu0 }
 0x304   : > { %v3027_v63 = vmul.f32 %v8150_v62, %v11234_v9  ;;  %v2829_v0 = vpop.f32.mrb[1].mxu0 }
 0x305   : > { %v3026_v23 = vmul.f32 %v11234_v9, %v2829_v0 }
 0x306   : > { %v3065_v13 = vadd.f32 %v11239_v57, %v3027_v63 }
 0x307   : > { %v3064_v31 = vadd.f32 %v11239_v57, %v3026_v23  ;;  %v8153_v20 = vpop.f32.mrb[2].mxu0 }
 0x308   : > { %v3097_v35 = vmax.f32 %v3065_v13, 0.0  ;;  %v3029_v36 = vmul.f32 %v8153_v20, %v11234_v9  ;;  %v2839_v26 = vpop.f32.mrb[3].mxu0 }
 0x309   : > { %v3096_v12 = vmax.f32 %v3064_v31, 0.0  ;;  %v3028_v40 = vmul.f32 %v11234_v9, %v2839_v26 }
 0x30a   : > { %3130 = vst [vmem:[#allocation2 + $0x21] sm:$0xff] %v3097_v35  ;;  %v3067_v41 = vadd.f32 %v11239_v57, %v3029_v36 }
 0x30b   : > { %3129 = vst [vmem:[#allocation2 + $0x19] sm:$0xff] %v3096_v12  ;;  %v3066_v27 = vadd.f32 %v11239_v57, %v3028_v40  ;;  %v8156_v17 = vpop.f32.mrb[4].mxu0  ;;  %8231 = vmatprep.mubr.f32.mxu1 %v3096_v12 }
 0x30c   : > { %v3099_v45 = vmax.f32 %v3067_v41, 0.0  ;;  %v3031_v46 = vmul.f32 %v8156_v17, %v11234_v9  ;;  %v2849_v21 = vpop.f32.mrb[5].mxu0  ;;  %8232 = vmatmul.mubr.f32.gmra.mrb[2].mxu1 %v3097_v35 }
 0x30d   : > { %v3098_v50 = vmax.f32 %v3066_v27, 0.0  ;;  %v3030_v51 = vmul.f32 %v11234_v9, %v2849_v21 }
 0x30e   : > { %3132 = vst [vmem:[#allocation2 + $0x39] sm:$0xff] %v3099_v45  ;;  %v3069_v18 = vadd.f32 %v11239_v57, %v3031_v46 }
 0x30f   : > { %3131 = vst [vmem:[#allocation2 + $0x31] sm:$0xff] %v3098_v50  ;;  %v3068_v55 = vadd.f32 %v11239_v57, %v3030_v51  ;;  %v8159_v56 = vpop.f32.mrb[6].mxu0  ;;  %8234 = vmatprep.mubr.f32.mxu1 %v3098_v50 }
 0x310   : > { %v3101_v61 = vmax.f32 %v3069_v18, 0.0  ;;  %v3033_v1 = vmul.f32 %v8159_v56, %v11234_v9  ;;  %v2859_v2 = vpop.f32.mrb[7].mxu0  ;;  %8235 = vmatmul.mubr.f32.gmra.mrb[4].mxu1 %v3099_v45 }
 0x311   : > { %v3100_v14 = vmax.f32 %v3068_v55, 0.0  ;;  %v3032_v60 = vmul.f32 %v11234_v9, %v2859_v2 }
 0x312   : > { %3134 = vst [vmem:[#allocation2 + $0x51] sm:$0xff] %v3101_v61  ;;  %v3071_v22 = vadd.f32 %v11239_v57, %v3033_v1 }
 0x313   : > { %3133 = vst [vmem:[#allocation2 + $0x49] sm:$0xff] %v3100_v14  ;;  %v3070_v5 = vadd.f32 %v11239_v57, %v3032_v60  ;;  %v8162_v28 = vpop.f32.mrb[8].mxu0  ;;  %8237 = vmatprep.mubr.f32.mxu1 %v3100_v14 }
 0x314   : > { %v3103_v6 = vmax.f32 %v3071_v22, 0.0  ;;  %v3035_v33 = vmul.f32 %v8162_v28, %v11234_v9  ;;  %v2869_v34 = vpop.f32.mrb[9].mxu0  ;;  %8238 = vmatmul.mubr.f32.gmra.mrb[6].mxu1 %v3101_v61 }
 0x315   : > { %v3102_v8 = vmax.f32 %v3070_v5, 0.0  ;;  %v3034_v42 = vmul.f32 %v11234_v9, %v2869_v34 }
 0x316   : > { %3136 = vst [vmem:[#allocation2 + $0x69] sm:$0xff] %v3103_v6  ;;  %v3073_v43 = vadd.f32 %v11239_v57, %v3035_v33 }
 0x317   : > { %3135 = vst [vmem:[#allocation2 + $0x61] sm:$0xff] %v3102_v8  ;;  %v3072_v10 = vadd.f32 %v11239_v57, %v3034_v42  ;;  %v8165_v49 = vpop.f32.mrb[10].mxu0  ;;  %8240 = vmatprep.mubr.f32.mxu1 %v3102_v8 }
 0x318   : > { %v3105_v52 = vmax.f32 %v3073_v43, 0.0  ;;  %v3037_v11 = vmul.f32 %v8165_v49, %v11234_v9  ;;  %v2879_v58 = vpop.f32.mrb[11].mxu0  ;;  %8241 = vmatmul.mubr.f32.gmra.mrb[8].mxu1 %v3103_v6 }
 0x319   : > { %v3104_v59 = vmax.f32 %v3072_v10, 0.0  ;;  %v3036_v15 = vmul.f32 %v11234_v9, %v2879_v58 }
 0x31a   : > { %3138 = vst [vmem:[#allocation2 + $0x81] sm:$0xff] %v3105_v52  ;;  %v3075_v3 = vadd.f32 %v11239_v57, %v3037_v11 }
 0x31b   : > { %3137 = vst [vmem:[#allocation2 + $0x79] sm:$0xff] %v3104_v59  ;;  %v3074_v19 = vadd.f32 %v11239_v57, %v3036_v15  ;;  %v8168_v16 = vpop.f32.mrb[12].mxu0  ;;  %8243 = vmatprep.mubr.f32.mxu1 %v3104_v59 }
 0x31c   : > { %v3107_v24 = vmax.f32 %v3075_v3, 0.0  ;;  %v3039_v25 = vmul.f32 %v8168_v16, %v11234_v9  ;;  %v2889_v29 = vpop.f32.mrb[13].mxu0  ;;  %8244 = vmatmul.mubr.f32.gmra.mrb[10].mxu1 %v3105_v52 }
 0x31d   : > { %v3106_v30 = vmax.f32 %v3074_v19, 0.0  ;;  %v3038_v32 = vmul.f32 %v11234_v9, %v2889_v29 }
 0x31e   : > { %3140 = vst [vmem:[#allocation2 + $0x99] sm:$0xff] %v3107_v24  ;;  %v3077_v37 = vadd.f32 %v11239_v57, %v3039_v25 }
 0x31f   : > { %3139 = vst [vmem:[#allocation2 + $0x91] sm:$0xff] %v3106_v30  ;;  %v3076_v38 = vadd.f32 %v11239_v57, %v3038_v32  ;;  %v8171_v39 = vpop.f32.mrb[14].mxu0  ;;  %8246 = vmatprep.mubr.f32.mxu1 %v3106_v30 }
 0x320   : > { %v3109_v44 = vmax.f32 %v3077_v37, 0.0  ;;  %v3041_v47 = vmul.f32 %v8171_v39, %v11234_v9  ;;  %v2899_v48 = vpop.f32.mrb[15].mxu0  ;;  %8247 = vmatmul.mubr.f32.gmra.mrb[12].mxu1 %v3107_v24 }
 0x321   : > { %v3108_v53 = vmax.f32 %v3076_v38, 0.0  ;;  %v3040_v54 = vmul.f32 %v11234_v9, %v2899_v48 }
 0x322   : > { %3142 = vst [vmem:[#allocation2 + $0xb1] sm:$0xff] %v3109_v44  ;;  %v3079_v62 = vadd.f32 %v11239_v57, %v3041_v47 }
 0x323   : > { %3141 = vst [vmem:[#allocation2 + $0xa9] sm:$0xff] %v3108_v53  ;;  %v3078_v63 = vadd.f32 %v11239_v57, %v3040_v54  ;;  %v8174_v0 = vpop.f32.mrb[16].mxu0  ;;  %8249 = vmatprep.mubr.f32.mxu1 %v3108_v53 }
 0x324   : > { %v3111_v23 = vmax.f32 %v3079_v62, 0.0  ;;  %v3043_v13 = vmul.f32 %v8174_v0, %v11234_v9  ;;  %v2909_v31 = vpop.f32.mrb[17].mxu0  ;;  %8250 = vmatmul.mubr.f32.gmra.mrb[14].mxu1 %v3109_v44 }
 0x325   : > { %v3110_v20 = vmax.f32 %v3078_v63, 0.0  ;;  %v3042_v35 = vmul.f32 %v11234_v9, %v2909_v31 }
 0x326   : > { %3144 = vst [vmem:[#allocation2 + $0xc9] sm:$0xff] %v3111_v23  ;;  %v3081_v36 = vadd.f32 %v11239_v57, %v3043_v13 }
 0x327   : > { %3143 = vst [vmem:[#allocation2 + $0xc1] sm:$0xff] %v3110_v20  ;;  %v3080_v26 = vadd.f32 %v11239_v57, %v3042_v35  ;;  %v8177_v12 = vpop.f32.mrb[18].mxu0  ;;  %8252 = vmatprep.mubr.f32.mxu1 %v3110_v20  ;;  %v6465_v20 = vld [vmem:[%s12213_s4 + $0x110] sm:$0xff] }
 0x328   : > { %v11277_v40 = vmax.f32 %v3081_v36, 0.0  ;;  %v3045_v41 = vmul.f32 %v8177_v12, %v11234_v9  ;;  %v2919_v27 = vpop.f32.mrb[19].mxu0  ;;  %8253 = vmatmul.mubr.f32.gmra.mrb[16].mxu1 %v3111_v23  ;;  %v6468_v12 = vld [vmem:[%s12213_s4 + $0x128] sm:$0xff] }
 0x329   : > { %v11280_v17 = vmax.f32 %v3080_v26, 0.0  ;;  %v3044_v45 = vmul.f32 %v11234_v9, %v2919_v27  ;;  %v6467_v26 = vld [vmem:[%s12213_s4 + $0x120] sm:$0xff] }
 0x32a   : > { %3146 = vst [vmem:[#allocation2 + $0xe1] sm:$0xff] %v11277_v40  ;;  %v3083_v46 = vadd.f32 %v11239_v57, %v3045_v41  ;;  %v11385_v41 = vld [vmem:[#allocation2 + $0x18] sm:$0xff]  ;;  %v9276_v27 = vpack.c.bf16 %v6468_v12, %v6467_v26 }
 0x32b   : > { %3145 = vst [vmem:[#allocation2 + $0xd9] sm:$0xff] %v11280_v17  ;;  %v3082_v21 = vadd.f32 %v11239_v57, %v3044_v45  ;;  %v8180_v50 = vpop.f32.mrb[20].mxu0  ;;  %8255 = vmatprep.mubr.f32.mxu1 %v11280_v17  ;;  %v11389_v45 = vld [vmem:[#allocation2 + $0x20] sm:$0xff] }
 0x32c   : > { %v11288_v51 = vmax.f32 %v3083_v46, 0.0  ;;  %v3047_v18 = vmul.f32 %v8180_v50, %v11234_v9  ;;  %v2929_v55 = vpop.f32.mrb[21].mxu0  ;;  %8256 = vmatmul.mubr.f32.gmra.mrb[18].mxu1 %v11277_v40  ;;  %v6469_v46 = vld [vmem:[%s12213_s4 + $0x130] sm:$0xff]  ;;  %v11401_v50 = vld [vmem:[#allocation2 + $0x38] sm:$0xff] }
 0x32d   : > { %v11292_v56 = vmax.f32 %v3082_v21, 0.0  ;;  %v3046_v61 = vmul.f32 %v11234_v9, %v2929_v55  ;;  %v6470_v21 = vld [vmem:[%s12213_s4 + $0x138] sm:$0xff]  ;;  %v6472_v55 = vld [vmem:[%s12213_s4 + $0x148] sm:$0xff] }
 0x32e   : > { %3148 = vst [vmem:[#allocation2 + $0xf9] sm:$0xff] %v11288_v51  ;;  %v3085_v1 = vadd.f32 %v11239_v57, %v3047_v18  ;;  %v6471_v18 = vld [vmem:[%s12213_s4 + $0x140] sm:$0xff] }
 0x32f   : > { %3147 = vst [vmem:[#allocation2 + $0xf1] sm:$0xff] %v11292_v56  ;;  %v3084_v2 = vadd.f32 %v11239_v57, %v3046_v61  ;;  %v8183_v14 = vpop.f32.mrb[22].mxu0  ;;  %8258 = vmatprep.mubr.f32.mxu1 %v11292_v56  ;;  %v11410_v61 = vld [vmem:[#allocation2 + $0x48] sm:$0xff] }
 0x330   : > { %v11300_v60 = vmax.f32 %v3085_v1, 0.0  ;;  %v3049_v22 = vmul.f32 %v8183_v14, %v11234_v9  ;;  %v2939_v5 = vpop.f32.mrb[23].mxu0  ;;  %8259 = vmatmul.mubr.f32.gmra.mrb[20].mxu1 %v11288_v51  ;;  %v9284_v1 = vpack.c.bf16 %v6472_v55, %v6471_v18  ;;  %v6473_v14 = vld [vmem:[%s12213_s4 + $0x150] sm:$0xff]  ;;  %v6482_v55 = vld [vmem:[%s12213_s4 + $0x198] sm:$0xff] }
 0x331   : > { %v11304_v28 = vmax.f32 %v3084_v2, 0.0  ;;  %v3048_v6 = vmul.f32 %v11234_v9, %v2939_v5  ;;  %v11413_v2 = vld [vmem:[#allocation2 + $0x50] sm:$0xff]  ;;  %v11422_v5 = vld [vmem:[#allocation2 + $0x60] sm:$0xff] }
 0x332   : > { %3150 = vst [vmem:[#allocation2 + $0x111] sm:$0xff] %v11300_v60  ;;  %v3087_v33 = vadd.f32 %v11239_v57, %v3049_v22  ;;  %v6474_v22 = vld [vmem:[%s12213_s4 + $0x158] sm:$0xff]  ;;  %v6481_v18 = vld [vmem:[%s12213_s4 + $0x190] sm:$0xff] }
 0x333   : > { %3149 = vst [vmem:[#allocation2 + $0x109] sm:$0xff] %v11304_v28  ;;  %v3086_v34 = vadd.f32 %v11239_v57, %v3048_v6  ;;  %v8186_v8 = vpop.f32.mrb[24].mxu0  ;;  %8261 = vmatprep.mubr.f32.mxu1 %v11304_v28  ;;  %v9288_v6 = vpack.c.bf16 %v6474_v22, %v6473_v14  ;;  %v9304_v14 = vpack.c.bf16 %v6482_v55, %v6481_v18  ;;  %v6483_v22 = vld [vmem:[%s12213_s4 + $0x1a0] sm:$0xff]  ;;  %v11548_v18 = vld [vmem:[#allocation2 + $0x4a] sm:$0xff] }
 0x334   : > { %v11312_v42 = vmax.f32 %v3087_v33, 0.0  ;;  %v3051_v43 = vmul.f32 %v8186_v8, %v11234_v9  ;;  %v2949_v10 = vpop.f32.mrb[25].mxu0  ;;  %8262 = vmatmul.mubr.f32.gmra.mrb[22].mxu1 %v11300_v60  ;;  %v11425_v33 = vld [vmem:[#allocation2 + $0x68] sm:$0xff] }
 0x335   : > { %v11316_v49 = vmax.f32 %v3086_v34, 0.0  ;;  %v3050_v52 = vmul.f32 %v11234_v9, %v2949_v10  ;;  %v6475_v34 = vld [vmem:[%s12213_s4 + $0x160] sm:$0xff]  ;;  %v6476_v8 = vld [vmem:[%s12213_s4 + $0x168] sm:$0xff] }
 0x336   : > { %3152 = vst [vmem:[#allocation2 + $0x129] sm:$0xff] %v11312_v42  ;;  %v3089_v11 = vadd.f32 %v11239_v57, %v3051_v43  ;;  %v11434_v43 = vld [vmem:[#allocation2 + $0x78] sm:$0xff]  ;;  %v9292_v10 = vpack.c.bf16 %v6476_v8, %v6475_v34 }
 0x337   : > { %3151 = vst [vmem:[#allocation2 + $0x121] sm:$0xff] %v11316_v49  ;;  %v3088_v58 = vadd.f32 %v11239_v57, %v3050_v52  ;;  %v8189_v59 = vpop.f32.mrb[26].mxu0  ;;  %8264 = vmatprep.mubr.f32.mxu1 %v11316_v49  ;;  %v11437_v52 = vld [vmem:[#allocation2 + $0x80] sm:$0xff] }
 0x338   : > { %v11324_v15 = vmax.f32 %v3089_v11, 0.0  ;;  %v3053_v3 = vmul.f32 %v8189_v59, %v11234_v9  ;;  %v2959_v19 = vpop.f32.mrb[27].mxu0  ;;  %8265 = vmatmul.mubr.f32.gmra.mrb[24].mxu1 %v11312_v42  ;;  %v6477_v11 = vld [vmem:[%s12213_s4 + $0x170] sm:$0xff]  ;;  %v11524_v34 = vld [vmem:[#allocation2 + $0x1a] sm:$0xff] }
 0x339   : > { %v11328_v16 = vmax.f32 %v3088_v58, 0.0  ;;  %v3052_v24 = vmul.f32 %v11234_v9, %v2959_v19  ;;  %v6478_v58 = vld [vmem:[%s12213_s4 + $0x178] sm:$0xff]  ;;  %v11446_v59 = vld [vmem:[#allocation2 + $0x90] sm:$0xff] }
 0x33a   : > { %3154 = vst [vmem:[#allocation2 + $0x141] sm:$0xff] %v11324_v15  ;;  %v3091_v25 = vadd.f32 %v11239_v57, %v3053_v3  ;;  %v9296_v3 = vpack.c.bf16 %v6478_v58, %v6477_v11  ;;  %v11449_v19 = vld [vmem:[#allocation2 + $0x98] sm:$0xff]  ;;  %v6485_v11 = vld [vmem:[%s12213_s4 + $0x1b0] sm:$0xff] }
 0x33b   : > { %3153 = vst [vmem:[#allocation2 + $0x139] sm:$0xff] %v11328_v16  ;;  %v3090_v29 = vadd.f32 %v11239_v57, %v3052_v24  ;;  %v8192_v30 = vpop.f32.mrb[28].mxu0  ;;  %8267 = vmatprep.mubr.f32.mxu1 %v11328_v16  ;;  %v6479_v24 = vld [vmem:[%s12213_s4 + $0x180] sm:$0xff]  ;;  %v6486_v58 = vld [vmem:[%s12213_s4 + $0x1b8] sm:$0xff] }
 0x33c   : > { %v11336_v32 = vmax.f32 %v3091_v25, 0.0  ;;  %v3055_v37 = vmul.f32 %v8192_v30, %v11234_v9  ;;  %v2969_v38 = vpop.f32.mrb[29].mxu0  ;;  %8268 = vmatmul.mubr.f32.gmra.mrb[26].mxu1 %v11324_v15  ;;  %v6480_v25 = vld [vmem:[%s12213_s4 + $0x188] sm:$0xff] }
 0x33d   : > { %v11340_v39 = vmax.f32 %v3090_v29, 0.0  ;;  %v3054_v44 = vmul.f32 %v11234_v9, %v2969_v38  ;;  %v11458_v29 = vld [vmem:[#allocation2 + $0xa8] sm:$0xff]  ;;  %v9300_v30 = vpack.c.bf16 %v6480_v25, %v6479_v24  ;;  %v11464_v38 = vld [vmem:[#allocation2 + $0xc0] sm:$0xff]  ;;  %v9312_v24 = vpack.c.bf16 %v6486_v58, %v6485_v11 }
 0x33e   : > { %3156 = vst [vmem:[#allocation2 + $0x159] sm:$0xff] %v11336_v32  ;;  %v3093_v47 = vadd.f32 %v11239_v57, %v3055_v37  ;;  %v11461_v37 = vld [vmem:[#allocation2 + $0xb0] sm:$0xff]  ;;  %v11539_v25 = vld [vmem:[#allocation2 + $0x3a] sm:$0xff] }
 0x33f   : > { %3155 = vst [vmem:[#allocation2 + $0x151] sm:$0xff] %v11340_v39  ;;  %v3092_v48 = vadd.f32 %v11239_v57, %v3054_v44  ;;  %v8195_v53 = vpop.f32.mrb[30].mxu0  ;;  %8270 = vmatprep.mubr.f32.mxu1 %v11340_v39  ;;  %v11467_v44 = vld [vmem:[#allocation2 + $0xc8] sm:$0xff]  ;;  %v6491_v58 = vld [vmem:[%s12213_s4 + $0x1e0] sm:$0xff] }
 0x340   : > { %v11348_v54 = vmax.f32 %v3093_v47, 0.0  ;;  %v3057_v62 = vmul.f32 %v8195_v53, %v11234_v9  ;;  %v2979_v63 = vpop.f32.mrb[31].mxu0  ;;  %8271 = vmatmul.mubr.f32.gmra.mrb[28].mxu1 %v11336_v32  ;;  %v11470_v47 = vld [vmem:[#allocation2 + $0xd8] sm:$0xff]  ;;  %v11476_v53 = vld [vmem:[#allocation2 + $0xf0] sm:$0xff] }
 0x341   : > { %v11352_v0 = vmax.f32 %v3092_v48, 0.0  ;;  %v3056_v23 = vmul.f32 %v11234_v9, %v2979_v63  ;;  %v6466_v9 = vld [vmem:[%s12213_s4 + $0x118] sm:$0xff]  ;;  %v11473_v48 = vld [vmem:[#allocation2 + $0xe0] sm:$0xff]  ;;  %v11482_v63 = vld [vmem:[#allocation2 + $0x108] sm:$0xff] }
 0x342   : > { %3158 = vst [vmem:[#allocation2 + $0x171] sm:$0xff] %v11348_v54  ;;  %v11357_v13 = vadd.f32 %v11239_v57, %v3057_v62  ;;  %v11479_v62 = vld [vmem:[#allocation2 + $0xf8] sm:$0xff]  ;;  %v11497_v26 = vld [vmem:[#allocation2 + $0x140] sm:$0xff]  ;;  %v11563_v11 = vld [vmem:[#allocation2 + $0x6a] sm:$0xff] }
 0x343   : > { %3157 = vst [vmem:[#allocation2 + $0x169] sm:$0xff] %v11352_v0  ;;  %v11361_v31 = vadd.f32 %v11239_v57, %v3056_v23  ;;  %8273 = vmatprep.mubr.f32.mxu1 %v11352_v0  ;;  %v9272_v57 = vpack.c.bf16 %v6466_v9, %v6465_v20  ;;  %v11485_v23 = vld [vmem:[#allocation2 + $0x110] sm:$0xff]  ;;  %v11488_v20 = vld [vmem:[#allocation2 + $0x120] sm:$0xff]  ;;  %v11491_v9 = vld [vmem:[#allocation2 + $0x128] sm:$0xff] }
 0x344   : > { %v12250_v35 = vmax.f32 %v11357_v13, 0.0  ;;  %8274 = vmatmul.mubr.f32.gmra.mrb[30].mxu1 %v11348_v54 }
 0x345   : > { %v12251_v36 = vmax.f32 %v11361_v31, 0.0  ;;  %8308 = vmatprep.mubr.f32.mxu1 %v10023_v4 }
 0x346   : > { %3160 = vst [vmem:[#allocation2 + $0x189] sm:$0xff] %v12250_v35  ;;  %v11500_v12 = vld [vmem:[#allocation2 + $0x150] sm:$0xff]  ;;  %v6494_v35 = vld [vmem:[%s12213_s4 + $0x1f8] sm:$0xff] }
 0x347   : > { %3159 = vst [vmem:[#allocation2 + $0x181] sm:$0xff] %v12251_v36  ;;  %v11584_v36 = vld [vmem:[#allocation2 + $0x92] sm:$0xff] }
 0x348   : > { %8309 = vmatmul.mubr.f32.vlgmr.msra.gmra.mrb[0].mxu1 %v10023_v4  ;;  %v11398_v4 = vld [vmem:[#allocation2 + $0x30] sm:$0xff]  ;;  %12354 = vst [vmem:[#allocation7_spill] sm:$0xff] %v11584_v36 }
 0x349   : > { %8311 = vmatprep.mubr.f32.mxu1 %v11385_v41  ;;  %9271 = vmatpush3.bf16.msra.mxu1 %v11228_v7  ;;  %v9280_v7 = vpack.c.bf16 %v6470_v21, %v6469_v46  ;;  %v3709_v21 = vld [vmem:[#allocation2 + $0x2] sm:$0xff] }
 0x34a   : > { %9273 = vmatprep.subr.bf16.mxu1 %v9272_v57  ;;  %v11506_v46 = vld [vmem:[#allocation2 + $0x168] sm:$0xff] }
 0x34b   : > { %12350 = vst [vmem:[#allocation3_spill] sm:$0xff] %v11506_v46 }
 0x34c   : > { %8312 = vmatmul.mubr.f32.gmra.mrb[2].mxu1 %v11389_v45 }
 0x34d   : > { %8314 = vmatprep.mubr.f32.mxu1 %v11398_v4  ;;  %9275 = vmatpush3.bf16.msra.mxu1 %v9272_v57  ;;  %v11494_v57 = vld [vmem:[#allocation2 + $0x138] sm:$0xff] }
 0x34e   : > { %9277 = vmatprep.subr.bf16.mxu1 %v9276_v27 }
 0x350   : > { %8315 = vmatmul.mubr.f32.gmra.mrb[4].mxu1 %v11401_v50 }
 0x351   : > { %8317 = vmatprep.mubr.f32.mxu1 %v11410_v61  ;;  %9279 = vmatpush3.bf16.msra.mxu1 %v9276_v27  ;;  %v11503_v27 = vld [vmem:[#allocation2 + $0x158] sm:$0xff] }
 0x352   : > { %9281 = vmatprep.subr.bf16.mxu1 %v9280_v7 }
 0x354   : > { %8318 = vmatmul.mubr.f32.gmra.mrb[6].mxu1 %v11413_v2 }
 0x355   : > { %8320 = vmatprep.mubr.f32.mxu1 %v11422_v5  ;;  %9283 = vmatpush3.bf16.msra.mxu1 %v9280_v7  ;;  %v11509_v7 = vld [vmem:[#allocation2 + $0x170] sm:$0xff] }
 0x356   : > { %9285 = vmatprep.subr.bf16.mxu1 %v9284_v1  ;;  %12351 = vst [vmem:[#allocation4_spill] sm:$0xff] %v11509_v7 }
 0x358   : > { %8321 = vmatmul.mubr.f32.gmra.mrb[8].mxu1 %v11425_v33 }
 0x359   : > { %8323 = vmatprep.mubr.f32.mxu1 %v11434_v43  ;;  %9287 = vmatpush3.bf16.msra.mxu1 %v9284_v1  ;;  %v3710_v1 = vld [vmem:[#allocation2 + $0xa] sm:$0xff] }
 0x35a   : > { %9289 = vmatprep.subr.bf16.mxu1 %v9288_v6 }
 0x35c   : > { %8324 = vmatmul.mubr.f32.gmra.mrb[10].mxu1 %v11437_v52 }
 0x35d   : > { %8326 = vmatprep.mubr.f32.mxu1 %v11446_v59  ;;  %9291 = vmatpush3.bf16.msra.mxu1 %v9288_v6  ;;  %v6484_v6 = vld [vmem:[%s12213_s4 + $0x1a8] sm:$0xff] }
 0x35e   : > { %9293 = vmatprep.subr.bf16.mxu1 %v9292_v10  ;;  %v9308_v8 = vpack.c.bf16 %v6484_v6, %v6483_v22  ;;  %v6490_v22 = vld [vmem:[%s12213_s4 + $0x1d8] sm:$0xff]  ;;  %v11560_v6 = vld [vmem:[#allocation2 + $0x62] sm:$0xff] }
 0x360   : > { %8327 = vmatmul.mubr.f32.gmra.mrb[12].mxu1 %v11449_v19 }
 0x361   : > { %8329 = vmatprep.mubr.f32.mxu1 %v11458_v29  ;;  %9295 = vmatpush3.bf16.msra.mxu1 %v9292_v10  ;;  %v11527_v10 = vld [vmem:[#allocation2 + $0x22] sm:$0xff] }
 0x362   : > { %9297 = vmatprep.subr.bf16.mxu1 %v9296_v3 }
 0x364   : > { %8330 = vmatmul.mubr.f32.gmra.mrb[14].mxu1 %v11461_v37 }
 0x365   : > { %8332 = vmatprep.mubr.f32.mxu1 %v11464_v38  ;;  %9299 = vmatpush3.bf16.msra.mxu1 %v9296_v3  ;;  %v11536_v3 = vld [vmem:[#allocation2 + $0x32] sm:$0xff] }
 0x366   : > { %9301 = vmatprep.subr.bf16.mxu1 %v9300_v30 }
 0x368   : > { %8333 = vmatmul.mubr.f32.gmra.mrb[16].mxu1 %v11467_v44 }
 0x369   : > { %8335 = vmatprep.mubr.f32.mxu1 %v11470_v47 }
 0x36c   : > { %8336 = vmatmul.mubr.f32.gmra.mrb[18].mxu1 %v11473_v48 }
 0x36d   : > { %8338 = vmatprep.mubr.f32.mxu1 %v11476_v53 }
 0x370   : > { %8339 = vmatmul.mubr.f32.gmra.mrb[20].mxu1 %v11479_v62 }
 0x371   : > { %8341 = vmatprep.mubr.f32.mxu1 %v11482_v63 }
 0x374   : > { %8342 = vmatmul.mubr.f32.gmra.mrb[22].mxu1 %v11485_v23 }
 0x375   : > { %8344 = vmatprep.mubr.f32.mxu1 %v11488_v20 }
 0x378   : > { %8345 = vmatmul.mubr.f32.gmra.mrb[24].mxu1 %v11491_v9 }
 0x379   : > { %8347 = vmatprep.mubr.f32.mxu1 %v11494_v57 }
 0x37c   : > { %8348 = vmatmul.mubr.f32.gmra.mrb[26].mxu1 %v11497_v26 }
 0x37d   : > { %8350 = vmatprep.mubr.f32.mxu1 %v11500_v12 }
 0x380   : > { %8351 = vmatmul.mubr.f32.gmra.mrb[28].mxu1 %v11503_v27 }
 0x381   : > { %8353 = vmatprep.mubr.f32.mxu1 %v11506_v46 }
 0x384   : > { %8354 = vmatmul.mubr.f32.gmra.mrb[30].mxu1 %v11509_v7 }
 0x385   : > { %8388 = vmatprep.mubr.f32.mxu1 %v3709_v21  ;;  %v6488_v21 = vld [vmem:[%s12213_s4 + $0x1c8] sm:$0xff] }
 0x388   : > { %8389 = vmatmul.mubr.f32.vlgmr.msra.gmra.mrb[0].mxu1 %v3710_v1  ;;  %v11551_v1 = vld [vmem:[#allocation2 + $0x52] sm:$0xff] }
 0x389   : > { %8391 = vmatprep.mubr.f32.mxu1 %v11524_v34  ;;  %9303 = vmatpush3.bf16.msra.mxu1 %v9300_v30  ;;  %v6487_v30 = vld [vmem:[%s12213_s4 + $0x1c0] sm:$0xff] }
 0x38a   : > { %9305 = vmatprep.subr.bf16.mxu1 %v9304_v14  ;;  %v9316_v55 = vpack.c.bf16 %v6488_v21, %v6487_v30  ;;  %v6492_v30 = vld [vmem:[%s12213_s4 + $0x1e8] sm:$0xff]  ;;  %v11572_v21 = vld [vmem:[#allocation2 + $0x7a] sm:$0xff] }
 0x38b   : > { %12352 = vst [vmem:[#allocation5_spill] sm:$0xff] %v11572_v21 }
 0x38c   : > { %8392 = vmatmul.mubr.f32.gmra.mrb[2].mxu1 %v11527_v10 }
 0x38d   : > { %8394 = vmatprep.mubr.f32.mxu1 %v11536_v3  ;;  %9307 = vmatpush3.bf16.msra.mxu1 %v9304_v14  ;;  %v6489_v14 = vld [vmem:[%s12213_s4 + $0x1d0] sm:$0xff] }
 0x38e   : > { %9309 = vmatprep.subr.bf16.mxu1 %v9308_v8 }
 0x390   : > { %8395 = vmatmul.mubr.f32.gmra.mrb[4].mxu1 %v11539_v25 }
 0x391   : > { %8397 = vmatprep.mubr.f32.mxu1 %v11548_v18  ;;  %9311 = vmatpush3.bf16.msra.mxu1 %v9308_v8  ;;  %v9320_v8 = vpack.c.bf16 %v6490_v22, %v6489_v14  ;;  %v11575_v14 = vld [vmem:[#allocation2 + $0x82] sm:$0xff]  ;;  %v6493_v22 = vld [vmem:[%s12213_s4 + $0x1f0] sm:$0xff] }
 0x392   : > { %9313 = vmatprep.subr.bf16.mxu1 %v9312_v24  ;;  %12353 = vst [vmem:[#allocation6_spill] sm:$0xff] %v11575_v14 }
 0x394   : > { %8398 = vmatmul.mubr.f32.gmra.mrb[6].mxu1 %v11551_v1 }
 0x395   : > { %8400 = vmatprep.mubr.f32.mxu1 %v11560_v6  ;;  %9315 = vmatpush3.bf16.msra.mxu1 %v9312_v24  ;;  %v9324_v24 = vpack.c.bf16 %v6492_v30, %v6491_v58  ;;  %v11587_v58 = vld [vmem:[#allocation2 + $0x9a] sm:$0xff] }
 0x396   : > { %9317 = vmatprep.subr.bf16.mxu1 %v9316_v55  ;;  %12355 = vst [vmem:[#allocation8_spill] sm:$0xff] %v11587_v58  ;;  %v6495_v30 = vld [vmem:[%s12213_s4 + $0x200] sm:$0xff] }
 0x398   : > { %8401 = vmatmul.mubr.f32.gmra.mrb[8].mxu1 %v11563_v11 }
 0x399   : > { %8403 = vmatprep.mubr.f32.mxu1 %v11572_v21  ;;  %9319 = vmatpush3.bf16.msra.mxu1 %v9316_v55  ;;  %v9328_v55 = vpack.c.bf16 %v6494_v35, %v6493_v22  ;;  %v6496_v21 = vld [vmem:[%s12213_s4 + $0x208] sm:$0xff]  ;;  %v11599_v35 = vld [vmem:[#allocation2 + $0xb2] sm:$0xff] }
 0x39a   : > { %9321 = vmatprep.subr.bf16.mxu1 %v9320_v8  ;;  %v11602_v22 = vld [vmem:[#allocation2 + $0xc2] sm:$0xff] }
 0x39b   : > { %12356 = vst [vmem:[#allocation9_spill] sm:$0xff] %v11602_v22 }
 0x39c   : > { %8404 = vmatmul.mubr.f32.gmra.mrb[10].mxu1 %v11575_v14  ;;  %v11596_v14 = vld [vmem:[#allocation2 + $0xaa] sm:$0xff] }
 0x39d   : > { %8406 = vmatprep.mubr.f32.mxu1 %v11584_v36  ;;  %9323 = vmatpush3.bf16.msra.mxu1 %v9320_v8  ;;  %v9332_v8 = vpack.c.bf16 %v6496_v21, %v6495_v30  ;;  %v11605_v36 = vld [vmem:[#allocation2 + $0xca] sm:$0xff]  ;;  %v11614_v21 = vld [vmem:[#allocation2 + $0xf2] sm:$0xff]  ;;  %v11617_v30 = vld [vmem:[#allocation2 + $0xfa] sm:$0xff] }
 0x39e   : > { %9325 = vmatprep.subr.bf16.mxu1 %v9324_v24  ;;  %12357 = vst [vmem:[#allocation10_spill] sm:$0xff] %v11605_v36  ;;  %12360 = vst [vmem:[#allocation13_spill] sm:$0xff] %v11614_v21 }
 0x39f   : > { %12361 = vst [vmem:[#allocation14_spill] sm:$0xff] %v11617_v30 }
 0x3a0   : > { %8407 = vmatmul.mubr.f32.gmra.mrb[12].mxu1 %v11587_v58  ;;  %v11608_v58 = vld [vmem:[#allocation2 + $0xda] sm:$0xff] }
 0x3a1   : > { %8409 = vmatprep.mubr.f32.mxu1 %v11596_v14  ;;  %9327 = vmatpush3.bf16.msra.mxu1 %v9324_v24  ;;  %12358 = vst [vmem:[#allocation11_spill] sm:$0xff] %v11608_v58  ;;  %v11611_v24 = vld [vmem:[#allocation2 + $0xe2] sm:$0xff] }
 0x3a2   : > { %9329 = vmatprep.subr.bf16.mxu1 %v9328_v55  ;;  %12359 = vst [vmem:[#allocation12_spill] sm:$0xff] %v11611_v24 }
 0x3a4   : > { %8410 = vmatmul.mubr.f32.gmra.mrb[14].mxu1 %v11599_v35 }
 0x3a5   : > { %8412 = vmatprep.mubr.f32.mxu1 %v11602_v22  ;;  %9331 = vmatpush3.bf16.msra.mxu1 %v9328_v55  ;;  %v11620_v55 = vld [vmem:[#allocation2 + $0x10a] sm:$0xff] }
 0x3a6   : > { %9333 = vmatprep.subr.bf16.mxu1 %v9332_v8  ;;  %12362 = vst [vmem:[#allocation15_spill] sm:$0xff] %v11620_v55 }
 0x3a8   : > { %8413 = vmatmul.mubr.f32.gmra.mrb[16].mxu1 %v11605_v36  ;;  %v11623_v36 = vld [vmem:[#allocation2 + $0x112] sm:$0xff] }
 0x3a9   : > { %8415 = vmatprep.mubr.f32.mxu1 %v11608_v58  ;;  %12363 = vst [vmem:[#allocation16_spill] sm:$0xff] %v11623_v36  ;;  %v11626_v58 = vld [vmem:[#allocation2 + $0x122] sm:$0xff] }
 0x3aa   : > { %12364 = vst [vmem:[#allocation17_spill] sm:$0xff] %v11626_v58 }
 0x3ac   : > { %8416 = vmatmul.mubr.f32.gmra.mrb[18].mxu1 %v11611_v24  ;;  %v11629_v24 = vld [vmem:[#allocation2 + $0x12a] sm:$0xff] }
 0x3ad   : > { %8418 = vmatprep.mubr.f32.mxu1 %v11614_v21  ;;  %12365 = vst [vmem:[#allocation18_spill] sm:$0xff] %v11629_v24  ;;  %v11632_v21 = vld [vmem:[#allocation2 + $0x13a] sm:$0xff] }
 0x3ae   : > { %12366 = vst [vmem:[#allocation19_spill] sm:$0xff] %v11632_v21 }
 0x3b0   : > { %8419 = vmatmul.mubr.f32.gmra.mrb[20].mxu1 %v11617_v30  ;;  %v11635_v30 = vld [vmem:[#allocation2 + $0x142] sm:$0xff] }
 0x3b1   : > { %8421 = vmatprep.mubr.f32.mxu1 %v11620_v55  ;;  %12367 = vst [vmem:[#allocation20_spill] sm:$0xff] %v11635_v30  ;;  %v11638_v55 = vld [vmem:[#allocation2 + $0x152] sm:$0xff] }
 0x3b2   : > { %12368 = vst [vmem:[#allocation21_spill] sm:$0xff] %v11638_v55 }
 0x3b4   : > { %8422 = vmatmul.mubr.f32.gmra.mrb[22].mxu1 %v11623_v36  ;;  %v11641_v36 = vld [vmem:[#allocation2 + $0x15a] sm:$0xff] }
 0x3b5   : > { %8424 = vmatprep.mubr.f32.mxu1 %v11626_v58  ;;  %12369 = vst [vmem:[#allocation22_spill] sm:$0xff] %v11641_v36  ;;  %v11644_v58 = vld [vmem:[#allocation2 + $0x16a] sm:$0xff] }
 0x3b6   : > { %12370 = vst [vmem:[#allocation23_spill] sm:$0xff] %v11644_v58 }
 0x3b8   : > { %8425 = vmatmul.mubr.f32.gmra.mrb[24].mxu1 %v11629_v24  ;;  %v11647_v24 = vld [vmem:[#allocation2 + $0x172] sm:$0xff] }
 0x3b9   : > { %8427 = vmatprep.mubr.f32.mxu1 %v11632_v21  ;;  %v6497_v21 = vld [vmem:[%s12213_s4 + $0x210] sm:$0xff] }
 0x3bc   : > { %8428 = vmatmul.mubr.f32.gmra.mrb[26].mxu1 %v11635_v30  ;;  %v6498_v30 = vld [vmem:[%s12213_s4 + $0x218] sm:$0xff] }
 0x3bd   : > { %8430 = vmatprep.mubr.f32.mxu1 %v11638_v55  ;;  %v9336_v55 = vpack.c.bf16 %v6498_v30, %v6497_v21  ;;  %v6502_v21 = vld [vmem:[%s12213_s4 + $0x238] sm:$0xff]  ;;  %v6505_v30 = vld [vmem:[%s12213_s4 + $0x250] sm:$0xff] }
 0x3c0   : > { %8431 = vmatmul.mubr.f32.gmra.mrb[28].mxu1 %v11641_v36  ;;  %v6499_v36 = vld [vmem:[%s12213_s4 + $0x220] sm:$0xff] }
 0x3c1   : > { %8433 = vmatprep.mubr.f32.mxu1 %v11644_v58  ;;  %v6500_v58 = vld [vmem:[%s12213_s4 + $0x228] sm:$0xff] }
 0x3c2   : > { %v9340_v22 = vpack.c.bf16 %v6500_v58, %v6499_v36  ;;  %v6504_v36 = vld [vmem:[%s12213_s4 + $0x248] sm:$0xff] }
 0x3c4   : > { %8434 = vmatmul.mubr.f32.gmra.mrb[30].mxu1 %v11647_v24 }
 0x3c5   : > { %8468 = vmatprep.mubr.f32.mxu1 %v11385_v41  ;;  %v6501_v41 = vld [vmem:[%s12213_s4 + $0x230] sm:$0xff] }
 0x3c8   : > { %8469 = vmatmul.mubr.f32.vlgmr.msra.gmra.mrb[0].mxu1 %v11389_v45  ;;  %v9344_v45 = vpack.c.bf16 %v6502_v21, %v6501_v41  ;;  %v6508_v21 = vld [vmem:[%s12213_s4 + $0x268] sm:$0xff] }
 0x3c9   : > { %8471 = vmatprep.mubr.f32.mxu1 %v11398_v4  ;;  %9335 = vmatpush3.bf16.msra.mxu1 %v9332_v8  ;;  %v6503_v8 = vld [vmem:[%s12213_s4 + $0x240] sm:$0xff] }
 0x3ca   : > { %9337 = vmatprep.subr.bf16.mxu1 %v9336_v55  ;;  %v9348_v58 = vpack.c.bf16 %v6504_v36, %v6503_v8  ;;  %v6510_v36 = vld [vmem:[%s12213_s4 + $0x278] sm:$0xff] }
 0x3cc   : > { %8472 = vmatmul.mubr.f32.gmra.mrb[2].mxu1 %v11401_v50 }
 0x3cd   : > { %8474 = vmatprep.mubr.f32.mxu1 %v11410_v61  ;;  %9339 = vmatpush3.bf16.msra.mxu1 %v9336_v55  ;;  %v6506_v55 = vld [vmem:[%s12213_s4 + $0x258] sm:$0xff] }
 0x3ce   : > { %9341 = vmatprep.subr.bf16.mxu1 %v9340_v22  ;;  %v9352_v41 = vpack.c.bf16 %v6506_v55, %v6505_v30  ;;  %v6512_v55 = vld [vmem:[%s12213_s4 + $0x288] sm:$0xff] }
 0x3d0   : > { %8475 = vmatmul.mubr.f32.gmra.mrb[4].mxu1 %v11413_v2 }
 0x3d1   : > { %8477 = vmatprep.mubr.f32.mxu1 %v11422_v5  ;;  %9343 = vmatpush3.bf16.msra.mxu1 %v9340_v22  ;;  %v6507_v22 = vld [vmem:[%s12213_s4 + $0x260] sm:$0xff] }
 0x3d2   : > { %9345 = vmatprep.subr.bf16.mxu1 %v9344_v45  ;;  %v9356_v8 = vpack.c.bf16 %v6508_v21, %v6507_v22  ;;  %v11731_v21 = vld [vmem:[#allocation2 + $0x188] sm:$0xff] }
 0x3d3   : > { %12372 = vst [vmem:[#allocation25_spill] sm:$0xff] %v11731_v21 }
 0x3d4   : > { %8478 = vmatmul.mubr.f32.gmra.mrb[6].mxu1 %v11425_v33 }
 0x3d5   : > { %8480 = vmatprep.mubr.f32.mxu1 %v11434_v43  ;;  %9347 = vmatpush3.bf16.msra.mxu1 %v9344_v45  ;;  %v6509_v45 = vld [vmem:[%s12213_s4 + $0x270] sm:$0xff] }
 0x3d6   : > { %9349 = vmatprep.subr.bf16.mxu1 %v9348_v58  ;;  %v9360_v30 = vpack.c.bf16 %v6510_v36, %v6509_v45  ;;  %v6514_v45 = vld [vmem:[%s12213_s4 + $0x298] sm:$0xff] }
 0x3d7   : > { %v4321_v36 = vld [vmem:[#allocation2 + $0x19] sm:$0xff] }
 0x3d8   : > { %8481 = vmatmul.mubr.f32.gmra.mrb[8].mxu1 %v11437_v52 }
 0x3d9   : > { %8483 = vmatprep.mubr.f32.mxu1 %v11446_v59  ;;  %9351 = vmatpush3.bf16.msra.mxu1 %v9348_v58  ;;  %v6511_v58 = vld [vmem:[%s12213_s4 + $0x280] sm:$0xff] }
 0x3da   : > { %9353 = vmatprep.subr.bf16.mxu1 %v9352_v41  ;;  %v9364_v22 = vpack.c.bf16 %v6512_v55, %v6511_v58  ;;  %v4322_v58 = vld [vmem:[#allocation2 + $0x21] sm:$0xff] }
 0x3db   : > { %v6515_v55 = vld [vmem:[%s12213_s4 + $0x2a0] sm:$0xff] }
 0x3dc   : > { %8484 = vmatmul.mubr.f32.gmra.mrb[10].mxu1 %v11449_v19 }
 0x3dd   : > { %8486 = vmatprep.mubr.f32.mxu1 %v11458_v29  ;;  %9355 = vmatpush3.bf16.msra.mxu1 %v9352_v41  ;;  %v11728_v41 = vld [vmem:[#allocation2 + $0x180] sm:$0xff] }
 0x3de   : > { %9357 = vmatprep.subr.bf16.mxu1 %v9356_v8  ;;  %12371 = vst [vmem:[#allocation24_spill] sm:$0xff] %v11728_v41 }
 0x3e0   : > { %8487 = vmatmul.mubr.f32.gmra.mrb[12].mxu1 %v11461_v37 }
 0x3e1   : > { %8489 = vmatprep.mubr.f32.mxu1 %v11464_v38  ;;  %9359 = vmatpush3.bf16.msra.mxu1 %v9356_v8  ;;  %v6513_v8 = vld [vmem:[%s12213_s4 + $0x290] sm:$0xff] }
 0x3e2   : > { %9361 = vmatprep.subr.bf16.mxu1 %v9360_v30 }
 0x3e4   : > { %8490 = vmatmul.mubr.f32.gmra.mrb[14].mxu1 %v11467_v44 }
 0x3e5   : > { %8492 = vmatprep.mubr.f32.mxu1 %v11470_v47  ;;  %9363 = vmatpush3.bf16.msra.mxu1 %v9360_v30  ;;  %v9368_v30 = vpack.c.bf16 %v6514_v45, %v6513_v8  ;;  %v6517_v8 = vld [vmem:[%s12213_s4 + $0x2b0] sm:$0xff]  ;;  %v6518_v45 = vld [vmem:[%s12213_s4 + $0x2b8] sm:$0xff] }
 0x3e6   : > { %9365 = vmatprep.subr.bf16.mxu1 %v9364_v22 }
 0x3e8   : > { %8493 = vmatmul.mubr.f32.gmra.mrb[16].mxu1 %v11473_v48 }
 0x3e9   : > { %8495 = vmatprep.mubr.f32.mxu1 %v11476_v53 }
 0x3ec   : > { %8496 = vmatmul.mubr.f32.gmra.mrb[18].mxu1 %v11479_v62 }
 0x3ed   : > { %8498 = vmatprep.mubr.f32.mxu1 %v11482_v63 }
 0x3f0   : > { %8499 = vmatmul.mubr.f32.gmra.mrb[20].mxu1 %v11485_v23 }
 0x3f1   : > { %8501 = vmatprep.mubr.f32.mxu1 %v11488_v20 }
 0x3f4   : > { %8502 = vmatmul.mubr.f32.gmra.mrb[22].mxu1 %v11491_v9 }
 0x3f5   : > { %8504 = vmatprep.mubr.f32.mxu1 %v11494_v57 }
 0x3f8   : > { %8505 = vmatmul.mubr.f32.gmra.mrb[24].mxu1 %v11497_v26 }
 0x3f9   : > { %8507 = vmatprep.mubr.f32.mxu1 %v11500_v12 }
 0x3fc   : > { %8508 = vmatmul.mubr.f32.gmra.mrb[26].mxu1 %v11503_v27 }
 0x3fd   : > { %8510 = vmatprep.mubr.f32.mxu1 %v11506_v46  ;;  %v11749_v46 = vld [vmem:[#allocation2 + $0x39] sm:$0xff] }
 0x3fe   : > { %12373 = vst [vmem:[#allocation26_spill] sm:$0xff] %v11749_v46 }
 0x400   : > { %8511 = vmatmul.mubr.f32.gmra.mrb[28].mxu1 %v11509_v7  ;;  %v11746_v7 = vld [vmem:[#allocation2 + $0x31] sm:$0xff] }
 0x401   : > { %8513 = vmatprep.mubr.f32.mxu1 %v11728_v41  ;;  %v6516_v41 = vld [vmem:[%s12213_s4 + $0x2a8] sm:$0xff] }
 0x404   : > { %8514 = vmatmul.mubr.f32.gmra.mrb[30].mxu1 %v11731_v21  ;;  %v9372_v21 = vpack.c.bf16 %v6516_v41, %v6515_v55  ;;  %v11761_v41 = vld [vmem:[#allocation2 + $0x51] sm:$0xff]  ;;  %v6520_v55 = vld [vmem:[%s12213_s4 + $0x2c8] sm:$0xff] }
 0x405   : > { %8548 = vmatprep.mubr.f32.mxu1 %v4321_v36  ;;  %v11758_v36 = vld [vmem:[#allocation2 + $0x49] sm:$0xff]  ;;  %12375 = vst [vmem:[#allocation28_spill] sm:$0xff] %v11761_v41 }
 0x406   : > { %12374 = vst [vmem:[#allocation27_spill] sm:$0xff] %v11758_v36 }
 0x408   : > { %8549 = vmatmul.mubr.f32.vlgmr.msra.gmra.mrb[0].mxu1 %v4322_v58  ;;  %v6519_v58 = vld [vmem:[%s12213_s4 + $0x2c0] sm:$0xff] }
 0x409   : > { %8551 = vmatprep.mubr.f32.mxu1 %v11746_v7  ;;  %9367 = vmatpush3.bf16.msra.mxu1 %v9364_v22  ;;  %v9376_v22 = vpack.c.bf16 %v6518_v45, %v6517_v8  ;;  %v11773_v8 = vld [vmem:[#allocation2 + $0x69] sm:$0xff] }
 0x40a   : > { %9369 = vmatprep.subr.bf16.mxu1 %v9368_v30  ;;  %12377 = vst [vmem:[#allocation30_spill] sm:$0xff] %v11773_v8  ;;  %v6521_v45 = vld [vmem:[%s12213_s4 + $0x2d0] sm:$0xff] }
 0x40c   : > { %8552 = vmatmul.mubr.f32.gmra.mrb[2].mxu1 %v11749_v46  ;;  %v11770_v46 = vld [vmem:[#allocation2 + $0x61] sm:$0xff] }
 0x40d   : > { %8554 = vmatprep.mubr.f32.mxu1 %v11758_v36  ;;  %9371 = vmatpush3.bf16.msra.mxu1 %v9368_v30  ;;  %12376 = vst [vmem:[#allocation29_spill] sm:$0xff] %v11770_v46  ;;  %v9380_v30 = vpack.c.bf16 %v6520_v55, %v6519_v58  ;;  %v6522_v36 = vld [vmem:[%s12213_s4 + $0x2d8] sm:$0xff]  ;;  %v11785_v58 = vld [vmem:[#allocation2 + $0x81] sm:$0xff] }
 0x40e   : > { %9373 = vmatprep.subr.bf16.mxu1 %v9372_v21  ;;  %12379 = vst [vmem:[#allocation32_spill] sm:$0xff] %v11785_v58  ;;  %v6523_v55 = vld [vmem:[%s12213_s4 + $0x2e0] sm:$0xff] }
 0x410   : > { %8555 = vmatmul.mubr.f32.gmra.mrb[4].mxu1 %v11761_v41  ;;  %v11782_v41 = vld [vmem:[#allocation2 + $0x79] sm:$0xff] }
 0x411   : > { %8557 = vmatprep.mubr.f32.mxu1 %v11770_v46  ;;  %9375 = vmatpush3.bf16.msra.mxu1 %v9372_v21  ;;  %12378 = vst [vmem:[#allocation31_spill] sm:$0xff] %v11782_v41  ;;  %v9384_v21 = vpack.c.bf16 %v6522_v36, %v6521_v45  ;;  %v6524_v46 = vld [vmem:[%s12213_s4 + $0x2e8] sm:$0xff]  ;;  %v11797_v36 = vld [vmem:[#allocation2 + $0x99] sm:$0xff]  ;;  %v6525_v45 = vld [vmem:[%s12213_s4 + $0x2f0] sm:$0xff] }
 0x412   : > { %9377 = vmatprep.subr.bf16.mxu1 %v9376_v22  ;;  %12381 = vst [vmem:[#allocation34_spill] sm:$0xff] %v11797_v36 }
 0x414   : > { %8558 = vmatmul.mubr.f32.gmra.mrb[6].mxu1 %v11773_v8  ;;  %v11794_v8 = vld [vmem:[#allocation2 + $0x91] sm:$0xff] }
 0x415   : > { %8560 = vmatprep.mubr.f32.mxu1 %v11782_v41  ;;  %9379 = vmatpush3.bf16.msra.mxu1 %v9376_v22  ;;  %12380 = vst [vmem:[#allocation33_spill] sm:$0xff] %v11794_v8  ;;  %v9388_v22 = vpack.c.bf16 %v6524_v46, %v6523_v55  ;;  %v6526_v41 = vld [vmem:[%s12213_s4 + $0x2f8] sm:$0xff]  ;;  %v6527_v55 = vld [vmem:[%s12213_s4 + $0x300] sm:$0xff] }
 0x416   : > { %9381 = vmatprep.subr.bf16.mxu1 %v9380_v30  ;;  %v11809_v46 = vld [vmem:[#allocation2 + $0xb1] sm:$0xff] }
 0x418   : > { %8561 = vmatmul.mubr.f32.gmra.mrb[8].mxu1 %v11785_v58  ;;  %v11806_v58 = vld [vmem:[#allocation2 + $0xa9] sm:$0xff] }
 0x419   : > { %8563 = vmatprep.mubr.f32.mxu1 %v11794_v8  ;;  %9383 = vmatpush3.bf16.msra.mxu1 %v9380_v30  ;;  %v9392_v30 = vpack.c.bf16 %v6526_v41, %v6525_v45  ;;  %v6528_v8 = vld [vmem:[%s12213_s4 + $0x308] sm:$0xff] }
 0x41a   : > { %9385 = vmatprep.subr.bf16.mxu1 %v9384_v21  ;;  %v11821_v41 = vld [vmem:[#allocation2 + $0xc9] sm:$0xff] }
 0x41c   : > { %8564 = vmatmul.mubr.f32.gmra.mrb[10].mxu1 %v11797_v36  ;;  %v11818_v36 = vld [vmem:[#allocation2 + $0xc1] sm:$0xff] }
 0x41d   : > { %8566 = vmatprep.mubr.f32.mxu1 %v11806_v58  ;;  %9387 = vmatpush3.bf16.msra.mxu1 %v9384_v21  ;;  %v9396_v21 = vpack.c.bf16 %v6528_v8, %v6527_v55  ;;  %v6542_v8 = vld [vmem:[%s12213_s4 + $0x378] sm:$0xff]  ;;  %v6544_v55 = vld [vmem:[%s12213_s4 + $0x388] sm:$0xff] }
 0x41e   : > { %9389 = vmatprep.subr.bf16.mxu1 %v9388_v22 }
 0x420   : > { %8567 = vmatmul.mubr.f32.gmra.mrb[12].mxu1 %v11809_v46 }
 0x421   : > { %8569 = vmatprep.mubr.f32.mxu1 %v11818_v36  ;;  %9391 = vmatpush3.bf16.msra.mxu1 %v9388_v22  ;;  %v12387_v22 = vld [vmem:[#allocation8_spill] sm:$0xff] }
 0x422   : > { %9393 = vmatprep.subr.bf16.mxu1 %v9392_v30 }
 0x424   : > { %8570 = vmatmul.mubr.f32.gmra.mrb[14].mxu1 %v11821_v41 }
 0x425   : > { %8572 = vmatprep.mubr.f32.mxu1 %v11280_v17  ;;  %9395 = vmatpush3.bf16.msra.mxu1 %v9392_v30  ;;  %v6529_v17 = vld [vmem:[%s12213_s4 + $0x310] sm:$0xff]  ;;  %v6543_v30 = vld [vmem:[%s12213_s4 + $0x380] sm:$0xff] }
 0x426   : > { %9397 = vmatprep.subr.bf16.mxu1 %v9396_v21 }
 0x428   : > { %8573 = vmatmul.mubr.f32.gmra.mrb[16].mxu1 %v11277_v40  ;;  %v12382_v40 = vmax.f32 %v11361_v31, 0.0  ;;  %v6538_v31 = vld [vmem:[%s12213_s4 + $0x358] sm:$0xff] }
 0x429   : > { %8575 = vmatprep.mubr.f32.mxu1 %v11292_v56  ;;  %v12383_v56 = vmax.f32 %v11357_v13, 0.0  ;;  %v6537_v13 = vld [vmem:[%s12213_s4 + $0x350] sm:$0xff] }
 0x42c   : > { %8576 = vmatmul.mubr.f32.gmra.mrb[18].mxu1 %v11288_v51  ;;  %v6530_v51 = vld [vmem:[%s12213_s4 + $0x318] sm:$0xff] }
 0x42d   : > { %8578 = vmatprep.mubr.f32.mxu1 %v11304_v28  ;;  %v6531_v28 = vld [vmem:[%s12213_s4 + $0x320] sm:$0xff] }
 0x430   : > { %8579 = vmatmul.mubr.f32.gmra.mrb[20].mxu1 %v11300_v60  ;;  %v9400_v60 = vpack.c.bf16 %v6530_v51, %v6529_v17  ;;  %v12389_v17 = vld [vmem:[#allocation10_spill] sm:$0xff]  ;;  %v12391_v51 = vld [vmem:[#allocation12_spill] sm:$0xff] }
 0x431   : > { %8581 = vmatprep.mubr.f32.mxu1 %v11316_v49 }
 0x434   : > { %8582 = vmatmul.mubr.f32.gmra.mrb[22].mxu1 %v11312_v42  ;;  %v6532_v42 = vld [vmem:[%s12213_s4 + $0x328] sm:$0xff] }
 0x435   : > { %8584 = vmatprep.mubr.f32.mxu1 %v11328_v16  ;;  %v9404_v49 = vpack.c.bf16 %v6532_v42, %v6531_v28  ;;  %v6534_v16 = vld [vmem:[%s12213_s4 + $0x338] sm:$0xff]  ;;  %v12394_v28 = vld [vmem:[#allocation15_spill] sm:$0xff]  ;;  %v12396_v42 = vld [vmem:[#allocation17_spill] sm:$0xff] }
 0x438   : > { %8585 = vmatmul.mubr.f32.gmra.mrb[24].mxu1 %v11324_v15  ;;  %v6533_v15 = vld [vmem:[%s12213_s4 + $0x330] sm:$0xff] }
 0x439   : > { %8587 = vmatprep.mubr.f32.mxu1 %v11340_v39  ;;  %v6535_v39 = vld [vmem:[%s12213_s4 + $0x340] sm:$0xff] }
 0x43c   : > { %8588 = vmatmul.mubr.f32.gmra.mrb[26].mxu1 %v11336_v32  ;;  %v9408_v32 = vpack.c.bf16 %v6534_v16, %v6533_v15  ;;  %v12398_v15 = vld [vmem:[#allocation19_spill] sm:$0xff]  ;;  %v12399_v16 = vld [vmem:[#allocation20_spill] sm:$0xff] }
 0x43d   : > { %8590 = vmatprep.mubr.f32.mxu1 %v11352_v0 }
 0x440   : > { %8591 = vmatmul.mubr.f32.gmra.mrb[28].mxu1 %v11348_v54  ;;  %v6536_v54 = vld [vmem:[%s12213_s4 + $0x348] sm:$0xff] }
 0x441   : > { %8593 = vmatprep.mubr.f32.mxu1 %v12382_v40  ;;  %v9412_v0 = vpack.c.bf16 %v6536_v54, %v6535_v39  ;;  %v9428_v40 = vpack.c.bf16 %v6544_v55, %v6543_v30  ;;  %v12401_v39 = vld [vmem:[#allocation22_spill] sm:$0xff]  ;;  %v12402_v54 = vld [vmem:[#allocation23_spill] sm:$0xff]  ;;  %v12410_v30 = vld [vmem:[#allocation29_spill] sm:$0xff] }
 0x444   : > { %8594 = vmatmul.mubr.f32.gmra.mrb[30].mxu1 %v12383_v56  ;;  %v12392_v56 = vld [vmem:[#allocation13_spill] sm:$0xff] }
 0x445   : > { %8628 = vmatprep.mubr.f32.mxu1 %v11524_v34  ;;  %v12384_v34 = vld [vmem:[#allocation5_spill] sm:$0xff] }
 0x448   : > { %8629 = vmatmul.mubr.f32.vlgmr.msra.gmra.mrb[0].mxu1 %v11527_v10  ;;  %v9416_v10 = vpack.c.bf16 %v6538_v31, %v6537_v13  ;;  %v11923_v13 = vld [vmem:[#allocation2 + $0x18a] sm:$0xff] }
 0x449   : > { %8631 = vmatprep.mubr.f32.mxu1 %v11536_v3  ;;  %9399 = vmatpush3.bf16.msra.mxu1 %v9396_v21  ;;  %v6539_v3 = vld [vmem:[%s12213_s4 + $0x360] sm:$0xff]  ;;  %v6545_v31 = vld [vmem:[%s12213_s4 + $0x390] sm:$0xff] }
 0x44a   : > { %9401 = vmatprep.subr.bf16.mxu1 %v9400_v60  ;;  %v12388_v21 = vld [vmem:[#allocation9_spill] sm:$0xff] }
 0x44c   : > { %8632 = vmatmul.mubr.f32.gmra.mrb[2].mxu1 %v11539_v25  ;;  %v6540_v25 = vld [vmem:[%s12213_s4 + $0x368] sm:$0xff] }
 0x44d   : > { %8634 = vmatprep.mubr.f32.mxu1 %v11548_v18  ;;  %9403 = vmatpush3.bf16.msra.mxu1 %v9400_v60  ;;  %v12385_v18 = vld [vmem:[#allocation6_spill] sm:$0xff] }
 0x44e   : > { %9405 = vmatprep.subr.bf16.mxu1 %v9404_v49  ;;  %v12393_v60 = vld [vmem:[#allocation14_spill] sm:$0xff] }
 0x450   : > { %8635 = vmatmul.mubr.f32.gmra.mrb[4].mxu1 %v11551_v1  ;;  %v12386_v1 = vld [vmem:[#allocation7_spill] sm:$0xff] }
 0x451   : > { %8637 = vmatprep.mubr.f32.mxu1 %v11560_v6  ;;  %9407 = vmatpush3.bf16.msra.mxu1 %v9404_v49  ;;  %v9420_v6 = vpack.c.bf16 %v6540_v25, %v6539_v3  ;;  %v12397_v49 = vld [vmem:[#allocation18_spill] sm:$0xff] }
 0x452   : > { %9409 = vmatprep.subr.bf16.mxu1 %v9408_v32  ;;  %v6548_v3 = vld [vmem:[%s12213_s4 + $0x3a8] sm:$0xff] }
 0x454   : > { %8638 = vmatmul.mubr.f32.gmra.mrb[6].mxu1 %v11563_v11  ;;  %v6541_v11 = vld [vmem:[%s12213_s4 + $0x370] sm:$0xff] }
 0x455   : > { %8640 = vmatprep.mubr.f32.mxu1 %v12384_v34  ;;  %9411 = vmatpush3.bf16.msra.mxu1 %v9408_v32  ;;  %v9424_v45 = vpack.c.bf16 %v6542_v8, %v6541_v11  ;;  %v12400_v32 = vld [vmem:[#allocation21_spill] sm:$0xff]  ;;  %v6546_v34 = vld [vmem:[%s12213_s4 + $0x398] sm:$0xff]  ;;  %v6556_v11 = vld [vmem:[%s12213_s4 + $0x3e8] sm:$0xff] }
 0x456   : > { %9413 = vmatprep.subr.bf16.mxu1 %v9412_v0  ;;  %v6558_v8 = vld [vmem:[%s12213_s4 + $0x3f8] sm:$0xff] }
 0x458   : > { %8641 = vmatmul.mubr.f32.gmra.mrb[8].mxu1 %v12385_v18  ;;  %v6550_v18 = vld [vmem:[%s12213_s4 + $0x3b8] sm:$0xff] }
 0x459   : > { %8643 = vmatprep.mubr.f32.mxu1 %v12386_v1  ;;  %9415 = vmatpush3.bf16.msra.mxu1 %v9412_v0  ;;  %v11920_v0 = vld [vmem:[#allocation2 + $0x182] sm:$0xff] }
 0x45a   : > { %9417 = vmatprep.subr.bf16.mxu1 %v9416_v10  ;;  %v6552_v1 = vld [vmem:[%s12213_s4 + $0x3c8] sm:$0xff] }
 0x45c   : > { %8644 = vmatmul.mubr.f32.gmra.mrb[10].mxu1 %v12387_v22  ;;  %v6560_v22 = vld [vmem:[%s12213_s4 + $0x408] sm:$0xff] }
 0x45d   : > { %8646 = vmatprep.mubr.f32.mxu1 %v11596_v14  ;;  %9419 = vmatpush3.bf16.msra.mxu1 %v9416_v10  ;;  %v12390_v14 = vld [vmem:[#allocation11_spill] sm:$0xff]  ;;  %v9432_v10 = vpack.c.bf16 %v6546_v34, %v6545_v31  ;;  %v5255_v34 = vld [vmem:[#allocation2 + $0xe1] sm:$0xff] }
 0x45e   : > { %9421 = vmatprep.subr.bf16.mxu1 %v9420_v6 }
 0x460   : > { %8647 = vmatmul.mubr.f32.gmra.mrb[12].mxu1 %v11599_v35  ;;  %v12395_v35 = vld [vmem:[#allocation16_spill] sm:$0xff] }
 0x461   : > { %8649 = vmatprep.mubr.f32.mxu1 %v12388_v21  ;;  %9423 = vmatpush3.bf16.msra.mxu1 %v9420_v6  ;;  %v6554_v6 = vld [vmem:[%s12213_s4 + $0x3d8] sm:$0xff]  ;;  %v6567_v21 = vld [vmem:[%s12213_s4 + $0x440] sm:$0xff] }
 0x462   : > { %9425 = vmatprep.subr.bf16.mxu1 %v9424_v45 }
 0x464   : > { %8650 = vmatmul.mubr.f32.gmra.mrb[14].mxu1 %v12389_v17  ;;  %v12411_v17 = vld [vmem:[#allocation30_spill] sm:$0xff] }
 0x465   : > { %8652 = vmatprep.mubr.f32.mxu1 %v12390_v14  ;;  %9427 = vmatpush3.bf16.msra.mxu1 %v9424_v45  ;;  %v12409_v45 = vld [vmem:[#allocation28_spill] sm:$0xff]  ;;  %v12412_v14 = vld [vmem:[#allocation31_spill] sm:$0xff] }
 0x466   : > { %9429 = vmatprep.subr.bf16.mxu1 %v9428_v40 }
 0x468   : > { %8653 = vmatmul.mubr.f32.gmra.mrb[16].mxu1 %v12391_v51 }
 0x469   : > { %8655 = vmatprep.mubr.f32.mxu1 %v12392_v56  ;;  %v6569_v56 = vld [vmem:[%s12213_s4 + $0x450] sm:$0xff] }
 0x46c   : > { %8656 = vmatmul.mubr.f32.gmra.mrb[18].mxu1 %v12393_v60  ;;  %v6570_v60 = vld [vmem:[%s12213_s4 + $0x458] sm:$0xff] }
 0x46d   : > { %8658 = vmatprep.mubr.f32.mxu1 %v12394_v28  ;;  %v12413_v28 = vld [vmem:[#allocation32_spill] sm:$0xff] }
 0x470   : > { %8659 = vmatmul.mubr.f32.gmra.mrb[20].mxu1 %v12395_v35  ;;  %v12414_v35 = vld [vmem:[#allocation33_spill] sm:$0xff] }
 0x471   : > { %8661 = vmatprep.mubr.f32.mxu1 %v12396_v42  ;;  %v9480_v42 = vpack.c.bf16 %v6570_v60, %v6569_v56 }
 0x474   : > { %8662 = vmatmul.mubr.f32.gmra.mrb[22].mxu1 %v12397_v49  ;;  %v6571_v49 = vld [vmem:[%s12213_s4 + $0x460] sm:$0xff] }
 0x475   : > { %8664 = vmatprep.mubr.f32.mxu1 %v12398_v15  ;;  %v6572_v15 = vld [vmem:[%s12213_s4 + $0x468] sm:$0xff] }
 0x478   : > { %8665 = vmatmul.mubr.f32.gmra.mrb[24].mxu1 %v12399_v16  ;;  %v12415_v16 = vld [vmem:[#allocation34_spill] sm:$0xff] }
 0x479   : > { %8667 = vmatprep.mubr.f32.mxu1 %v12400_v32  ;;  %v9484_v32 = vpack.c.bf16 %v6572_v15, %v6571_v49 }
 0x47c   : > { %8668 = vmatmul.mubr.f32.gmra.mrb[26].mxu1 %v12401_v39  ;;  %v6573_v39 = vld [vmem:[%s12213_s4 + $0x470] sm:$0xff] }
 0x47d   : > { %8670 = vmatprep.mubr.f32.mxu1 %v12402_v54  ;;  %v6574_v54 = vld [vmem:[%s12213_s4 + $0x478] sm:$0xff] }
 0x47e   : > { %v9488_v31 = vpack.c.bf16 %v6574_v54, %v6573_v39 }
 0x480   : > { %8671 = vmatmul.mubr.f32.gmra.mrb[28].mxu1 %v11647_v24  ;;  %v6547_v24 = vld [vmem:[%s12213_s4 + $0x3a0] sm:$0xff] }
 0x481   : > { %8673 = vmatprep.mubr.f32.mxu1 %v11920_v0  ;;  %v9436_v25 = vpack.c.bf16 %v6548_v3, %v6547_v24  ;;  %v5257_v24 = vld [vmem:[#allocation2 + $0xf9] sm:$0xff]  ;;  %v5258_v3 = vld [vmem:[#allocation2 + $0x109] sm:$0xff] }
 0x484   : > { %8674 = vmatmul.mubr.f32.gmra.mrb[30].mxu1 %v11923_v13 }
 0x485   : > { %8708 = vmatprep.mubr.f32.mxu1 %v11398_v4  ;;  %v6549_v4 = vld [vmem:[%s12213_s4 + $0x3b0] sm:$0xff] }
 0x488   : > { %8709 = vmatmul.mubr.f32.vlgmr.msra.gmra.mrb[0].mxu1 %v11401_v50  ;;  %v9440_v50 = vpack.c.bf16 %v6550_v18, %v6549_v4  ;;  %v5263_v4 = vld [vmem:[#allocation2 + $0x141] sm:$0xff]  ;;  %v5264_v18 = vld [vmem:[#allocation2 + $0x151] sm:$0xff] }
 0x489   : > { %8711 = vmatprep.mubr.f32.mxu1 %v11410_v61  ;;  %9431 = vmatpush3.bf16.msra.mxu1 %v9428_v40  ;;  %v6551_v61 = vld [vmem:[%s12213_s4 + $0x3c0] sm:$0xff]  ;;  %v6568_v40 = vld [vmem:[%s12213_s4 + $0x448] sm:$0xff] }
 0x48a   : > { %9433 = vmatprep.subr.bf16.mxu1 %v9432_v10  ;;  %v9476_v51 = vpack.c.bf16 %v6568_v40, %v6567_v21  ;;  %v5573_v21 = vld [vmem:[#allocation2 + $0x172] sm:$0xff]  ;;  %v5576_v40 = vld [vmem:[#allocation2 + $0x19a] sm:$0xff] }
 0x48c   : > { %8712 = vmatmul.mubr.f32.gmra.mrb[2].mxu1 %v11413_v2  ;;  %v9444_v2 = vpack.c.bf16 %v6552_v1, %v6551_v61  ;;  %v5266_v61 = vld [vmem:[#allocation2 + $0x169] sm:$0xff]  ;;  %v5267_v1 = vld [vmem:[#allocation2 + $0x171] sm:$0xff] }
 0x48d   : > { %8714 = vmatprep.mubr.f32.mxu1 %v11422_v5  ;;  %9435 = vmatpush3.bf16.msra.mxu1 %v9432_v10  ;;  %v6553_v5 = vld [vmem:[%s12213_s4 + $0x3d0] sm:$0xff] }
 0x48e   : > { %9437 = vmatprep.subr.bf16.mxu1 %v9436_v25  ;;  %v5256_v10 = vld [vmem:[#allocation2 + $0xf1] sm:$0xff] }
 0x490   : > { %8715 = vmatmul.mubr.f32.gmra.mrb[4].mxu1 %v11425_v33  ;;  %v9448_v33 = vpack.c.bf16 %v6554_v6, %v6553_v5  ;;  %v5270_v5 = vld [vmem:[#allocation2 + $0x199] sm:$0xff]  ;;  %v5269_v6 = vld [vmem:[#allocation2 + $0x189] sm:$0xff] }
 0x491   : > { %8717 = vmatprep.mubr.f32.mxu1 %v11434_v43  ;;  %9439 = vmatpush3.bf16.msra.mxu1 %v9436_v25  ;;  %v6555_v43 = vld [vmem:[%s12213_s4 + $0x3e0] sm:$0xff]  ;;  %v5261_v25 = vld [vmem:[#allocation2 + $0x129] sm:$0xff] }
 0x492   : > { %9441 = vmatprep.subr.bf16.mxu1 %v9440_v50 }
 0x494   : > { %8718 = vmatmul.mubr.f32.gmra.mrb[6].mxu1 %v11437_v52  ;;  %v9452_v52 = vpack.c.bf16 %v6556_v11, %v6555_v43  ;;  %v5546_v43 = vld [vmem:[#allocation2 + $0x32] sm:$0xff]  ;;  %v5547_v11 = vld [vmem:[#allocation2 + $0x3a] sm:$0xff] }
 0x495   : > { %8720 = vmatprep.mubr.f32.mxu1 %v11446_v59  ;;  %9443 = vmatpush3.bf16.msra.mxu1 %v9440_v50  ;;  %v6557_v59 = vld [vmem:[%s12213_s4 + $0x3f0] sm:$0xff]  ;;  %v5265_v50 = vld [vmem:[#allocation2 + $0x159] sm:$0xff] }
 0x496   : > { %9445 = vmatprep.subr.bf16.mxu1 %v9444_v2 }
 0x498   : > { %8721 = vmatmul.mubr.f32.gmra.mrb[8].mxu1 %v11449_v19  ;;  %v9456_v19 = vpack.c.bf16 %v6558_v8, %v6557_v59  ;;  %v5549_v59 = vld [vmem:[#allocation2 + $0x52] sm:$0xff]  ;;  %v5550_v8 = vld [vmem:[#allocation2 + $0x62] sm:$0xff] }
 0x499   : > { %8723 = vmatprep.mubr.f32.mxu1 %v11458_v29  ;;  %9447 = vmatpush3.bf16.msra.mxu1 %v9444_v2  ;;  %v6559_v29 = vld [vmem:[%s12213_s4 + $0x400] sm:$0xff] }
 0x49a   : > { %9449 = vmatprep.subr.bf16.mxu1 %v9448_v33  ;;  %v5268_v2 = vld [vmem:[#allocation2 + $0x181] sm:$0xff] }
 0x49c   : > { %8724 = vmatmul.mubr.f32.gmra.mrb[10].mxu1 %v11461_v37  ;;  %v9460_v37 = vpack.c.bf16 %v6560_v22, %v6559_v29  ;;  %v5552_v29 = vld [vmem:[#allocation2 + $0x7a] sm:$0xff]  ;;  %v5553_v22 = vld [vmem:[#allocation2 + $0x82] sm:$0xff] }
 0x49d   : > { %8726 = vmatprep.mubr.f32.mxu1 %v11464_v38  ;;  %9451 = vmatpush3.bf16.msra.mxu1 %v9448_v33  ;;  %v12403_v38 = vld [vmem:[#allocation3_spill] sm:$0xff]  ;;  %v5271_v33 = vld [vmem:[#allocation2 + $0x1a1] sm:$0xff] }
 0x49e   : > { %9453 = vmatprep.subr.bf16.mxu1 %v9452_v52 }
 0x4a0   : > { %8727 = vmatmul.mubr.f32.gmra.mrb[12].mxu1 %v11467_v44  ;;  %v12404_v44 = vld [vmem:[#allocation4_spill] sm:$0xff] }
 0x4a1   : > { %8729 = vmatprep.mubr.f32.mxu1 %v11470_v47  ;;  %9455 = vmatpush3.bf16.msra.mxu1 %v9452_v52  ;;  %v12405_v47 = vld [vmem:[#allocation24_spill] sm:$0xff]  ;;  %v5548_v52 = vld [vmem:[#allocation2 + $0x4a] sm:$0xff] }
 0x4a2   : > { %9457 = vmatprep.subr.bf16.mxu1 %v9456_v19 }
 0x4a4   : > { %8730 = vmatmul.mubr.f32.gmra.mrb[14].mxu1 %v11473_v48  ;;  %v12406_v48 = vld [vmem:[#allocation25_spill] sm:$0xff] }
 0x4a5   : > { %8732 = vmatprep.mubr.f32.mxu1 %v11476_v53  ;;  %9459 = vmatpush3.bf16.msra.mxu1 %v9456_v19  ;;  %v10014_v53 = vld [vmem:[#allocation2] sm:$0xff]  ;;  %v5551_v19 = vld [vmem:[#allocation2 + $0x6a] sm:$0xff] }
 0x4a6   : > { %9461 = vmatprep.subr.bf16.mxu1 %v9460_v37 }
 0x4a8   : > { %8733 = vmatmul.mubr.f32.gmra.mrb[16].mxu1 %v11479_v62  ;;  %v6561_v62 = vld [vmem:[%s12213_s4 + $0x410] sm:$0xff] }
 0x4a9   : > { %8735 = vmatprep.mubr.f32.mxu1 %v11482_v63  ;;  %v6562_v63 = vld [vmem:[%s12213_s4 + $0x418] sm:$0xff] }
 0x4ac   : > { %8736 = vmatmul.mubr.f32.gmra.mrb[18].mxu1 %v11485_v23  ;;  %v9464_v23 = vpack.c.bf16 %v6562_v63, %v6561_v62  ;;  %v5560_v62 = vld [vmem:[#allocation2 + $0xda] sm:$0xff]  ;;  %v5561_v63 = vld [vmem:[#allocation2 + $0xe2] sm:$0xff] }
 0x4ad   : > { %8738 = vmatprep.mubr.f32.mxu1 %v11488_v20  ;;  %v6563_v20 = vld [vmem:[%s12213_s4 + $0x420] sm:$0xff] }
 0x4b0   : > { %8739 = vmatmul.mubr.f32.gmra.mrb[20].mxu1 %v11491_v9  ;;  %v6564_v9 = vld [vmem:[%s12213_s4 + $0x428] sm:$0xff] }
 0x4b1   : > { %8741 = vmatprep.mubr.f32.mxu1 %v11494_v57  ;;  %v12407_v57 = vld [vmem:[#allocation26_spill] sm:$0xff] }
 0x4b4   : > { %8742 = vmatmul.mubr.f32.gmra.mrb[22].mxu1 %v11497_v26  ;;  %v12408_v26 = vld [vmem:[#allocation27_spill] sm:$0xff] }
 0x4b5   : > { %8744 = vmatprep.mubr.f32.mxu1 %v11500_v12  ;;  %v9468_v12 = vpack.c.bf16 %v6564_v9, %v6563_v20  ;;  %v5563_v20 = vld [vmem:[#allocation2 + $0xfa] sm:$0xff]  ;;  %v5564_v9 = vld [vmem:[#allocation2 + $0x10a] sm:$0xff] }
 0x4b8   : > { %8745 = vmatmul.mubr.f32.gmra.mrb[24].mxu1 %v11503_v27  ;;  %v6565_v27 = vld [vmem:[%s12213_s4 + $0x430] sm:$0xff] }
 0x4b9   : > { %8747 = vmatprep.mubr.f32.mxu1 %v12403_v38  ;;  %v5555_v38 = vld [vmem:[#allocation2 + $0x9a] sm:$0xff] }
 0x4bc   : > { %8748 = vmatmul.mubr.f32.gmra.mrb[26].mxu1 %v12404_v44  ;;  %v5556_v44 = vld [vmem:[#allocation2 + $0xaa] sm:$0xff] }
 0x4bd   : > { %8750 = vmatprep.mubr.f32.mxu1 %v12405_v47  ;;  %v5557_v47 = vld [vmem:[#allocation2 + $0xb2] sm:$0xff] }
 0x4c0   : > { %8751 = vmatmul.mubr.f32.gmra.mrb[28].mxu1 %v12406_v48  ;;  %v5558_v48 = vld [vmem:[#allocation2 + $0xc2] sm:$0xff] }
 0x4c1   : > { %8753 = vmatprep.mubr.f32.mxu1 %v10014_v53 }
 0x4c4   : > { %8754 = vmatmul.mubr.f32.gmra.mrb[30].mxu1 %v10014_v53  ;;  %v5559_v53 = vld [vmem:[#allocation2 + $0xca] sm:$0xff] }
 0x4c5   : > { %8788 = vmatprep.mubr.f32.mxu1 %v11746_v7  ;;  %v6566_v7 = vld [vmem:[%s12213_s4 + $0x438] sm:$0xff] }
 0x4c6   : > { %v9472_v55 = vpack.c.bf16 %v6566_v7, %v6565_v27  ;;  %v5568_v27 = vld [vmem:[#allocation2 + $0x13a] sm:$0xff]  ;;  %v5569_v7 = vld [vmem:[#allocation2 + $0x142] sm:$0xff] }
 0x4c8   : > { %8789 = vmatmul.mubr.f32.vlgmr.msra.gmra.mrb[0].mxu1 %v12407_v57  ;;  %v5565_v57 = vld [vmem:[#allocation2 + $0x112] sm:$0xff] }
 0x4c9   : > { %8791 = vmatprep.mubr.f32.mxu1 %v12408_v26  ;;  %9463 = vmatpush3.bf16.msra.mxu1 %v9460_v37  ;;  %v5554_v37 = vld [vmem:[#allocation2 + $0x92] sm:$0xff]  ;;  %v5566_v26 = vld [vmem:[#allocation2 + $0x122] sm:$0xff] }
 0x4ca   : > { %9465 = vmatprep.subr.bf16.mxu1 %v9464_v23 }
 0x4cc   : > { %8792 = vmatmul.mubr.f32.gmra.mrb[2].mxu1 %v12409_v45  ;;  %v5570_v45 = vld [vmem:[#allocation2 + $0x152] sm:$0xff] }
 0x4cd   : > { %8794 = vmatprep.mubr.f32.mxu1 %v12410_v30  ;;  %9467 = vmatpush3.bf16.msra.mxu1 %v9464_v23  ;;  %v5562_v23 = vld [vmem:[#allocation2 + $0xf2] sm:$0xff]  ;;  %v5571_v30 = vld [vmem:[#allocation2 + $0x15a] sm:$0xff] }
 0x4ce   : > { %9469 = vmatprep.subr.bf16.mxu1 %v9468_v12 }
 0x4d0   : > { %8795 = vmatmul.mubr.f32.gmra.mrb[4].mxu1 %v12411_v17  ;;  %v5577_v17 = vld [vmem:[#allocation2 + $0x1a2] sm:$0xff] }
 0x4d1   : > { %8797 = vmatprep.mubr.f32.mxu1 %v12412_v14  ;;  %9471 = vmatpush3.bf16.msra.mxu1 %v9468_v12  ;;  %v5567_v12 = vld [vmem:[#allocation2 + $0x12a] sm:$0xff]  ;;  %v12065_v14 = vld [vmem:[%s12214_s5] ss:$0 sm:$0xff] }
 0x4d2   : > { %9473 = vmatprep.subr.bf16.mxu1 %v9472_v55 }
 0x4d4   : > { %8798 = vmatmul.mubr.f32.gmra.mrb[6].mxu1 %v12413_v28  ;;  %v6578_v28 = vld [vmem:[%s10102_s22 + $0x21] sm:$0xff] }
 0x4d5   : > { %8800 = vmatprep.mubr.f32.mxu1 %v12414_v35  ;;  %9475 = vmatpush3.bf16.msra.mxu1 %v9472_v55  ;;  %v5572_v55 = vld [vmem:[#allocation2 + $0x16a] sm:$0xff] }
 0x4d6   : > { %9477 = vmatprep.subr.bf16.mxu1 %v9476_v51 }
 0x4d8   : > { %8801 = vmatmul.mubr.f32.gmra.mrb[8].mxu1 %v12415_v16 }
 0x4d9   : > { %8803 = vmatprep.mubr.f32.mxu1 %v11806_v58  ;;  %9479 = vmatpush3.bf16.msra.mxu1 %v9476_v51  ;;  %v5254_v58 = vld [vmem:[#allocation2 + $0xd9] sm:$0xff] }
 0x4da   : > { %9481 = vmatprep.subr.bf16.mxu1 %v9480_v42  ;;  %v12070_v51 = vld [vmem:[%s12215_s6] ss:$0 sm:$0xff] }
 0x4dc   : > { %8804 = vmatmul.mubr.f32.gmra.mrb[10].mxu1 %v11809_v46  ;;  %v5259_v46 = vld [vmem:[#allocation2 + $0x111] sm:$0xff] }
 0x4dd   : > { %8806 = vmatprep.mubr.f32.mxu1 %v11818_v36  ;;  %9483 = vmatpush3.bf16.msra.mxu1 %v9480_v42  ;;  %v5260_v36 = vld [vmem:[#allocation2 + $0x121] sm:$0xff]  ;;  %v6577_v42 = vld [vmem:[%s10102_s22 + $0x19] sm:$0xff] }
 0x4de   : > { %9485 = vmatprep.subr.bf16.mxu1 %v9484_v32 }
 0x4e0   : > { %8807 = vmatmul.mubr.f32.gmra.mrb[12].mxu1 %v11821_v41  ;;  %v5262_v41 = vld [vmem:[#allocation2 + $0x139] sm:$0xff] }
 0x4e1   : > { %8809 = vmatprep.mubr.f32.mxu1 %v5254_v58  ;;  %9487 = vmatpush3.bf16.msra.mxu1 %v9484_v32 }
 0x4e2   : > { %9489 = vmatprep.subr.bf16.mxu1 %v9488_v31 }
 0x4e4   : > { %8810 = vmatmul.mubr.f32.gmra.mrb[14].mxu1 %v5255_v34 }
 0x4e5   : > { %8812 = vmatprep.mubr.f32.mxu1 %v5256_v10  ;;  %9491 = vmatpush3.bf16.msra.mxu1 %v9488_v31  ;;  %v6580_v31 = vld [vmem:[%s10102_s22 + $0x39] sm:$0xff] }
 0x4e8   : > { %8813 = vmatmul.mubr.f32.gmra.mrb[16].mxu1 %v5257_v24  ;;  %v6579_v24 = vld [vmem:[%s10102_s22 + $0x31] sm:$0xff] }
 0x4e9   : > { %8815 = vmatprep.mubr.f32.mxu1 %v5258_v3 }
 0x4ec   : > { %8816 = vmatmul.mubr.f32.gmra.mrb[18].mxu1 %v5259_v46 }
 0x4ed   : > { %8818 = vmatprep.mubr.f32.mxu1 %v5260_v36 }
 0x4f0   : > { %8819 = vmatmul.mubr.f32.gmra.mrb[20].mxu1 %v5261_v25 }
 0x4f1   : > { %8821 = vmatprep.mubr.f32.mxu1 %v5262_v41 }
 0x4f4   : > { %8822 = vmatmul.mubr.f32.gmra.mrb[22].mxu1 %v5263_v4 }
 0x4f5   : > { %8824 = vmatprep.mubr.f32.mxu1 %v5264_v18 }
 0x4f8   : > { %8825 = vmatmul.mubr.f32.gmra.mrb[24].mxu1 %v5265_v50  ;;  %v6582_v50 = vld [vmem:[%s10102_s22 + $0x51] sm:$0xff] }
 0x4f9   : > { %8827 = vmatprep.mubr.f32.mxu1 %v5266_v61 }
 0x4fc   : > { %8828 = vmatmul.mubr.f32.gmra.mrb[26].mxu1 %v5267_v1 }
 0x4fd   : > { %8830 = vmatprep.mubr.f32.mxu1 %v5268_v2 }
 0x500   : > { %8831 = vmatmul.mubr.f32.gmra.mrb[28].mxu1 %v5269_v6 }
 0x501   : > { %8833 = vmatprep.mubr.f32.mxu1 %v5270_v5  ;;  %v6581_v5 = vld [vmem:[%s10102_s22 + $0x49] sm:$0xff] }
 0x504   : > { %8834 = vmatmul.mubr.f32.gmra.mrb[30].mxu1 %v5271_v33 }
 0x505   : > { %8868 = vmatprep.mubr.f32.mxu1 %v5546_v43 }
 0x508   : > { %8869 = vmatmul.mubr.f32.vlgmr.msra.gmra.mrb[0].mxu1 %v5547_v11 }
 0x509   : > { %8871 = vmatprep.mubr.f32.mxu1 %v5548_v52 }
 0x50c   : > { %8872 = vmatmul.mubr.f32.gmra.mrb[2].mxu1 %v5549_v59 }
 0x50d   : > { %8874 = vmatprep.mubr.f32.mxu1 %v5550_v8 }
 0x510   : > { %8875 = vmatmul.mubr.f32.gmra.mrb[4].mxu1 %v5551_v19  ;;  %v6584_v19 = vld [vmem:[%s10102_s22 + $0x69] sm:$0xff] }
 0x511   : > { %8877 = vmatprep.mubr.f32.mxu1 %v5552_v29 }
 0x514   : > { %8878 = vmatmul.mubr.f32.gmra.mrb[6].mxu1 %v5553_v22 }
 0x515   : > { %8880 = vmatprep.mubr.f32.mxu1 %v5554_v37 }
 0x518   : > { %8881 = vmatmul.mubr.f32.gmra.mrb[8].mxu1 %v5555_v38  ;;  %v6583_v38 = vld [vmem:[%s10102_s22 + $0x61] sm:$0xff] }
 0x519   : > { %8883 = vmatprep.mubr.f32.mxu1 %v5556_v44 }
 0x51c   : > { %8884 = vmatmul.mubr.f32.gmra.mrb[10].mxu1 %v5557_v47 }
 0x51d   : > { %8886 = vmatprep.mubr.f32.mxu1 %v5558_v48 }
 0x520   : > { %8887 = vmatmul.mubr.f32.gmra.mrb[12].mxu1 %v5559_v53 }
 0x521   : > { %8889 = vmatprep.mubr.f32.mxu1 %v5560_v62 }
 0x524   : > { %8890 = vmatmul.mubr.f32.gmra.mrb[14].mxu1 %v5561_v63 }
 0x525   : > { %8892 = vmatprep.mubr.f32.mxu1 %v5562_v23 }
 0x528   : > { %8893 = vmatmul.mubr.f32.gmra.mrb[16].mxu1 %v5563_v20  ;;  %v6586_v20 = vld [vmem:[%s10102_s22 + $0x81] sm:$0xff] }
 0x529   : > { %8895 = vmatprep.mubr.f32.mxu1 %v5564_v9 }
 0x52c   : > { %8896 = vmatmul.mubr.f32.gmra.mrb[18].mxu1 %v5565_v57 }
 0x52d   : > { %8898 = vmatprep.mubr.f32.mxu1 %v5566_v26 }
 0x530   : > { %8899 = vmatmul.mubr.f32.gmra.mrb[20].mxu1 %v5567_v12  ;;  %v6585_v12 = vld [vmem:[%s10102_s22 + $0x79] sm:$0xff] }
 0x531   : > { %8901 = vmatprep.mubr.f32.mxu1 %v5568_v27 }
 0x534   : > { %8902 = vmatmul.mubr.f32.gmra.mrb[22].mxu1 %v5569_v7 }
 0x535   : > { %8904 = vmatprep.mubr.f32.mxu1 %v5570_v45 }
 0x538   : > { %8905 = vmatmul.mubr.f32.gmra.mrb[24].mxu1 %v5571_v30 }
 0x539   : > { %8907 = vmatprep.mubr.f32.mxu1 %v5572_v55 }
 0x53c   : > { %8908 = vmatmul.mubr.f32.gmra.mrb[26].mxu1 %v5573_v21 }
 0x53d   : > { %8910 = vmatprep.mubr.f32.mxu1 %v11920_v0 }
 0x540   : > { %8911 = vmatmul.mubr.f32.gmra.mrb[28].mxu1 %v11923_v13 }
 0x541   : > { %8913 = vmatprep.mubr.f32.mxu1 %v5576_v40 }
 0x544   : > { %8914 = vmatmul.mubr.f32.gmra.mrb[30].mxu1 %v5577_v17  ;;  %v6588_v17 = vld [vmem:[%s10102_s22 + $0x99] sm:$0xff] }
 0x5db   : > { %v8870_v56 = vpop.f32.mrb[0].mxu1 }
 0x5dc   : > { %v5859_v0 = vmul.f32 %v8870_v56, %v12065_v14  ;;  %v5661_v60 = vpop.f32.mrb[1].mxu1 }
 0x5dd   : > { %v5858_v13 = vmul.f32 %v12065_v14, %v5661_v60 }
 0x5de   : > { %v5897_v35 = vadd.f32 %v12070_v51, %v5859_v0 }
 0x5df   : > { %v5896_v49 = vadd.f32 %v12070_v51, %v5858_v13  ;;  %v8873_v15 = vpop.f32.mrb[2].mxu1 }
 0x5e0   : > { %v5961_v16 = vadd.f32 %v6578_v28, %v5897_v35  ;;  %v5861_v32 = vmul.f32 %v8873_v15, %v12065_v14  ;;  %v5671_v39 = vpop.f32.mrb[3].mxu1  ;;  %v6587_v28 = vld [vmem:[%s10102_s22 + $0x91] sm:$0xff] }
 0x5e1   : > { %v5960_v54 = vadd.f32 %v6577_v42, %v5896_v49  ;;  %v5860_v58 = vmul.f32 %v12065_v14, %v5671_v39  ;;  %v6590_v39 = vld [vmem:[%s10102_s22 + $0xb1] sm:$0xff] }
 0x5e2   : > { %v5993_v34 = vmax.f32 %v5961_v16, 0.0  ;;  %v5899_v10 = vadd.f32 %v12070_v51, %v5861_v32 }
 0x5e3   : > { %v5992_v3 = vmax.f32 %v5960_v54, 0.0  ;;  %v5898_v46 = vadd.f32 %v12070_v51, %v5860_v58  ;;  %v8876_v36 = vpop.f32.mrb[4].mxu1 }
 0x5e4   : > { %6027 = vst [vmem:[%s12083_s13 + $0x8] sm:$0xff] %v5993_v34  ;;  %v5963_v25 = vadd.f32 %v6580_v31, %v5899_v10  ;;  %v5863_v41 = vmul.f32 %v8876_v36, %v12065_v14  ;;  %v5681_v4 = vpop.f32.mrb[5].mxu1  ;;  %v6589_v34 = vld [vmem:[%s10102_s22 + $0xa9] sm:$0xff] }
 0x5e5   : > { %6026 = vst [vmem:[%s12083_s13] sm:$0xff] %v5992_v3  ;;  %v5962_v18 = vadd.f32 %v6579_v24, %v5898_v46  ;;  %v5862_v61 = vmul.f32 %v12065_v14, %v5681_v4  ;;  %v6592_v4 = vld [vmem:[%s10102_s22 + $0xc9] sm:$0xff] }
 0x5e6   : > { %v5995_v1 = vmax.f32 %v5963_v25, 0.0  ;;  %v5901_v2 = vadd.f32 %v12070_v51, %v5863_v41 }
 0x5e7   : > { %v5994_v6 = vmax.f32 %v5962_v18, 0.0  ;;  %v5900_v33 = vadd.f32 %v12070_v51, %v5862_v61  ;;  %v8879_v43 = vpop.f32.mrb[6].mxu1 }
 0x5e8   : > { %6029 = vst [vmem:[%s12083_s13 + $0x18] sm:$0xff] %v5995_v1  ;;  %v5965_v11 = vadd.f32 %v6582_v50, %v5901_v2  ;;  %v5865_v52 = vmul.f32 %v8879_v43, %v12065_v14  ;;  %v5691_v59 = vpop.f32.mrb[7].mxu1  ;;  %v6591_v1 = vld [vmem:[%s10102_s22 + $0xc1] sm:$0xff] }
 0x5e9   : > { %6028 = vst [vmem:[%s12083_s13 + $0x10] sm:$0xff] %v5994_v6  ;;  %v5964_v8 = vadd.f32 %v6581_v5, %v5900_v33  ;;  %v5864_v29 = vmul.f32 %v12065_v14, %v5691_v59  ;;  %v6594_v59 = vld [vmem:[%s10102_s22 + $0xe1] sm:$0xff] }
 0x5ea   : > { %v5997_v22 = vmax.f32 %v5965_v11, 0.0  ;;  %v5903_v37 = vadd.f32 %v12070_v51, %v5865_v52 }
 0x5eb   : > { %v5996_v44 = vmax.f32 %v5964_v8, 0.0  ;;  %v5902_v47 = vadd.f32 %v12070_v51, %v5864_v29  ;;  %v8882_v48 = vpop.f32.mrb[8].mxu1 }
 0x5ec   : > { %6031 = vst [vmem:[%s12083_s13 + $0x28] sm:$0xff] %v5997_v22  ;;  %v5967_v53 = vadd.f32 %v6584_v19, %v5903_v37  ;;  %v5867_v62 = vmul.f32 %v8882_v48, %v12065_v14  ;;  %v5701_v63 = vpop.f32.mrb[9].mxu1  ;;  %v6593_v22 = vld [vmem:[%s10102_s22 + $0xd9] sm:$0xff] }
 0x5ed   : > { %6030 = vst [vmem:[%s12083_s13 + $0x20] sm:$0xff] %v5996_v44  ;;  %v5966_v23 = vadd.f32 %v6583_v38, %v5902_v47  ;;  %v5866_v9 = vmul.f32 %v12065_v14, %v5701_v63  ;;  %v6596_v63 = vld [vmem:[%s10102_s22 + $0xf9] sm:$0xff] }
 0x5ee   : > { %v5999_v57 = vmax.f32 %v5967_v53, 0.0  ;;  %v5905_v26 = vadd.f32 %v12070_v51, %v5867_v62 }
 0x5ef   : > { %v5998_v27 = vmax.f32 %v5966_v23, 0.0  ;;  %v5904_v7 = vadd.f32 %v12070_v51, %v5866_v9  ;;  %v8885_v45 = vpop.f32.mrb[10].mxu1 }
 0x5f0   : > { %6033 = vst [vmem:[%s12083_s13 + $0x38] sm:$0xff] %v5999_v57  ;;  %v5969_v30 = vadd.f32 %v6586_v20, %v5905_v26  ;;  %v5869_v55 = vmul.f32 %v8885_v45, %v12065_v14  ;;  %v5711_v21 = vpop.f32.mrb[11].mxu1  ;;  %v6595_v57 = vld [vmem:[%s10102_s22 + $0xf1] sm:$0xff] }
 0x5f1   : > { %6032 = vst [vmem:[%s12083_s13 + $0x30] sm:$0xff] %v5998_v27  ;;  %v5968_v40 = vadd.f32 %v6585_v12, %v5904_v7  ;;  %v5868_v56 = vmul.f32 %v12065_v14, %v5711_v21  ;;  %v6598_v21 = vld [vmem:[%s10102_s22 + $0x111] sm:$0xff] }
 0x5f2   : > { %v6001_v0 = vmax.f32 %v5969_v30, 0.0  ;;  %v5907_v60 = vadd.f32 %v12070_v51, %v5869_v55 }
 0x5f3   : > { %v6000_v13 = vmax.f32 %v5968_v40, 0.0  ;;  %v5906_v35 = vadd.f32 %v12070_v51, %v5868_v56  ;;  %v8888_v42 = vpop.f32.mrb[12].mxu1 }
 0x5f4   : > { %6035 = vst [vmem:[%s12083_s13 + $0x48] sm:$0xff] %v6001_v0  ;;  %v5971_v49 = vadd.f32 %v6588_v17, %v5907_v60  ;;  %v5871_v15 = vmul.f32 %v8888_v42, %v12065_v14  ;;  %v5721_v16 = vpop.f32.mrb[13].mxu1  ;;  %v6597_v0 = vld [vmem:[%s10102_s22 + $0x109] sm:$0xff] }
 0x5f5   : > { %6034 = vst [vmem:[%s12083_s13 + $0x40] sm:$0xff] %v6000_v13  ;;  %v5970_v32 = vadd.f32 %v6587_v28, %v5906_v35  ;;  %v5870_v54 = vmul.f32 %v12065_v14, %v5721_v16  ;;  %v6600_v16 = vld [vmem:[%s10102_s22 + $0x129] sm:$0xff] }
 0x5f6   : > { %v6003_v31 = vmax.f32 %v5971_v49, 0.0  ;;  %v5909_v58 = vadd.f32 %v12070_v51, %v5871_v15 }
 0x5f7   : > { %v6002_v10 = vmax.f32 %v5970_v32, 0.0  ;;  %v5908_v24 = vadd.f32 %v12070_v51, %v5870_v54  ;;  %v8891_v3 = vpop.f32.mrb[14].mxu1 }
 0x5f8   : > { %6037 = vst [vmem:[%s12083_s13 + $0x58] sm:$0xff] %v6003_v31  ;;  %v5973_v46 = vadd.f32 %v6590_v39, %v5909_v58  ;;  %v5873_v36 = vmul.f32 %v8891_v3, %v12065_v14  ;;  %v5731_v25 = vpop.f32.mrb[15].mxu1  ;;  %v6599_v31 = vld [vmem:[%s10102_s22 + $0x121] sm:$0xff] }
 0x5f9   : > { %6036 = vst [vmem:[%s12083_s13 + $0x50] sm:$0xff] %v6002_v10  ;;  %v5972_v41 = vadd.f32 %v6589_v34, %v5908_v24  ;;  %v5872_v18 = vmul.f32 %v12065_v14, %v5731_v25  ;;  %v6602_v25 = vld [vmem:[%s10102_s22 + $0x141] sm:$0xff] }
 0x5fa   : > { %v6005_v50 = vmax.f32 %v5973_v46, 0.0  ;;  %v5911_v61 = vadd.f32 %v12070_v51, %v5873_v36 }
 0x5fb   : > { %v6004_v2 = vmax.f32 %v5972_v41, 0.0  ;;  %v5910_v5 = vadd.f32 %v12070_v51, %v5872_v18  ;;  %v8894_v6 = vpop.f32.mrb[16].mxu1 }
 0x5fc   : > { %6039 = vst [vmem:[%s12083_s13 + $0x68] sm:$0xff] %v6005_v50  ;;  %v5975_v33 = vadd.f32 %v6592_v4, %v5911_v61  ;;  %v5875_v43 = vmul.f32 %v8894_v6, %v12065_v14  ;;  %v5741_v11 = vpop.f32.mrb[17].mxu1  ;;  %v6601_v50 = vld [vmem:[%s10102_s22 + $0x139] sm:$0xff] }
 0x5fd   : > { %6038 = vst [vmem:[%s12083_s13 + $0x60] sm:$0xff] %v6004_v2  ;;  %v5974_v52 = vadd.f32 %v6591_v1, %v5910_v5  ;;  %v5874_v8 = vmul.f32 %v12065_v14, %v5741_v11  ;;  %v6604_v11 = vld [vmem:[%s10102_s22 + $0x159] sm:$0xff] }
 0x5fe   : > { %v6007_v19 = vmax.f32 %v5975_v33, 0.0  ;;  %v5913_v29 = vadd.f32 %v12070_v51, %v5875_v43 }
 0x5ff   : > { %v6006_v37 = vmax.f32 %v5974_v52, 0.0  ;;  %v5912_v38 = vadd.f32 %v12070_v51, %v5874_v8  ;;  %v8897_v44 = vpop.f32.mrb[18].mxu1 }
 0x600   : > { %6041 = vst [vmem:[%s12083_s13 + $0x78] sm:$0xff] %v6007_v19  ;;  %v5977_v47 = vadd.f32 %v6594_v59, %v5913_v29  ;;  %v5877_v48 = vmul.f32 %v8897_v44, %v12065_v14  ;;  %v5751_v53 = vpop.f32.mrb[19].mxu1  ;;  %v6603_v19 = vld [vmem:[%s10102_s22 + $0x151] sm:$0xff] }
 0x601   : > { %6040 = vst [vmem:[%s12083_s13 + $0x70] sm:$0xff] %v6006_v37  ;;  %v5976_v62 = vadd.f32 %v6593_v22, %v5912_v38  ;;  %v5876_v23 = vmul.f32 %v12065_v14, %v5751_v53  ;;  %v6606_v53 = vld [vmem:[%s10102_s22 + $0x171] sm:$0xff] }
 0x602   : > { %v6009_v20 = vmax.f32 %v5977_v47, 0.0  ;;  %v5915_v9 = vadd.f32 %v12070_v51, %v5877_v48 }
 0x603   : > { %v6008_v26 = vmax.f32 %v5976_v62, 0.0  ;;  %v5914_v12 = vadd.f32 %v12070_v51, %v5876_v23  ;;  %v8900_v27 = vpop.f32.mrb[20].mxu1 }
 0x604   : > { %6043 = vst [vmem:[%s12083_s13 + $0x88] sm:$0xff] %v6009_v20  ;;  %v5979_v7 = vadd.f32 %v6596_v63, %v5915_v9  ;;  %v5879_v45 = vmul.f32 %v8900_v27, %v12065_v14  ;;  %v5761_v30 = vpop.f32.mrb[21].mxu1  ;;  %v6605_v20 = vld [vmem:[%s10102_s22 + $0x169] sm:$0xff] }
 0x605   : > { %6042 = vst [vmem:[%s12083_s13 + $0x80] sm:$0xff] %v6008_v26  ;;  %v5978_v55 = vadd.f32 %v6595_v57, %v5914_v12  ;;  %v5878_v40 = vmul.f32 %v12065_v14, %v5761_v30  ;;  %v6608_v30 = vld [vmem:[%s10102_s22 + $0x189] sm:$0xff] }
 0x606   : > { %v6011_v17 = vmax.f32 %v5979_v7, 0.0  ;;  %v5917_v56 = vadd.f32 %v12070_v51, %v5879_v45 }
 0x607   : > { %v6010_v60 = vmax.f32 %v5978_v55, 0.0  ;;  %v5916_v28 = vadd.f32 %v12070_v51, %v5878_v40  ;;  %v8903_v13 = vpop.f32.mrb[22].mxu1 }
 0x608   : > { %6045 = vst [vmem:[%s12083_s13 + $0x98] sm:$0xff] %v6011_v17  ;;  %v5981_v35 = vadd.f32 %v6598_v21, %v5917_v56  ;;  %v5881_v42 = vmul.f32 %v8903_v13, %v12065_v14  ;;  %v5771_v49 = vpop.f32.mrb[23].mxu1  ;;  %v6607_v17 = vld [vmem:[%s10102_s22 + $0x181] sm:$0xff] }
 0x609   : > { %6044 = vst [vmem:[%s12083_s13 + $0x90] sm:$0xff] %v6010_v60  ;;  %v5980_v15 = vadd.f32 %v6597_v0, %v5916_v28  ;;  %v5880_v32 = vmul.f32 %v12065_v14, %v5771_v49 }
 0x60a   : > { %v6013_v39 = vmax.f32 %v5981_v35, 0.0  ;;  %v5919_v54 = vadd.f32 %v12070_v51, %v5881_v42 }
 0x60b   : > { %v6012_v58 = vmax.f32 %v5980_v15, 0.0  ;;  %v5918_v34 = vadd.f32 %v12070_v51, %v5880_v32  ;;  %v8906_v10 = vpop.f32.mrb[24].mxu1 }
 0x60c   : > { %6047 = vst [vmem:[%s12083_s13 + $0xa8] sm:$0xff] %v6013_v39  ;;  %v5983_v24 = vadd.f32 %v6600_v16, %v5919_v54  ;;  %v5883_v3 = vmul.f32 %v8906_v10, %v12065_v14  ;;  %v5781_v46 = vpop.f32.mrb[25].mxu1 }
 0x60d   : > { %6046 = vst [vmem:[%s12083_s13 + $0xa0] sm:$0xff] %v6012_v58  ;;  %v5982_v36 = vadd.f32 %v6599_v31, %v5918_v34  ;;  %v5882_v41 = vmul.f32 %v12065_v14, %v5781_v46 }
 0x60e   : > { %v6015_v4 = vmax.f32 %v5983_v24, 0.0  ;;  %v5921_v18 = vadd.f32 %v12070_v51, %v5883_v3 }
 0x60f   : > { %v6014_v61 = vmax.f32 %v5982_v36, 0.0  ;;  %v5920_v1 = vadd.f32 %v12070_v51, %v5882_v41  ;;  %v8909_v2 = vpop.f32.mrb[26].mxu1 }
 0x610   : > { %6049 = vst [vmem:[%s12083_s13 + $0xb8] sm:$0xff] %v6015_v4  ;;  %v5985_v5 = vadd.f32 %v6602_v25, %v5921_v18  ;;  %v5885_v6 = vmul.f32 %v8909_v2, %v12065_v14  ;;  %v5791_v33 = vpop.f32.mrb[27].mxu1 }
 0x611   : > { %6048 = vst [vmem:[%s12083_s13 + $0xb0] sm:$0xff] %v6014_v61  ;;  %v5984_v43 = vadd.f32 %v6601_v50, %v5920_v1  ;;  %v5884_v52 = vmul.f32 %v12065_v14, %v5791_v33 }
 0x612   : > { %v6017_v59 = vmax.f32 %v5985_v5, 0.0  ;;  %v5923_v8 = vadd.f32 %v12070_v51, %v5885_v6 }
 0x613   : > { %v6016_v29 = vmax.f32 %v5984_v43, 0.0  ;;  %v5922_v22 = vadd.f32 %v12070_v51, %v5884_v52  ;;  %v8912_v37 = vpop.f32.mrb[28].mxu1 }
 0x614   : > { %6051 = vst [vmem:[%s12083_s13 + $0xc8] sm:$0xff] %v6017_v59  ;;  %v5987_v38 = vadd.f32 %v6604_v11, %v5923_v8  ;;  %v5887_v44 = vmul.f32 %v8912_v37, %v12065_v14  ;;  %v5801_v47 = vpop.f32.mrb[29].mxu1 }
 0x615   : > { %6050 = vst [vmem:[%s12083_s13 + $0xc0] sm:$0xff] %v6016_v29  ;;  %v5986_v48 = vadd.f32 %v6603_v19, %v5922_v22  ;;  %v5886_v62 = vmul.f32 %v12065_v14, %v5801_v47 }
 0x616   : > { %v6019_v63 = vmax.f32 %v5987_v38, 0.0  ;;  %v5925_v23 = vadd.f32 %v12070_v51, %v5887_v44 }
 0x617   : > { %v6018_v9 = vmax.f32 %v5986_v48, 0.0  ;;  %v5924_v57 = vadd.f32 %v12070_v51, %v5886_v62  ;;  %v8915_v26 = vpop.f32.mrb[30].mxu1 }
 0x618   : > { %6053 = vst [vmem:[%s12083_s13 + $0xd8] sm:$0xff] %v6019_v63  ;;  %v5989_v12 = vadd.f32 %v6606_v53, %v5925_v23  ;;  %v5889_v27 = vmul.f32 %v8915_v26, %v12065_v14  ;;  %v5811_v7 = vpop.f32.mrb[31].mxu1 }
 0x619   : > { %6052 = vst [vmem:[%s12083_s13 + $0xd0] sm:$0xff] %v6018_v9  ;;  %v5988_v45 = vadd.f32 %v6605_v20, %v5924_v57  ;;  %v5888_v55 = vmul.f32 %v12065_v14, %v5811_v7 }
 0x61a   : > { %v6021_v21 = vmax.f32 %v5989_v12, 0.0  ;;  %v5927_v40 = vadd.f32 %v12070_v51, %v5889_v27 }
 0x61b   : > { %v6020_v56 = vmax.f32 %v5988_v45, 0.0  ;;  %v5926_v0 = vadd.f32 %v12070_v51, %v5888_v55 }
 0x61c   : > { %6055 = vst [vmem:[%s12083_s13 + $0xe8] sm:$0xff] %v6021_v21  ;;  %v5991_v60 = vadd.f32 %v6608_v30, %v5927_v40 }
 0x61d   : > { %6054 = vst [vmem:[%s12083_s13 + $0xe0] sm:$0xff] %v6020_v56  ;;  %v5990_v28 = vadd.f32 %v6607_v17, %v5926_v0 }
 0x61e   : > { %v6023_v13 = vmax.f32 %v5991_v60, 0.0 }
 0x61f   : > { %v6022_v35 = vmax.f32 %v5990_v28, 0.0 }
 0x620   : > { %6057 = vst [vmem:[%s12083_s13 + $0xf8] sm:$0xff] %v6023_v13 }
 0x621   : > { %6056 = vst [vmem:[%s12083_s13 + $0xf0] sm:$0xff] %v6022_v35 }
 0x622 PF: > { %s17_s24 = sadd.s32 1, %s10021_s24  }
 0x623   : > { %p14_p4 = scmp.ge.s32.totalorder %s17_s24, 4  }
 0x625   :  { %16 = sbr.rel (!%p14_p4) target bundleno = 1 (0x1), region = 103 }

</bundles_post_ra>
